<compile_context>
chip_gen: v7x
topology: tpu7x:2x2x1
jax: 0.10.0
libtpu: 0.0.40
codegen_flags: <defaults>
</compile_context>

<pallas_src>
import math
from functools import partial

import jax
import jax.numpy as jnp
from jax.experimental import pallas as pl
from jax.experimental.pallas import tpu as pltpu


# ------------------------------ Pallas kernel ------------------------------ #
def _self_attn_kernel(x_ref, pos_ref, wqk_ref, bqk_ref, wv_ref, bv_ref,
                      wout_ref, bout_ref, gamma_ref, beta_ref, hmask_ref,
                      out_ref, *attn_refs, nhead, eps, need_weights):
    f32 = jnp.float32
    NB, L, E = x_ref.shape

    x = x_ref[...]                                   # (NB, L, E), matmul dtype
    pos = pos_ref[...]
    md = x.dtype

    x2 = x.reshape(NB * L, E)
    qk2 = (x + pos).reshape(NB * L, E)               # q = k = tgt + query_pos

    # ---- fused input projections: two big (NB*L, E) x (E, .) MXU matmuls ----
    # (w_qk_t already carries the 1/sqrt(head_dim) scale folded into q cols)
    qk = jnp.dot(qk2, wqk_ref[...], preferred_element_type=f32) + bqk_ref[...]
    v2 = jnp.dot(x2, wv_ref[...], preferred_element_type=f32) + bv_ref[...]

    q3 = qk[:, :E].reshape(NB, L, E)                       # f32
    k3 = qk[:, E:].astype(md).reshape(NB, L, E)            # matmul dtype
    v3 = v2.astype(md).reshape(NB, L, E)

    # ---- block-diagonal head separation (no per-head matmul loop) ----
    # Row m = h*L + j of the replicated K/V is key j of head h; masking with
    # the host-built 0/1 head mask keeps only head h's feature columns, so one
    # batched einsum yields every head's scores / context at once.  K/V are
    # built once, already in matmul_dtype.
    hmask = hmask_ref[...]                                 # (HL, E)
    k_bd = jnp.concatenate([k3] * nhead, axis=1) * hmask   # (NB, HL, E)
    v_bd = jnp.concatenate([v3] * nhead, axis=1) * hmask   # (NB, HL, E)

    s = jnp.einsum("bie,bje->bij", q3.astype(md), k_bd,
                   preferred_element_type=f32)             # (NB, L, HL)

    # ---- exact per-head softmax over static L-wide column slices (f32) ----
    # Per-head max (not the row-global max) -> numerically identical to the
    # reference even when heads' logit ranges differ wildly.
    p_parts = []
    for h in range(nhead):                                 # static Python loop
        s_h = s[:, :, h * L:(h + 1) * L]                   # (NB, L, L)
        s_h = s_h - jnp.max(s_h, axis=-1, keepdims=True)
        e_h = jnp.exp(s_h)
        d_h = jnp.sum(e_h, axis=-1, keepdims=True)
        # exact reciprocal when the weights are returned; EUP approx otherwise
        p_parts.append(e_h * pl.reciprocal(d_h, approx=not need_weights))
    p = jnp.concatenate(p_parts, axis=-1)                  # (NB, L, HL)

    if need_weights:
        attn_ref, = attn_refs
        attn = p_parts[0]
        for h in range(1, nhead):
            attn = attn + p_parts[h]
        attn_ref[...] = (attn * (1.0 / nhead)).astype(attn_ref.dtype)

    # ---- context + output projection ----
    ctx = jnp.einsum("bij,bje->bie", p.astype(md), v_bd,
                     preferred_element_type=f32)           # (NB, L, E)
    attn_out = jnp.dot(ctx.reshape(NB * L, E).astype(md), wout_ref[...],
                       preferred_element_type=f32) + bout_ref[...]

    # ---- residual + LayerNorm (dropout = 0.0 -> identity), in f32 ----
    y = x2.astype(f32) + attn_out
    mean = jnp.mean(y, axis=-1, keepdims=True)
    var = jnp.mean(jnp.square(y - mean), axis=-1, keepdims=True)
    y = (y - mean) * jax.lax.rsqrt(var + eps)
    y = y * gamma_ref[...] + beta_ref[...]
    out_ref[...] = y.reshape(NB, L, E).astype(out_ref.dtype)


# ------------------------------ VMEM sizing --------------------------------- #
def _estimate_step_vmem_bytes(nb, L, E, nhead, mm_bytes, need_weights):
    """Rough per-grid-step VMEM working set (pipelined operands + temporaries)."""
    HL = nhead * L
    rows = nb * L
    f32b = 4
    # pipelined activation tiles (x2 for double buffering) + outputs
    acts = 2 * (2 * rows * E * mm_bytes + rows * E * f32b
                + (rows * L * f32b if need_weights else 0))
    # replicated weights / constants (assume 2 buffers worst case)
    wts = 2 * ((4 * E * E + HL * E) * mm_bytes + 8 * E * f32b)
    # dominant in-body temporaries
    tmp = (rows * 3 * E * f32b            # qk, v2 (f32 accumulators)
           + 2 * nb * HL * E * mm_bytes   # k_bd, v_bd
           + 2 * rows * HL * f32b         # s, p
           + 2 * rows * E * f32b)         # ctx, y
    return int(1.25 * (acts + wts + tmp))


def _pick_batch_block(n, L, E, nhead, mm_bytes, need_weights,
                      vmem_budget_bytes, num_tensorcores):
    """Largest batch block whose working set fits the VMEM budget.

    Single-TC chips (v5e/v6e): one big step (better MXU fill, fewer per-step
    pipeline overheads).  Multi-TC chips (v7x): keep the parallel grid axis a
    multiple of num_tensorcores so every core gets work, still VMEM-bounded.
    """
    group = max(1, int(num_tensorcores))
    nb_fit, lo, hi = 1, 1, max(n, 1)
    while lo <= hi:                         # est() is monotone in nb
        mid = (lo + hi) // 2
        if _estimate_step_vmem_bytes(mid, L, E, nhead, mm_bytes,
                                     need_weights) <= vmem_budget_bytes:
            nb_fit, lo = mid, mid + 1
        else:
            hi = mid - 1
    steps = pl.cdiv(n, nb_fit)
    if group > 1 and n >= group:
        steps = group * pl.cdiv(max(steps, group), group)
    return pl.cdiv(n, steps)


# ------------------------------ wrapper ------------------------------------- #
def self_attention_layer(tgt, query_pos, params, *, nhead, eps=1e-5,
                         matmul_dtype=jnp.bfloat16, need_weights=True,
                         batch_block=None, num_tensorcores=1,
                         vmem_budget_bytes=48 * 1024 * 1024,
                         batch_major=False, out_dtype=None):
    """Pallas forward of SelfAttentionLayer.forward_post (dropout=0, no masks).

    tgt, query_pos: (L, N, E)  (PyTorch MultiheadAttention convention), or
                    (N, L, E) if batch_major=True (skips the layout transpose).
    returns: (tgt_out (same convention as input), attn (N, L, L) or None)
    """
    if batch_major:
        N, L, E = tgt.shape
        x, pos = tgt, query_pos
    else:
        L, N, E = tgt.shape
        x = jnp.transpose(tgt, (1, 0, 2))
        pos = jnp.transpose(query_pos, (1, 0, 2))
    assert E % nhead == 0, "d_model must be divisible by nhead"
    hd = E // nhead
    HL = nhead * L
    scale = 1.0 / math.sqrt(hd)
    md = matmul_dtype
    mm_bytes = jnp.dtype(md).itemsize
    out_dtype = out_dtype or tgt.dtype

    # activations enter the kernel already in matmul_dtype (the cast fuses
    # with the layout transpose; bf16 halves the HBM->VMEM DMA bytes)
    x = x.astype(md)
    pos = pos.astype(md)

    nb = batch_block or _pick_batch_block(N, L, E, nhead, mm_bytes,
                                          need_weights, vmem_budget_bytes,
                                          num_tensorcores)
    steps = pl.cdiv(N, nb)
    n_pad = steps * nb
    if n_pad != N:                           # pad only when nb doesn't divide N
        x = jnp.pad(x, ((0, n_pad - N), (0, 0), (0, 0)))
        pos = jnp.pad(pos, ((0, n_pad - N), (0, 0), (0, 0)))

    # --- host-side weight prep: transpose / split / fold q scale / cast ---
    w_in = params["in_proj_weight"].astype(jnp.float32)          # (3E, E): q,k,v
    b_in = params["in_proj_bias"].astype(jnp.float32)            # (3E,)
    w_qk_t = jnp.concatenate([w_in[:E].T * scale, w_in[E:2 * E].T],
                             axis=1).astype(md)                  # (E, 2E)
    b_qk = jnp.concatenate([b_in[:E] * scale, b_in[E:2 * E]]).reshape(1, 2 * E)
    w_v_t = w_in[2 * E:].T.astype(md)                            # (E, E)
    b_v = b_in[2 * E:].reshape(1, E)
    w_out_t = params["out_proj_weight"].astype(jnp.float32).T.astype(md)
    b_out = params["out_proj_bias"].astype(jnp.float32).reshape(1, E)
    gamma = params["ln_weight"].astype(jnp.float32).reshape(1, E)
    beta = params["ln_bias"].astype(jnp.float32).reshape(1, E)
    # grid-invariant block-diagonal head mask, built once on the host
    head_mask = (jnp.arange(HL)[:, None] // L ==
                 jnp.arange(E)[None, :] // hd).astype(md)        # (HL, E)

    kernel = partial(_self_attn_kernel, nhead=nhead, eps=eps,
                     need_weights=need_weights)

    est = _estimate_step_vmem_bytes(nb, L, E, nhead, mm_bytes, need_weights)
    vmem_limit = None
    if est > (16 << 20):   # raise the scoped-VMEM default only when needed
        vmem_limit = int(min(max(est, 32 << 20), 64 << 20))

    seq_spec = pl.BlockSpec((nb, L, E), lambda i: (i, 0, 0))
    out_shape = [jax.ShapeDtypeStruct((n_pad, L, E), out_dtype)]
    out_specs = [pl.BlockSpec((nb, L, E), lambda i: (i, 0, 0))]
    if need_weights:
        out_shape.append(jax.ShapeDtypeStruct((n_pad, L, L), jnp.float32))
        out_specs.append(pl.BlockSpec((nb, L, L), lambda i: (i, 0, 0)))
    # TODO(synk): for production shapes keep E and L multiples of 128 so these
    # output stores stay lane-dense (unmasked vst); not padded here to avoid an
    # extra wrapper-side HBM round trip at small shapes.

    def build_call(single_buffer_weights):
        def rep(shape):
            kwargs = {}
            if single_buffer_weights:
                # weights/constants never change across grid steps -> 1 buffer
                kwargs["pipeline_mode"] = pl.Buffered(1)
            return pl.BlockSpec(shape, lambda i: (0,) * len(shape), **kwargs)

        return pl.pallas_call(
            kernel,
            out_shape=tuple(out_shape),
            grid_spec=pltpu.PrefetchScalarGridSpec(
                num_scalar_prefetch=0,
                grid=(steps,),
                in_specs=[
                    seq_spec,               # tgt (batch-major, matmul dtype)
                    seq_spec,               # query_pos
                    rep((E, 2 * E)),        # w_qk_t (q-scale folded in)
                    rep((1, 2 * E)),        # b_qk (f32)
                    rep((E, E)),            # w_v_t
                    rep((1, E)),            # b_v (f32)
                    rep((E, E)),            # w_out_t
                    rep((1, E)),            # b_out (f32)
                    rep((1, E)),            # ln gamma (f32)
                    rep((1, E)),            # ln beta (f32)
                    rep((HL, E)),           # block-diagonal head mask
                ],
                out_specs=out_specs,
            ),
            compiler_params=pltpu.CompilerParams(
                dimension_semantics=("parallel",),
                vmem_limit_bytes=vmem_limit),
        )

    args = (x, pos, w_qk_t, b_qk, w_v_t, b_v, w_out_t, b_out, gamma, beta,
            head_mask)
    try:
        results = build_call(True)(*args)
    except Exception:
        # This jax build does not take pipeline_mode on pallas_call BlockSpecs;
        # fall back to default double-buffered weight tiles (same results,
        # slightly more VMEM).
        results = build_call(False)(*args)

    out = results[0]
    attn = results[1] if need_weights else None
    if n_pad != N:
        out = out[:N]
        if attn is not None:
            attn = attn[:N]
    if not batch_major:
        out = jnp.transpose(out, (1, 0, 2))          # back to (L, N, E)
    return out, attn


# ------------------------------ reference (pure JAX) ------------------------ #
def reference(tgt, query_pos, params, *, nhead, eps=1e-5):
    L, N, E = tgt.shape
    hd = E // nhead
    x = jnp.transpose(tgt, (1, 0, 2)).astype(jnp.float32)
    pos = jnp.transpose(query_pos, (1, 0, 2)).astype(jnp.float32)
    qk_in = x + pos
    w_in, b_in = params["in_proj_weight"], params["in_proj_bias"]
    q = qk_in @ w_in[:E].T + b_in[:E]
    k = qk_in @ w_in[E:2 * E].T + b_in[E:2 * E]
    v = x @ w_in[2 * E:].T + b_in[2 * E:]
    q = q.reshape(N, L, nhead, hd).transpose(0, 2, 1, 3) / math.sqrt(hd)
    k = k.reshape(N, L, nhead, hd).transpose(0, 2, 1, 3)
    v = v.reshape(N, L, nhead, hd).transpose(0, 2, 1, 3)
    s = jnp.einsum("nhqd,nhkd->nhqk", q, k)
    p = jax.nn.softmax(s, axis=-1)
    ctx = jnp.einsum("nhqk,nhkd->nhqd", p, v).transpose(0, 2, 1, 3).reshape(N, L, E)
    attn_out = ctx @ params["out_proj_weight"].T + params["out_proj_bias"]
    y = x + attn_out
    mean = y.mean(-1, keepdims=True)
    var = ((y - mean) ** 2).mean(-1, keepdims=True)
    y = (y - mean) / jnp.sqrt(var + eps) * params["ln_weight"] + params["ln_bias"]
    return jnp.transpose(y, (1, 0, 2)), p.mean(axis=1)


# ------------------------------ main ---------------------------------------- #
def _xavier_uniform(key, shape):
    fan_out, fan_in = shape
    a = math.sqrt(6.0 / (fan_in + fan_out))
    return jax.random.uniform(key, shape, jnp.float32, -a, a)


if __name__ == "__main__":
    d_model, nhead, L, N = 32, 4, 8, 4

    key = jax.random.PRNGKey(0)
    keys = jax.random.split(key, 8)

    params = {
        "in_proj_weight": _xavier_uniform(keys[0], (3 * d_model, d_model)),
        "in_proj_bias": 0.1 * jax.random.normal(keys[1], (3 * d_model,), jnp.float32),
        "out_proj_weight": _xavier_uniform(keys[2], (d_model, d_model)),
        "out_proj_bias": 0.1 * jax.random.normal(keys[3], (d_model,), jnp.float32),
        "ln_weight": 1.0 + 0.1 * jax.random.normal(keys[4], (d_model,), jnp.float32),
        "ln_bias": 0.1 * jax.random.normal(keys[5], (d_model,), jnp.float32),
    }

    tgt = jax.random.normal(keys[6], (L, N, d_model), jnp.float32)
    query_pos = jax.random.normal(keys[7], (L, N, d_model), jnp.float32)

    ref_out, ref_attn = reference(tgt, query_pos, params, nhead=nhead)

    # 1) f32 MXU operands, attention weights returned (exact-path check)
    out, attn = self_attention_layer(tgt, query_pos, params, nhead=nhead,
                                     matmul_dtype=jnp.float32)
    out, attn = jax.block_until_ready((out, attn))
    assert out.shape == (L, N, d_model) and attn.shape == (N, L, L)
    assert jnp.allclose(out, ref_out, atol=1e-4, rtol=1e-4), "output mismatch (f32)"
    assert jnp.allclose(attn, ref_attn, atol=2e-5, rtol=1e-4), "attn mismatch (f32)"

    # 2) default bf16-at-the-boundary path (v6e/v7x MXU throughput)
    out2, attn2 = self_attention_layer(tgt, query_pos, params, nhead=nhead)
    out2, attn2 = jax.block_until_ready((out2, attn2))
    assert jnp.allclose(out2, ref_out, atol=5e-2, rtol=5e-2), "output mismatch (bf16)"
    assert jnp.allclose(attn2, ref_attn, atol=3e-2, rtol=5e-2), "attn mismatch (bf16)"

    # 3) need_weights=False fast path with 2 parallel grid steps (v7x-style)
    out3, attn3 = self_attention_layer(tgt, query_pos, params, nhead=nhead,
                                       need_weights=False, num_tensorcores=2)
    out3 = jax.block_until_ready(out3)
    assert attn3 is None
    assert jnp.allclose(out3, ref_out, atol=5e-2, rtol=5e-2), "output mismatch (fast path)"

    print("KERNEL_OK")
</pallas_src>

<mosaic_0001>
module attributes {stable_mosaic.version = 11 : i64} {
  func.func @_self_attn_kernel(%arg0: i32, %arg1: memref<4x8x32xf32, #tpu.memory_space<vmem>>, %arg2: memref<4x8x32xf32, #tpu.memory_space<vmem>>, %arg3: memref<32x64xf32, #tpu.memory_space<vmem>>, %arg4: memref<1x64xf32, #tpu.memory_space<vmem>>, %arg5: memref<32x32xf32, #tpu.memory_space<vmem>>, %arg6: memref<1x32xf32, #tpu.memory_space<vmem>>, %arg7: memref<32x32xf32, #tpu.memory_space<vmem>>, %arg8: memref<1x32xf32, #tpu.memory_space<vmem>>, %arg9: memref<1x32xf32, #tpu.memory_space<vmem>>, %arg10: memref<1x32xf32, #tpu.memory_space<vmem>>, %arg11: memref<32x32xf32, #tpu.memory_space<vmem>>, %arg12: memref<4x8x32xf32, #tpu.memory_space<vmem>>, %arg13: memref<4x8x8xf32, #tpu.memory_space<vmem>>) attributes {dimension_semantics = [#tpu.dimension_semantics<parallel>], iteration_bounds = array<i64: 1>, scalar_prefetch = 0 : i64, scratch_operands = 0 : i64, tpu.core_type = #tpu.core_type<tc>, window_params = [{transform_indices = @transform_0, window_bounds = array<i64: 4, 8, 32>}, {transform_indices = @transform_1, window_bounds = array<i64: 4, 8, 32>}, {pipeline_mode = #tpu.pipeline_mode<synchronous>, transform_indices = @transform_2, window_bounds = array<i64: 32, 64>}, {pipeline_mode = #tpu.pipeline_mode<synchronous>, transform_indices = @transform_3, window_bounds = array<i64: 1, 64>}, {pipeline_mode = #tpu.pipeline_mode<synchronous>, transform_indices = @transform_4, window_bounds = array<i64: 32, 32>}, {pipeline_mode = #tpu.pipeline_mode<synchronous>, transform_indices = @transform_5, window_bounds = array<i64: 1, 32>}, {pipeline_mode = #tpu.pipeline_mode<synchronous>, transform_indices = @transform_6, window_bounds = array<i64: 32, 32>}, {pipeline_mode = #tpu.pipeline_mode<synchronous>, transform_indices = @transform_7, window_bounds = array<i64: 1, 32>}, {pipeline_mode = #tpu.pipeline_mode<synchronous>, transform_indices = @transform_8, window_bounds = array<i64: 1, 32>}, {pipeline_mode = #tpu.pipeline_mode<synchronous>, transform_indices = @transform_9, window_bounds = array<i64: 1, 32>}, {pipeline_mode = #tpu.pipeline_mode<synchronous>, transform_indices = @transform_10, window_bounds = array<i64: 32, 32>}, {transform_indices = @transform_11, window_bounds = array<i64: 4, 8, 32>}, {transform_indices = @transform_12, window_bounds = array<i64: 4, 8, 8>}]} {
    %c0 = arith.constant 0 : index
    %c0_0 = arith.constant 0 : index
    %c0_1 = arith.constant 0 : index
    %0 = vector.load %arg1[%c0, %c0_0, %c0_1] : memref<4x8x32xf32, #tpu.memory_space<vmem>>, vector<4x8x32xf32>
    %c0_2 = arith.constant 0 : index
    %c0_3 = arith.constant 0 : index
    %c0_4 = arith.constant 0 : index
    %1 = vector.load %arg2[%c0_2, %c0_3, %c0_4] : memref<4x8x32xf32, #tpu.memory_space<vmem>>, vector<4x8x32xf32>
    %2 = vector.shape_cast %0 : vector<4x8x32xf32> to vector<32x32xf32>
    %3 = arith.addf %0, %1 : vector<4x8x32xf32>
    %4 = vector.shape_cast %3 : vector<4x8x32xf32> to vector<32x32xf32>
    %c0_5 = arith.constant 0 : index
    %c0_6 = arith.constant 0 : index
    %5 = vector.load %arg3[%c0_5, %c0_6] : memref<32x64xf32, #tpu.memory_space<vmem>>, vector<32x64xf32>
    %cst = arith.constant dense<0.000000e+00> : vector<32x64xf32>
    %6 = tpu.matmul %4, %5, %cst {dimension_numbers = #tpu.dot_dimension_numbers<[1], [0], [0], [1], [0, 0, 1, 1], [], []>} : vector<32x32xf32>, vector<32x64xf32>, vector<32x64xf32> -> vector<32x64xf32>
    %c0_7 = arith.constant 0 : index
    %c0_8 = arith.constant 0 : index
    %7 = vector.load %arg4[%c0_7, %c0_8] : memref<1x64xf32, #tpu.memory_space<vmem>>, vector<1x64xf32>
    %8 = vector.broadcast %7 : vector<1x64xf32> to vector<32x64xf32>
    %9 = arith.addf %6, %8 : vector<32x64xf32>
    %c0_9 = arith.constant 0 : index
    %c0_10 = arith.constant 0 : index
    %10 = vector.load %arg5[%c0_9, %c0_10] : memref<32x32xf32, #tpu.memory_space<vmem>>, vector<32x32xf32>
    %cst_11 = arith.constant dense<0.000000e+00> : vector<32x32xf32>
    %11 = tpu.matmul %2, %10, %cst_11 {dimension_numbers = #tpu.dot_dimension_numbers<[1], [0], [0], [1], [0, 0, 1, 1], [], []>} : vector<32x32xf32>, vector<32x32xf32>, vector<32x32xf32> -> vector<32x32xf32>
    %c0_12 = arith.constant 0 : index
    %c0_13 = arith.constant 0 : index
    %12 = vector.load %arg6[%c0_12, %c0_13] : memref<1x32xf32, #tpu.memory_space<vmem>>, vector<1x32xf32>
    %13 = vector.broadcast %12 : vector<1x32xf32> to vector<32x32xf32>
    %14 = arith.addf %11, %13 : vector<32x32xf32>
    %15 = vector.extract_strided_slice %9 {offsets = [0, 0], sizes = [32, 32], strides = [1, 1]} : vector<32x64xf32> to vector<32x32xf32>
    %16 = vector.shape_cast %15 : vector<32x32xf32> to vector<4x8x32xf32>
    %17 = vector.extract_strided_slice %9 {offsets = [0, 32], sizes = [32, 32], strides = [1, 1]} : vector<32x64xf32> to vector<32x32xf32>
    %18 = vector.shape_cast %17 : vector<32x32xf32> to vector<4x8x32xf32>
    %19 = vector.shape_cast %14 : vector<32x32xf32> to vector<4x8x32xf32>
    %c0_14 = arith.constant 0 : index
    %c0_15 = arith.constant 0 : index
    %20 = vector.load %arg11[%c0_14, %c0_15] : memref<32x32xf32, #tpu.memory_space<vmem>>, vector<32x32xf32>
    %21 = tpu.concatenate %18, %18, %18, %18 in 1 : vector<4x8x32xf32>, vector<4x8x32xf32>, vector<4x8x32xf32>, vector<4x8x32xf32> -> vector<4x32x32xf32>
    %22 = vector.shape_cast %20 : vector<32x32xf32> to vector<1x32x32xf32>
    %23 = vector.broadcast %22 : vector<1x32x32xf32> to vector<4x32x32xf32>
    %24 = arith.mulf %21, %23 : vector<4x32x32xf32>
    %25 = tpu.concatenate %19, %19, %19, %19 in 1 : vector<4x8x32xf32>, vector<4x8x32xf32>, vector<4x8x32xf32>, vector<4x8x32xf32> -> vector<4x32x32xf32>
    %26 = vector.shape_cast %20 : vector<32x32xf32> to vector<1x32x32xf32>
    %27 = vector.broadcast %26 : vector<1x32x32xf32> to vector<4x32x32xf32>
    %28 = arith.mulf %25, %27 : vector<4x32x32xf32>
    "tpu.trace_start"() <{level = 10 : i32, message = "bie,bje->bij"}> : () -> ()
    %cst_16 = arith.constant dense<0.000000e+00> : vector<4x8x32xf32>
    %29 = tpu.matmul %16, %24, %cst_16 {dimension_numbers = #tpu.dot_dimension_numbers<[2], [2], [1], [1], [0, 0, 0, 1, 1, 1], [0], [0]>} : vector<4x8x32xf32>, vector<4x32x32xf32>, vector<4x8x32xf32> -> vector<4x8x32xf32>
    "tpu.trace_stop"() : () -> ()
    %30 = vector.extract_strided_slice %29 {offsets = [0, 0, 0], sizes = [4, 8, 8], strides = [1, 1, 1]} : vector<4x8x32xf32> to vector<4x8x8xf32>
    %cst_17 = arith.constant dense<0xFF800000> : vector<4x8xf32>
    %31 = vector.multi_reduction <maximumf>, %30, %cst_17 [2] : vector<4x8x8xf32> to vector<4x8xf32>
    %32 = vector.shape_cast %31 : vector<4x8xf32> to vector<4x8x1xf32>
    %33 = vector.broadcast %32 : vector<4x8x1xf32> to vector<4x8x8xf32>
    %34 = arith.subf %30, %33 : vector<4x8x8xf32>
    %35 = math.exp %34 : vector<4x8x8xf32>
    %cst_18 = arith.constant dense<0.000000e+00> : vector<4x8xf32>
    %36 = vector.multi_reduction <add>, %35, %cst_18 [2] : vector<4x8x8xf32> to vector<4x8xf32>
    %37 = vector.shape_cast %36 : vector<4x8xf32> to vector<4x8x1xf32>
    %38 = tpu.reciprocal %37 : vector<4x8x1xf32> -> vector<4x8x1xf32>
    %39 = vector.broadcast %38 : vector<4x8x1xf32> to vector<4x8x8xf32>
    %40 = arith.mulf %35, %39 : vector<4x8x8xf32>
    %41 = vector.extract_strided_slice %29 {offsets = [0, 0, 8], sizes = [4, 8, 8], strides = [1, 1, 1]} : vector<4x8x32xf32> to vector<4x8x8xf32>
    %cst_19 = arith.constant dense<0xFF800000> : vector<4x8xf32>
    %42 = vector.multi_reduction <maximumf>, %41, %cst_19 [2] : vector<4x8x8xf32> to vector<4x8xf32>
    %43 = vector.shape_cast %42 : vector<4x8xf32> to vector<4x8x1xf32>
    %44 = vector.broadcast %43 : vector<4x8x1xf32> to vector<4x8x8xf32>
    %45 = arith.subf %41, %44 : vector<4x8x8xf32>
    %46 = math.exp %45 : vector<4x8x8xf32>
    %cst_20 = arith.constant dense<0.000000e+00> : vector<4x8xf32>
    %47 = vector.multi_reduction <add>, %46, %cst_20 [2] : vector<4x8x8xf32> to vector<4x8xf32>
    %48 = vector.shape_cast %47 : vector<4x8xf32> to vector<4x8x1xf32>
    %49 = tpu.reciprocal %48 : vector<4x8x1xf32> -> vector<4x8x1xf32>
    %50 = vector.broadcast %49 : vector<4x8x1xf32> to vector<4x8x8xf32>
    %51 = arith.mulf %46, %50 : vector<4x8x8xf32>
    %52 = vector.extract_strided_slice %29 {offsets = [0, 0, 16], sizes = [4, 8, 8], strides = [1, 1, 1]} : vector<4x8x32xf32> to vector<4x8x8xf32>
    %cst_21 = arith.constant dense<0xFF800000> : vector<4x8xf32>
    %53 = vector.multi_reduction <maximumf>, %52, %cst_21 [2] : vector<4x8x8xf32> to vector<4x8xf32>
    %54 = vector.shape_cast %53 : vector<4x8xf32> to vector<4x8x1xf32>
    %55 = vector.broadcast %54 : vector<4x8x1xf32> to vector<4x8x8xf32>
    %56 = arith.subf %52, %55 : vector<4x8x8xf32>
    %57 = math.exp %56 : vector<4x8x8xf32>
    %cst_22 = arith.constant dense<0.000000e+00> : vector<4x8xf32>
    %58 = vector.multi_reduction <add>, %57, %cst_22 [2] : vector<4x8x8xf32> to vector<4x8xf32>
    %59 = vector.shape_cast %58 : vector<4x8xf32> to vector<4x8x1xf32>
    %60 = tpu.reciprocal %59 : vector<4x8x1xf32> -> vector<4x8x1xf32>
    %61 = vector.broadcast %60 : vector<4x8x1xf32> to vector<4x8x8xf32>
    %62 = arith.mulf %57, %61 : vector<4x8x8xf32>
    %63 = vector.extract_strided_slice %29 {offsets = [0, 0, 24], sizes = [4, 8, 8], strides = [1, 1, 1]} : vector<4x8x32xf32> to vector<4x8x8xf32>
    %cst_23 = arith.constant dense<0xFF800000> : vector<4x8xf32>
    %64 = vector.multi_reduction <maximumf>, %63, %cst_23 [2] : vector<4x8x8xf32> to vector<4x8xf32>
    %65 = vector.shape_cast %64 : vector<4x8xf32> to vector<4x8x1xf32>
    %66 = vector.broadcast %65 : vector<4x8x1xf32> to vector<4x8x8xf32>
    %67 = arith.subf %63, %66 : vector<4x8x8xf32>
    %68 = math.exp %67 : vector<4x8x8xf32>
    %cst_24 = arith.constant dense<0.000000e+00> : vector<4x8xf32>
    %69 = vector.multi_reduction <add>, %68, %cst_24 [2] : vector<4x8x8xf32> to vector<4x8xf32>
    %70 = vector.shape_cast %69 : vector<4x8xf32> to vector<4x8x1xf32>
    %71 = tpu.reciprocal %70 : vector<4x8x1xf32> -> vector<4x8x1xf32>
    %72 = vector.broadcast %71 : vector<4x8x1xf32> to vector<4x8x8xf32>
    %73 = arith.mulf %68, %72 : vector<4x8x8xf32>
    %74 = tpu.concatenate %40, %51, %62, %73 in 2 : vector<4x8x8xf32>, vector<4x8x8xf32>, vector<4x8x8xf32>, vector<4x8x8xf32> -> vector<4x8x32xf32>
    %75 = arith.addf %40, %51 : vector<4x8x8xf32>
    %76 = arith.addf %75, %62 : vector<4x8x8xf32>
    %77 = arith.addf %76, %73 : vector<4x8x8xf32>
    %cst_25 = arith.constant 2.500000e-01 : f32
    %78 = vector.broadcast %cst_25 : f32 to vector<4x8x8xf32>
    %79 = arith.mulf %77, %78 : vector<4x8x8xf32>
    %c0_26 = arith.constant 0 : index
    %c0_27 = arith.constant 0 : index
    %c0_28 = arith.constant 0 : index
    %80 = vector.load %arg13[%c0_26, %c0_27, %c0_28] : memref<4x8x8xf32, #tpu.memory_space<vmem>>, vector<4x8x8xf32>
    tpu.vector_store %arg13[%c0_26, %c0_27, %c0_28], %79 {strides = array<i32>} : memref<4x8x8xf32, #tpu.memory_space<vmem>>, vector<4x8x8xf32>,
    "tpu.trace_start"() <{level = 10 : i32, message = "bij,bje->bie"}> : () -> ()
    %cst_29 = arith.constant dense<0.000000e+00> : vector<4x8x32xf32>
    %81 = tpu.matmul %74, %28, %cst_29 {dimension_numbers = #tpu.dot_dimension_numbers<[2], [1], [1], [2], [0, 0, 0, 1, 1, 2], [0], [0]>} : vector<4x8x32xf32>, vector<4x32x32xf32>, vector<4x8x32xf32> -> vector<4x8x32xf32>
    "tpu.trace_stop"() : () -> ()
    %82 = vector.shape_cast %81 : vector<4x8x32xf32> to vector<32x32xf32>
    %c0_30 = arith.constant 0 : index
    %c0_31 = arith.constant 0 : index
    %83 = vector.load %arg7[%c0_30, %c0_31] : memref<32x32xf32, #tpu.memory_space<vmem>>, vector<32x32xf32>
    %cst_32 = arith.constant dense<0.000000e+00> : vector<32x32xf32>
    %84 = tpu.matmul %82, %83, %cst_32 {dimension_numbers = #tpu.dot_dimension_numbers<[1], [0], [0], [1], [0, 0, 1, 1], [], []>} : vector<32x32xf32>, vector<32x32xf32>, vector<32x32xf32> -> vector<32x32xf32>
    %c0_33 = arith.constant 0 : index
    %c0_34 = arith.constant 0 : index
    %85 = vector.load %arg8[%c0_33, %c0_34] : memref<1x32xf32, #tpu.memory_space<vmem>>, vector<1x32xf32>
    %86 = vector.broadcast %85 : vector<1x32xf32> to vector<32x32xf32>
    %87 = arith.addf %84, %86 : vector<32x32xf32>
    %88 = arith.addf %2, %87 : vector<32x32xf32>
    %cst_35 = arith.constant dense<0.000000e+00> : vector<32xf32>
    %89 = vector.multi_reduction <add>, %88, %cst_35 [1] : vector<32x32xf32> to vector<32xf32>
    %90 = vector.shape_cast %89 : vector<32xf32> to vector<32x1xf32>
    %cst_36 = arith.constant 3.200000e+01 : f32
    %91 = vector.broadcast %cst_36 : f32 to vector<32x1xf32>
    %92 = arith.divf %90, %91 : vector<32x1xf32>
    %93 = vector.broadcast %92 : vector<32x1xf32> to vector<32x32xf32>
    %94 = arith.subf %88, %93 : vector<32x32xf32>
    %95 = arith.mulf %94, %94 : vector<32x32xf32>
    %cst_37 = arith.constant dense<0.000000e+00> : vector<32xf32>
    %96 = vector.multi_reduction <add>, %95, %cst_37 [1] : vector<32x32xf32> to vector<32xf32>
    %97 = vector.shape_cast %96 : vector<32xf32> to vector<32x1xf32>
    %cst_38 = arith.constant 3.200000e+01 : f32
    %98 = vector.broadcast %cst_38 : f32 to vector<32x1xf32>
    %99 = arith.divf %97, %98 : vector<32x1xf32>
    %100 = vector.broadcast %92 : vector<32x1xf32> to vector<32x32xf32>
    %101 = arith.subf %88, %100 : vector<32x32xf32>
    %cst_39 = arith.constant 9.99999974E-6 : f32
    %102 = vector.broadcast %cst_39 : f32 to vector<32x1xf32>
    %103 = arith.addf %99, %102 : vector<32x1xf32>
    %104 = math.rsqrt %103 : vector<32x1xf32>
    %105 = vector.broadcast %104 : vector<32x1xf32> to vector<32x32xf32>
    %106 = arith.mulf %101, %105 : vector<32x32xf32>
    %c0_40 = arith.constant 0 : index
    %c0_41 = arith.constant 0 : index
    %107 = vector.load %arg9[%c0_40, %c0_41] : memref<1x32xf32, #tpu.memory_space<vmem>>, vector<1x32xf32>
    %108 = vector.broadcast %107 : vector<1x32xf32> to vector<32x32xf32>
    %109 = arith.mulf %106, %108 : vector<32x32xf32>
    %c0_42 = arith.constant 0 : index
    %c0_43 = arith.constant 0 : index
    %110 = vector.load %arg10[%c0_42, %c0_43] : memref<1x32xf32, #tpu.memory_space<vmem>>, vector<1x32xf32>
    %111 = vector.broadcast %110 : vector<1x32xf32> to vector<32x32xf32>
    %112 = arith.addf %109, %111 : vector<32x32xf32>
    %113 = vector.shape_cast %112 : vector<32x32xf32> to vector<4x8x32xf32>
    %c0_44 = arith.constant 0 : index
    %c0_45 = arith.constant 0 : index
    %c0_46 = arith.constant 0 : index
    %114 = vector.load %arg12[%c0_44, %c0_45, %c0_46] : memref<4x8x32xf32, #tpu.memory_space<vmem>>, vector<4x8x32xf32>
    tpu.vector_store %arg12[%c0_44, %c0_45, %c0_46], %113 {strides = array<i32>} : memref<4x8x32xf32, #tpu.memory_space<vmem>>, vector<4x8x32xf32>,
    return
  }
  func.func @transform_0(%arg0: i32) -> (i32, i32, i32) {
    %c0_i32 = arith.constant 0 : i32
    %c0_i32_0 = arith.constant 0 : i32
    %c0_i32_1 = arith.constant 0 : i32
    return %arg0, %c0_i32, %c0_i32_0 : i32, i32, i32
  }
  func.func @transform_1(%arg0: i32) -> (i32, i32, i32) {
    %c0_i32 = arith.constant 0 : i32
    %c0_i32_0 = arith.constant 0 : i32
    %c0_i32_1 = arith.constant 0 : i32
    return %arg0, %c0_i32, %c0_i32_0 : i32, i32, i32
  }
  func.func @transform_2(%arg0: i32) -> (i32, i32) {
    %c0_i32 = arith.constant 0 : i32
    %c0_i32_0 = arith.constant 0 : i32
    %c0_i32_1 = arith.constant 0 : i32
    return %c0_i32, %c0_i32_0 : i32, i32
  }
  func.func @transform_3(%arg0: i32) -> (i32, i32) {
    %c0_i32 = arith.constant 0 : i32
    %c0_i32_0 = arith.constant 0 : i32
    %c0_i32_1 = arith.constant 0 : i32
    return %c0_i32, %c0_i32_0 : i32, i32
  }
  func.func @transform_4(%arg0: i32) -> (i32, i32) {
    %c0_i32 = arith.constant 0 : i32
    %c0_i32_0 = arith.constant 0 : i32
    %c0_i32_1 = arith.constant 0 : i32
    return %c0_i32, %c0_i32_0 : i32, i32
  }
  func.func @transform_5(%arg0: i32) -> (i32, i32) {
    %c0_i32 = arith.constant 0 : i32
    %c0_i32_0 = arith.constant 0 : i32
    %c0_i32_1 = arith.constant 0 : i32
    return %c0_i32, %c0_i32_0 : i32, i32
  }
  func.func @transform_6(%arg0: i32) -> (i32, i32) {
    %c0_i32 = arith.constant 0 : i32
    %c0_i32_0 = arith.constant 0 : i32
    %c0_i32_1 = arith.constant 0 : i32
    return %c0_i32, %c0_i32_0 : i32, i32
  }
  func.func @transform_7(%arg0: i32) -> (i32, i32) {
    %c0_i32 = arith.constant 0 : i32
    %c0_i32_0 = arith.constant 0 : i32
    %c0_i32_1 = arith.constant 0 : i32
    return %c0_i32, %c0_i32_0 : i32, i32
  }
  func.func @transform_8(%arg0: i32) -> (i32, i32) {
    %c0_i32 = arith.constant 0 : i32
    %c0_i32_0 = arith.constant 0 : i32
    %c0_i32_1 = arith.constant 0 : i32
    return %c0_i32, %c0_i32_0 : i32, i32
  }
  func.func @transform_9(%arg0: i32) -> (i32, i32) {
    %c0_i32 = arith.constant 0 : i32
    %c0_i32_0 = arith.constant 0 : i32
    %c0_i32_1 = arith.constant 0 : i32
    return %c0_i32, %c0_i32_0 : i32, i32
  }
  func.func @transform_10(%arg0: i32) -> (i32, i32) {
    %c0_i32 = arith.constant 0 : i32
    %c0_i32_0 = arith.constant 0 : i32
    %c0_i32_1 = arith.constant 0 : i32
    return %c0_i32, %c0_i32_0 : i32, i32
  }
  func.func @transform_11(%arg0: i32) -> (i32, i32, i32) {
    %c0_i32 = arith.constant 0 : i32
    %c0_i32_0 = arith.constant 0 : i32
    %c0_i32_1 = arith.constant 0 : i32
    return %arg0, %c0_i32, %c0_i32_0 : i32, i32, i32
  }
  func.func @transform_12(%arg0: i32) -> (i32, i32, i32) {
    %c0_i32 = arith.constant 0 : i32
    %c0_i32_0 = arith.constant 0 : i32
    %c0_i32_1 = arith.constant 0 : i32
    return %arg0, %c0_i32, %c0_i32_0 : i32, i32, i32
  }
}

module attributes {stable_mosaic.version = 11 : i64} {
  func.func @_self_attn_kernel(%arg0: i32, %arg1: memref<4x8x32xf32, #tpu.memory_space<vmem>>, %arg2: memref<4x8x32xf32, #tpu.memory_space<vmem>>, %arg3: memref<32x64xf32, #tpu.memory_space<vmem>>, %arg4: memref<1x64xf32, #tpu.memory_space<vmem>>, %arg5: memref<32x32xf32, #tpu.memory_space<vmem>>, %arg6: memref<1x32xf32, #tpu.memory_space<vmem>>, %arg7: memref<32x32xf32, #tpu.memory_space<vmem>>, %arg8: memref<1x32xf32, #tpu.memory_space<vmem>>, %arg9: memref<1x32xf32, #tpu.memory_space<vmem>>, %arg10: memref<1x32xf32, #tpu.memory_space<vmem>>, %arg11: memref<32x32xf32, #tpu.memory_space<vmem>>, %arg12: memref<4x8x32xf32, #tpu.memory_space<vmem>>, %arg13: memref<4x8x8xf32, #tpu.memory_space<vmem>>) attributes {dimension_semantics = [#tpu.dimension_semantics<parallel>], iteration_bounds = array<i64: 1>, scalar_prefetch = 0 : i64, scratch_operands = 0 : i64, tpu.core_type = #tpu.core_type<tc>, window_params = [{transform_indices = @transform_0, window_bounds = array<i64: 4, 8, 32>}, {transform_indices = @transform_1, window_bounds = array<i64: 4, 8, 32>}, {pipeline_mode = #tpu.pipeline_mode<synchronous>, transform_indices = @transform_2, window_bounds = array<i64: 32, 64>}, {pipeline_mode = #tpu.pipeline_mode<synchronous>, transform_indices = @transform_3, window_bounds = array<i64: 1, 64>}, {pipeline_mode = #tpu.pipeline_mode<synchronous>, transform_indices = @transform_4, window_bounds = array<i64: 32, 32>}, {pipeline_mode = #tpu.pipeline_mode<synchronous>, transform_indices = @transform_5, window_bounds = array<i64: 1, 32>}, {pipeline_mode = #tpu.pipeline_mode<synchronous>, transform_indices = @transform_6, window_bounds = array<i64: 32, 32>}, {pipeline_mode = #tpu.pipeline_mode<synchronous>, transform_indices = @transform_7, window_bounds = array<i64: 1, 32>}, {pipeline_mode = #tpu.pipeline_mode<synchronous>, transform_indices = @transform_8, window_bounds = array<i64: 1, 32>}, {pipeline_mode = #tpu.pipeline_mode<synchronous>, transform_indices = @transform_9, window_bounds = array<i64: 1, 32>}, {pipeline_mode = #tpu.pipeline_mode<synchronous>, transform_indices = @transform_10, window_bounds = array<i64: 32, 32>}, {transform_indices = @transform_11, window_bounds = array<i64: 4, 8, 32>}, {transform_indices = @transform_12, window_bounds = array<i64: 4, 8, 8>}]} {
    %c0 = arith.constant 0 : index
    %c0_0 = arith.constant 0 : index
    %c0_1 = arith.constant 0 : index
    %0 = vector.load %arg1[%c0, %c0_0, %c0_1] : memref<4x8x32xf32, #tpu.memory_space<vmem>>, vector<4x8x32xf32>
    %c0_2 = arith.constant 0 : index
    %c0_3 = arith.constant 0 : index
    %c0_4 = arith.constant 0 : index
    %1 = vector.load %arg2[%c0_2, %c0_3, %c0_4] : memref<4x8x32xf32, #tpu.memory_space<vmem>>, vector<4x8x32xf32>
    %2 = vector.shape_cast %0 : vector<4x8x32xf32> to vector<32x32xf32>
    %3 = arith.addf %0, %1 : vector<4x8x32xf32>
    %4 = vector.shape_cast %3 : vector<4x8x32xf32> to vector<32x32xf32>
    %c0_5 = arith.constant 0 : index
    %c0_6 = arith.constant 0 : index
    %5 = vector.load %arg3[%c0_5, %c0_6] : memref<32x64xf32, #tpu.memory_space<vmem>>, vector<32x64xf32>
    %cst = arith.constant dense<0.000000e+00> : vector<32x64xf32>
    %6 = tpu.matmul %4, %5, %cst {dimension_numbers = #tpu.dot_dimension_numbers<[1], [0], [0], [1], [0, 0, 1, 1], [], []>} : vector<32x32xf32>, vector<32x64xf32>, vector<32x64xf32> -> vector<32x64xf32>
    %c0_7 = arith.constant 0 : index
    %c0_8 = arith.constant 0 : index
    %7 = vector.load %arg4[%c0_7, %c0_8] : memref<1x64xf32, #tpu.memory_space<vmem>>, vector<1x64xf32>
    %8 = vector.broadcast %7 : vector<1x64xf32> to vector<32x64xf32>
    %9 = arith.addf %6, %8 : vector<32x64xf32>
    %c0_9 = arith.constant 0 : index
    %c0_10 = arith.constant 0 : index
    %10 = vector.load %arg5[%c0_9, %c0_10] : memref<32x32xf32, #tpu.memory_space<vmem>>, vector<32x32xf32>
    %cst_11 = arith.constant dense<0.000000e+00> : vector<32x32xf32>
    %11 = tpu.matmul %2, %10, %cst_11 {dimension_numbers = #tpu.dot_dimension_numbers<[1], [0], [0], [1], [0, 0, 1, 1], [], []>} : vector<32x32xf32>, vector<32x32xf32>, vector<32x32xf32> -> vector<32x32xf32>
    %c0_12 = arith.constant 0 : index
    %c0_13 = arith.constant 0 : index
    %12 = vector.load %arg6[%c0_12, %c0_13] : memref<1x32xf32, #tpu.memory_space<vmem>>, vector<1x32xf32>
    %13 = vector.broadcast %12 : vector<1x32xf32> to vector<32x32xf32>
    %14 = arith.addf %11, %13 : vector<32x32xf32>
    %15 = vector.extract_strided_slice %9 {offsets = [0, 0], sizes = [32, 32], strides = [1, 1]} : vector<32x64xf32> to vector<32x32xf32>
    %16 = vector.shape_cast %15 : vector<32x32xf32> to vector<4x8x32xf32>
    %17 = vector.extract_strided_slice %9 {offsets = [0, 32], sizes = [32, 32], strides = [1, 1]} : vector<32x64xf32> to vector<32x32xf32>
    %18 = vector.shape_cast %17 : vector<32x32xf32> to vector<4x8x32xf32>
    %19 = vector.shape_cast %14 : vector<32x32xf32> to vector<4x8x32xf32>
    %c0_14 = arith.constant 0 : index
    %c0_15 = arith.constant 0 : index
    %20 = vector.load %arg11[%c0_14, %c0_15] : memref<32x32xf32, #tpu.memory_space<vmem>>, vector<32x32xf32>
    %21 = tpu.concatenate %18, %18, %18, %18 in 1 : vector<4x8x32xf32>, vector<4x8x32xf32>, vector<4x8x32xf32>, vector<4x8x32xf32> -> vector<4x32x32xf32>
    %22 = vector.shape_cast %20 : vector<32x32xf32> to vector<1x32x32xf32>
    %23 = vector.broadcast %22 : vector<1x32x32xf32> to vector<4x32x32xf32>
    %24 = arith.mulf %21, %23 : vector<4x32x32xf32>
    %25 = tpu.concatenate %19, %19, %19, %19 in 1 : vector<4x8x32xf32>, vector<4x8x32xf32>, vector<4x8x32xf32>, vector<4x8x32xf32> -> vector<4x32x32xf32>
    %26 = vector.shape_cast %20 : vector<32x32xf32> to vector<1x32x32xf32>
    %27 = vector.broadcast %26 : vector<1x32x32xf32> to vector<4x32x32xf32>
    %28 = arith.mulf %25, %27 : vector<4x32x32xf32>
    "tpu.trace_start"() <{level = 10 : i32, message = "bie,bje->bij"}> : () -> ()
    %cst_16 = arith.constant dense<0.000000e+00> : vector<4x8x32xf32>
    %29 = tpu.matmul %16, %24, %cst_16 {dimension_numbers = #tpu.dot_dimension_numbers<[2], [2], [1], [1], [0, 0, 0, 1, 1, 1], [0], [0]>} : vector<4x8x32xf32>, vector<4x32x32xf32>, vector<4x8x32xf32> -> vector<4x8x32xf32>
    "tpu.trace_stop"() : () -> ()
    %30 = vector.extract_strided_slice %29 {offsets = [0, 0, 0], sizes = [4, 8, 8], strides = [1, 1, 1]} : vector<4x8x32xf32> to vector<4x8x8xf32>
    %cst_17 = arith.constant dense<0xFF800000> : vector<4x8xf32>
    %31 = vector.multi_reduction <maximumf>, %30, %cst_17 [2] : vector<4x8x8xf32> to vector<4x8xf32>
    %32 = vector.shape_cast %31 : vector<4x8xf32> to vector<4x8x1xf32>
    %33 = vector.broadcast %32 : vector<4x8x1xf32> to vector<4x8x8xf32>
    %34 = arith.subf %30, %33 : vector<4x8x8xf32>
    %35 = math.exp %34 : vector<4x8x8xf32>
    %cst_18 = arith.constant dense<0.000000e+00> : vector<4x8xf32>
    %36 = vector.multi_reduction <add>, %35, %cst_18 [2] : vector<4x8x8xf32> to vector<4x8xf32>
    %37 = vector.shape_cast %36 : vector<4x8xf32> to vector<4x8x1xf32>
    %38 = tpu.reciprocal %37 : vector<4x8x1xf32> -> vector<4x8x1xf32>
    %39 = vector.broadcast %38 : vector<4x8x1xf32> to vector<4x8x8xf32>
    %40 = arith.mulf %35, %39 : vector<4x8x8xf32>
    %41 = vector.extract_strided_slice %29 {offsets = [0, 0, 8], sizes = [4, 8, 8], strides = [1, 1, 1]} : vector<4x8x32xf32> to vector<4x8x8xf32>
    %cst_19 = arith.constant dense<0xFF800000> : vector<4x8xf32>
    %42 = vector.multi_reduction <maximumf>, %41, %cst_19 [2] : vector<4x8x8xf32> to vector<4x8xf32>
    %43 = vector.shape_cast %42 : vector<4x8xf32> to vector<4x8x1xf32>
    %44 = vector.broadcast %43 : vector<4x8x1xf32> to vector<4x8x8xf32>
    %45 = arith.subf %41, %44 : vector<4x8x8xf32>
    %46 = math.exp %45 : vector<4x8x8xf32>
    %cst_20 = arith.constant dense<0.000000e+00> : vector<4x8xf32>
    %47 = vector.multi_reduction <add>, %46, %cst_20 [2] : vector<4x8x8xf32> to vector<4x8xf32>
    %48 = vector.shape_cast %47 : vector<4x8xf32> to vector<4x8x1xf32>
    %49 = tpu.reciprocal %48 : vector<4x8x1xf32> -> vector<4x8x1xf32>
    %50 = vector.broadcast %49 : vector<4x8x1xf32> to vector<4x8x8xf32>
    %51 = arith.mulf %46, %50 : vector<4x8x8xf32>
    %52 = vector.extract_strided_slice %29 {offsets = [0, 0, 16], sizes = [4, 8, 8], strides = [1, 1, 1]} : vector<4x8x32xf32> to vector<4x8x8xf32>
    %cst_21 = arith.constant dense<0xFF800000> : vector<4x8xf32>
    %53 = vector.multi_reduction <maximumf>, %52, %cst_21 [2] : vector<4x8x8xf32> to vector<4x8xf32>
    %54 = vector.shape_cast %53 : vector<4x8xf32> to vector<4x8x1xf32>
    %55 = vector.broadcast %54 : vector<4x8x1xf32> to vector<4x8x8xf32>
    %56 = arith.subf %52, %55 : vector<4x8x8xf32>
    %57 = math.exp %56 : vector<4x8x8xf32>
    %cst_22 = arith.constant dense<0.000000e+00> : vector<4x8xf32>
    %58 = vector.multi_reduction <add>, %57, %cst_22 [2] : vector<4x8x8xf32> to vector<4x8xf32>
    %59 = vector.shape_cast %58 : vector<4x8xf32> to vector<4x8x1xf32>
    %60 = tpu.reciprocal %59 : vector<4x8x1xf32> -> vector<4x8x1xf32>
    %61 = vector.broadcast %60 : vector<4x8x1xf32> to vector<4x8x8xf32>
    %62 = arith.mulf %57, %61 : vector<4x8x8xf32>
    %63 = vector.extract_strided_slice %29 {offsets = [0, 0, 24], sizes = [4, 8, 8], strides = [1, 1, 1]} : vector<4x8x32xf32> to vector<4x8x8xf32>
    %cst_23 = arith.constant dense<0xFF800000> : vector<4x8xf32>
    %64 = vector.multi_reduction <maximumf>, %63, %cst_23 [2] : vector<4x8x8xf32> to vector<4x8xf32>
    %65 = vector.shape_cast %64 : vector<4x8xf32> to vector<4x8x1xf32>
    %66 = vector.broadcast %65 : vector<4x8x1xf32> to vector<4x8x8xf32>
    %67 = arith.subf %63, %66 : vector<4x8x8xf32>
    %68 = math.exp %67 : vector<4x8x8xf32>
    %cst_24 = arith.constant dense<0.000000e+00> : vector<4x8xf32>
    %69 = vector.multi_reduction <add>, %68, %cst_24 [2] : vector<4x8x8xf32> to vector<4x8xf32>
    %70 = vector.shape_cast %69 : vector<4x8xf32> to vector<4x8x1xf32>
    %71 = tpu.reciprocal %70 : vector<4x8x1xf32> -> vector<4x8x1xf32>
    %72 = vector.broadcast %71 : vector<4x8x1xf32> to vector<4x8x8xf32>
    %73 = arith.mulf %68, %72 : vector<4x8x8xf32>
    %74 = tpu.concatenate %40, %51, %62, %73 in 2 : vector<4x8x8xf32>, vector<4x8x8xf32>, vector<4x8x8xf32>, vector<4x8x8xf32> -> vector<4x8x32xf32>
    %75 = arith.addf %40, %51 : vector<4x8x8xf32>
    %76 = arith.addf %75, %62 : vector<4x8x8xf32>
    %77 = arith.addf %76, %73 : vector<4x8x8xf32>
    %cst_25 = arith.constant 2.500000e-01 : f32
    %78 = vector.broadcast %cst_25 : f32 to vector<4x8x8xf32>
    %79 = arith.mulf %77, %78 : vector<4x8x8xf32>
    %c0_26 = arith.constant 0 : index
    %c0_27 = arith.constant 0 : index
    %c0_28 = arith.constant 0 : index
    %80 = vector.load %arg13[%c0_26, %c0_27, %c0_28] : memref<4x8x8xf32, #tpu.memory_space<vmem>>, vector<4x8x8xf32>
    tpu.vector_store %arg13[%c0_26, %c0_27, %c0_28], %79 {strides = array<i32>} : memref<4x8x8xf32, #tpu.memory_space<vmem>>, vector<4x8x8xf32>,
    "tpu.trace_start"() <{level = 10 : i32, message = "bij,bje->bie"}> : () -> ()
    %cst_29 = arith.constant dense<0.000000e+00> : vector<4x8x32xf32>
    %81 = tpu.matmul %74, %28, %cst_29 {dimension_numbers = #tpu.dot_dimension_numbers<[2], [1], [1], [2], [0, 0, 0, 1, 1, 2], [0], [0]>} : vector<4x8x32xf32>, vector<4x32x32xf32>, vector<4x8x32xf32> -> vector<4x8x32xf32>
    "tpu.trace_stop"() : () -> ()
    %82 = vector.shape_cast %81 : vector<4x8x32xf32> to vector<32x32xf32>
    %c0_30 = arith.constant 0 : index
    %c0_31 = arith.constant 0 : index
    %83 = vector.load %arg7[%c0_30, %c0_31] : memref<32x32xf32, #tpu.memory_space<vmem>>, vector<32x32xf32>
    %cst_32 = arith.constant dense<0.000000e+00> : vector<32x32xf32>
    %84 = tpu.matmul %82, %83, %cst_32 {dimension_numbers = #tpu.dot_dimension_numbers<[1], [0], [0], [1], [0, 0, 1, 1], [], []>} : vector<32x32xf32>, vector<32x32xf32>, vector<32x32xf32> -> vector<32x32xf32>
    %c0_33 = arith.constant 0 : index
    %c0_34 = arith.constant 0 : index
    %85 = vector.load %arg8[%c0_33, %c0_34] : memref<1x32xf32, #tpu.memory_space<vmem>>, vector<1x32xf32>
    %86 = vector.broadcast %85 : vector<1x32xf32> to vector<32x32xf32>
    %87 = arith.addf %84, %86 : vector<32x32xf32>
    %88 = arith.addf %2, %87 : vector<32x32xf32>
    %cst_35 = arith.constant dense<0.000000e+00> : vector<32xf32>
    %89 = vector.multi_reduction <add>, %88, %cst_35 [1] : vector<32x32xf32> to vector<32xf32>
    %90 = vector.shape_cast %89 : vector<32xf32> to vector<32x1xf32>
    %cst_36 = arith.constant 3.200000e+01 : f32
    %91 = vector.broadcast %cst_36 : f32 to vector<32x1xf32>
    %92 = arith.divf %90, %91 : vector<32x1xf32>
    %93 = vector.broadcast %92 : vector<32x1xf32> to vector<32x32xf32>
    %94 = arith.subf %88, %93 : vector<32x32xf32>
    %95 = arith.mulf %94, %94 : vector<32x32xf32>
    %cst_37 = arith.constant dense<0.000000e+00> : vector<32xf32>
    %96 = vector.multi_reduction <add>, %95, %cst_37 [1] : vector<32x32xf32> to vector<32xf32>
    %97 = vector.shape_cast %96 : vector<32xf32> to vector<32x1xf32>
    %cst_38 = arith.constant 3.200000e+01 : f32
    %98 = vector.broadcast %cst_38 : f32 to vector<32x1xf32>
    %99 = arith.divf %97, %98 : vector<32x1xf32>
    %100 = vector.broadcast %92 : vector<32x1xf32> to vector<32x32xf32>
    %101 = arith.subf %88, %100 : vector<32x32xf32>
    %cst_39 = arith.constant 9.99999974E-6 : f32
    %102 = vector.broadcast %cst_39 : f32 to vector<32x1xf32>
    %103 = arith.addf %99, %102 : vector<32x1xf32>
    %104 = math.rsqrt %103 : vector<32x1xf32>
    %105 = vector.broadcast %104 : vector<32x1xf32> to vector<32x32xf32>
    %106 = arith.mulf %101, %105 : vector<32x32xf32>
    %c0_40 = arith.constant 0 : index
    %c0_41 = arith.constant 0 : index
    %107 = vector.load %arg9[%c0_40, %c0_41] : memref<1x32xf32, #tpu.memory_space<vmem>>, vector<1x32xf32>
    %108 = vector.broadcast %107 : vector<1x32xf32> to vector<32x32xf32>
    %109 = arith.mulf %106, %108 : vector<32x32xf32>
    %c0_42 = arith.constant 0 : index
    %c0_43 = arith.constant 0 : index
    %110 = vector.load %arg10[%c0_42, %c0_43] : memref<1x32xf32, #tpu.memory_space<vmem>>, vector<1x32xf32>
    %111 = vector.broadcast %110 : vector<1x32xf32> to vector<32x32xf32>
    %112 = arith.addf %109, %111 : vector<32x32xf32>
    %113 = vector.shape_cast %112 : vector<32x32xf32> to vector<4x8x32xf32>
    %c0_44 = arith.constant 0 : index
    %c0_45 = arith.constant 0 : index
    %c0_46 = arith.constant 0 : index
    %114 = vector.load %arg12[%c0_44, %c0_45, %c0_46] : memref<4x8x32xf32, #tpu.memory_space<vmem>>, vector<4x8x32xf32>
    tpu.vector_store %arg12[%c0_44, %c0_45, %c0_46], %113 {strides = array<i32>} : memref<4x8x32xf32, #tpu.memory_space<vmem>>, vector<4x8x32xf32>,
    return
  }
  func.func @transform_0(%arg0: i32) -> (i32, i32, i32) {
    %c0_i32 = arith.constant 0 : i32
    %c0_i32_0 = arith.constant 0 : i32
    %c0_i32_1 = arith.constant 0 : i32
    return %arg0, %c0_i32, %c0_i32_0 : i32, i32, i32
  }
  func.func @transform_1(%arg0: i32) -> (i32, i32, i32) {
    %c0_i32 = arith.constant 0 : i32
    %c0_i32_0 = arith.constant 0 : i32
    %c0_i32_1 = arith.constant 0 : i32
    return %arg0, %c0_i32, %c0_i32_0 : i32, i32, i32
  }
  func.func @transform_2(%arg0: i32) -> (i32, i32) {
    %c0_i32 = arith.constant 0 : i32
    %c0_i32_0 = arith.constant 0 : i32
    %c0_i32_1 = arith.constant 0 : i32
    return %c0_i32, %c0_i32_0 : i32, i32
  }
  func.func @transform_3(%arg0: i32) -> (i32, i32) {
    %c0_i32 = arith.constant 0 : i32
    %c0_i32_0 = arith.constant 0 : i32
    %c0_i32_1 = arith.constant 0 : i32
    return %c0_i32, %c0_i32_0 : i32, i32
  }
  func.func @transform_4(%arg0: i32) -> (i32, i32) {
    %c0_i32 = arith.constant 0 : i32
    %c0_i32_0 = arith.constant 0 : i32
    %c0_i32_1 = arith.constant 0 : i32
    return %c0_i32, %c0_i32_0 : i32, i32
  }
  func.func @transform_5(%arg0: i32) -> (i32, i32) {
    %c0_i32 = arith.constant 0 : i32
    %c0_i32_0 = arith.constant 0 : i32
    %c0_i32_1 = arith.constant 0 : i32
    return %c0_i32, %c0_i32_0 : i32, i32
  }
  func.func @transform_6(%arg0: i32) -> (i32, i32) {
    %c0_i32 = arith.constant 0 : i32
    %c0_i32_0 = arith.constant 0 : i32
    %c0_i32_1 = arith.constant 0 : i32
    return %c0_i32, %c0_i32_0 : i32, i32
  }
  func.func @transform_7(%arg0: i32) -> (i32, i32) {
    %c0_i32 = arith.constant 0 : i32
    %c0_i32_0 = arith.constant 0 : i32
    %c0_i32_1 = arith.constant 0 : i32
    return %c0_i32, %c0_i32_0 : i32, i32
  }
  func.func @transform_8(%arg0: i32) -> (i32, i32) {
    %c0_i32 = arith.constant 0 : i32
    %c0_i32_0 = arith.constant 0 : i32
    %c0_i32_1 = arith.constant 0 : i32
    return %c0_i32, %c0_i32_0 : i32, i32
  }
  func.func @transform_9(%arg0: i32) -> (i32, i32) {
    %c0_i32 = arith.constant 0 : i32
    %c0_i32_0 = arith.constant 0 : i32
    %c0_i32_1 = arith.constant 0 : i32
    return %c0_i32, %c0_i32_0 : i32, i32
  }
  func.func @transform_10(%arg0: i32) -> (i32, i32) {
    %c0_i32 = arith.constant 0 : i32
    %c0_i32_0 = arith.constant 0 : i32
    %c0_i32_1 = arith.constant 0 : i32
    return %c0_i32, %c0_i32_0 : i32, i32
  }
  func.func @transform_11(%arg0: i32) -> (i32, i32, i32) {
    %c0_i32 = arith.constant 0 : i32
    %c0_i32_0 = arith.constant 0 : i32
    %c0_i32_1 = arith.constant 0 : i32
    return %arg0, %c0_i32, %c0_i32_0 : i32, i32, i32
  }
  func.func @transform_12(%arg0: i32) -> (i32, i32, i32) {
    %c0_i32 = arith.constant 0 : i32
    %c0_i32_0 = arith.constant 0 : i32
    %c0_i32_1 = arith.constant 0 : i32
    return %arg0, %c0_i32, %c0_i32_0 : i32, i32, i32
  }
}

</mosaic_0001>

<bundles_post_ra>
// kernel: tpu_custom_call.1
= control target key start
LH: loop header
LB: loop body
LE: loop exit
PB: predicated region body
PF: predicated region fallthrough
CT: control target
= control target key end

     0   :  { %18 = vsyncpa [#allocation3], 0  ;;  %s2853_s0 = inlined_call_operand.hbm [shape: f32[4,8,32], index: 0, kind: input, shape index: {}]   ;;  %s2854_s1 = inlined_call_operand.hbm [shape: f32[4,8,32], index: 1, kind: input, shape index: {}]   ;;  %s2855_s2 = inlined_call_operand.hbm [shape: f32[32,64], index: 2, kind: input, shape index: {}]   ;;  %s2856_s3 = inlined_call_operand.vmem [shape: f32[1,64], index: 3, kind: input, shape index: {}]   ;;  %s2857_s4 = inlined_call_operand.hbm [shape: f32[32,32], index: 4, kind: input, shape index: {}]   ;;  %s2858_s5 = inlined_call_operand.vmem [shape: f32[1,32], index: 5, kind: input, shape index: {}]   ;;  %s2859_s6 = inlined_call_operand.hbm [shape: f32[32,32], index: 6, kind: input, shape index: {}]   ;;  %s2860_s7 = inlined_call_operand.vmem [shape: f32[1,32], index: 7, kind: input, shape index: {}]   ;;  %s2861_s8 = inlined_call_operand.vmem [shape: f32[1,32], index: 8, kind: input, shape index: {}]   ;;  %s2862_s9 = inlined_call_operand.vmem [shape: f32[1,32], index: 9, kind: input, shape index: {}]   ;;  %s2863_s10 = inlined_call_operand.vmem [shape: f32[32,32], index: 10, kind: input, shape index: {}]   ;;  %s2864_s11 = inlined_call_operand.hbm [shape: f32[4,8,32], index: 11, kind: output, shape index: {0}]   ;;  %s2865_s12 = inlined_call_operand.hbm [shape: f32[4,8,8], index: 12, kind: output, shape index: {1}]  }
   0x1   :  { %19 = vsyncpa [#allocation6], 0 }
   0x2   :  { %20 = vsyncpa [#allocation9], 0 }
   0x3   :  { %21 = vsyncpa [#allocation4], 0 }
   0x4   :  { %22 = vsyncpa [#allocation13], 0  ;;  %s2199_s21 = smov [#allocation5]   ;;  %s2200_s23 = smov [#allocation8]  }
   0x5   :  { %s40_s22 = sshll.u32 %s2199_s21, 4  ;;  %s66_s24 = sshll.u32 %s2200_s23, 4  ;;  %s41_s22 = int_to_ptr.vmem [resolvable:$true] %s40_s22  ;;  %s2281_s24 = int_to_ptr.vmem [resolvable:$true] %s66_s24 }
   0x6   :  { %s2035_s27 = scalar_lea.hbm %s2854_s1, 512 }
   0x7   :  { %p2036_p0 = scmp.ne.s32.totalorder %s2854_s1, %s2035_s27  ;;  %p2039_p1 = scmp.lt.u32.totalorder %s2035_s27, %s2854_s1 }
   0x9   :  { %p2041_p2 = pnand %p2039_p1, %p2036_p0 }
   0xb   :  { %2044 = shalt.err (!%p2041_p2)
}
   0xc   :  { %s2045_s14 = scalar_lea.vmem %s41_s22, 512  ;;  %p2050_p4 = scmp.lt.s32.totalorder %s41_s22, %s41_s22 }
   0xd   :  { %p2046_p3 = scmp.ne.s32.totalorder %s41_s22, %s2045_s14  ;;  %p2051_p5 = scmp.lt.s32.totalorder %s2045_s14, %s2045_s14 }
   0xf   :  { %p2052_p6 = por %p2051_p5, %p2050_p4 }
  0x11   :  { %p2053_p7 = pnand %p2052_p6, %p2046_p3 }
  0x13   :  { %2056 = shalt.err (!%p2053_p7)
}
  0x14   :  { %s2201_s15 = smov 128   ;;  %s2202_s16 = smov 8  }
  0x15   :  { %46 = dma.hbm_to_vmem [thread:$0]  %s2854_s1, 512, %s41_s22, [#allocation6], %s2201_s15, %s2201_s15, %s2202_s16  }
  0x16   :  { %s2057_s21 = scalar_lea.hbm %s2857_s4, 512 }
  0x17   :  { %p2058_p8 = scmp.ne.s32.totalorder %s2857_s4, %s2057_s21  ;;  %p2061_p9 = scmp.lt.u32.totalorder %s2057_s21, %s2857_s4 }
  0x19   :  { %p2063_p10 = pnand %p2061_p9, %p2058_p8 }
  0x1b   :  { %2066 = shalt.err (!%p2063_p10)
}
  0x1c   :  { %s2067_s28 = scalar_lea.vmem %s2281_s24, 512  ;;  %p2072_p12 = scmp.lt.s32.totalorder %s2281_s24, %s2281_s24 }
  0x1d   :  { %p2068_p11 = scmp.ne.s32.totalorder %s2281_s24, %s2067_s28  ;;  %p2073_p13 = scmp.lt.s32.totalorder %s2067_s28, %s2067_s28 }
  0x1f   :  { %p2074_p0 = por %p2073_p13, %p2072_p12 }
  0x21   :  { %p2075_p1 = pnand %p2074_p0, %p2068_p11 }
  0x23   :  { %2078 = shalt.err (!%p2075_p1)
}
  0x24   :  { %72 = dma.hbm_to_vmem [thread:$0]  %s2857_s4, 512, %s2281_s24, [#allocation9], %s2201_s15, %s2201_s15, %s2202_s16  }
  0x25   :  { %s2203_s29 = smov [#allocation2]   ;;  %s2204_s13 = smov [#allocation7]  }
  0x26   :  { %s28_s30 = sshll.u32 %s2203_s29, 4  ;;  %s52_s14 = sshll.u32 %s2204_s13, 4  ;;  %s29_s30 = int_to_ptr.vmem [resolvable:$true] %s28_s30  ;;  %s2318_s14 = int_to_ptr.vmem [resolvable:$true] %s52_s14 }
  0x27   :  { %s2079_s19 = scalar_lea.hbm %s2853_s0, 512 }
  0x28   :  { %p2080_p2 = scmp.ne.s32.totalorder %s2853_s0, %s2079_s19  ;;  %p2083_p3 = scmp.lt.u32.totalorder %s2079_s19, %s2853_s0 }
  0x2a   :  { %p2085_p4 = pnand %p2083_p3, %p2080_p2 }
  0x2c   :  { %2088 = shalt.err (!%p2085_p4)
}
  0x2d   :  { %s2089_s4 = scalar_lea.vmem %s29_s30, 512  ;;  %p2094_p6 = scmp.lt.s32.totalorder %s29_s30, %s29_s30 }
  0x2e   :  { %p2090_p5 = scmp.ne.s32.totalorder %s29_s30, %s2089_s4  ;;  %p2095_p7 = scmp.lt.s32.totalorder %s2089_s4, %s2089_s4 }
  0x30   :  { %p2096_p8 = por %p2095_p7, %p2094_p6 }
  0x32   :  { %p2097_p9 = pnand %p2096_p8, %p2090_p5 }
  0x34   :  { %2100 = shalt.err (!%p2097_p9)
}
  0x35   :  { %34 = dma.hbm_to_vmem [thread:$0]  %s2853_s0, 512, %s29_s30, [#allocation3], %s2201_s15, %s2201_s15, %s2202_s16  }
  0x36   :  { %s2101_s1 = scalar_lea.hbm %s2855_s2, 512 }
  0x37   :  { %p2102_p10 = scmp.ne.s32.totalorder %s2855_s2, %s2101_s1  ;;  %p2105_p11 = scmp.lt.u32.totalorder %s2101_s1, %s2855_s2 }
  0x39   :  { %p2107_p12 = pnand %p2105_p11, %p2102_p10 }
  0x3b   :  { %2110 = shalt.err (!%p2107_p12)
}
  0x3c   :  { %s2111_s18 = scalar_lea.vmem %s2318_s14, 512  ;;  %p2116_p0 = scmp.lt.s32.totalorder %s2318_s14, %s2318_s14 }
  0x3d   :  { %p2112_p13 = scmp.ne.s32.totalorder %s2318_s14, %s2111_s18  ;;  %p2117_p1 = scmp.lt.s32.totalorder %s2111_s18, %s2111_s18 }
  0x3f   :  { %p2118_p2 = por %p2117_p1, %p2116_p0 }
  0x41   :  { %p2119_p3 = pnand %p2118_p2, %p2112_p13 }
  0x43   :  { %2122 = shalt.err (!%p2119_p3)
}
  0x44   :  { %58 = dma.hbm_to_vmem [thread:$0]  %s2855_s2, 512, %s2318_s14, [#allocation6], %s2201_s15, %s2201_s15, %s2202_s16  }
  0x45   :  { %s2205_s19 = smov [#allocation10]   ;;  %s2123_s25 = scalar_lea.hbm %s2859_s6, 512 }
  0x46   :  { %s80_s20 = sshll.u32 %s2205_s19, 4  ;;  %p2124_p4 = scmp.ne.s32.totalorder %s2859_s6, %s2123_s25  ;;  %s81_s20 = int_to_ptr.vmem [resolvable:$true] %s80_s20 }
  0x47   :  { %p2127_p5 = scmp.lt.u32.totalorder %s2123_s25, %s2859_s6 }
  0x49   :  { %p2129_p6 = pnand %p2127_p5, %p2124_p4 }
  0x4b   :  { %2132 = shalt.err (!%p2129_p6)
}
  0x4c   :  { %s2133_s28 = scalar_lea.vmem %s81_s20, 512  ;;  %p2138_p8 = scmp.lt.s32.totalorder %s81_s20, %s81_s20 }
  0x4d   :  { %p2134_p7 = scmp.ne.s32.totalorder %s81_s20, %s2133_s28  ;;  %p2139_p9 = scmp.lt.s32.totalorder %s2133_s28, %s2133_s28 }
  0x4f   :  { %p2140_p10 = por %p2139_p9, %p2138_p8 }
  0x51   :  { %p2141_p11 = pnand %p2140_p10, %p2134_p7 }
  0x53   :  { %2144 = shalt.err (!%p2141_p11)
}
  0x54   :  { %86 = dma.hbm_to_vmem [thread:$0]  %s2859_s6, 512, %s81_s20, [#allocation9], %s2201_s15, %s2201_s15, %s2202_s16  }
  0x55   :  { %2189 = dma.done.wait [#allocation3], 512  }
  0x56   :  { %2190 = vsyncadd [#allocation3], 4294966784 }
  0x57   :  { %2191 = dma.done.wait [#allocation6], 1024  }
  0x58   :  { %2192 = vsyncadd [#allocation6], 4294966272 }
  0x59   :  { %2193 = dma.done.wait [#allocation9], 1024  }
  0x5a   :  { %2194 = vsyncadd [#allocation9], 4294966272  ;;  %v122_v0 = vld [vmem:[#allocation7] sm:$0xff]  ;;  %v123_v1 = vld [vmem:[#allocation7 + $0x8] sm:$0xff]  ;;  %vm133_vm0 = vcmask 261120   ;;  %s2206_s13 = smov 32  }
  0x5b   :  { %v124_v2 = vld [vmem:[#allocation7 + $0x10] sm:$0xff]  ;;  %v1826_v3 = vpack.c.bf16 %v123_v1, %v122_v0  ;;  %v125_v4 = vld [vmem:[#allocation7 + $0x18] sm:$0xff]  ;;  %v2370_v5 = vld [vmem:[#allocation2] sm:$0xff]  ;;  %v2207_v30 = vmov 0.0|0.0   ;;  %vm2209_vm1 = vmmov 0   ;;  %v2210_v58 = vmov 0.0  }
  0x5c   :  { %v114_v6 = vld [vmem:[#allocation5] sm:$0xff]  ;;  %v1830_v7 = vpack.c.bf16 %v125_v4, %v124_v2  ;;  %v2373_v9 = vld [vmem:[#allocation2 + $0x8] sm:$0xff]  ;;  %v2379_v11 = vld [vmem:[%s2863_s10 + $0x10] sm:$0xff]  ;;  %1842 = vmatprep.subr.bf16.mxu0 %v2207_v30  ;;  %1732 = vmatprep.mubr.msk.f32.mxu0 %vm2209_vm1, %v2210_v58  ;;  %vm808_vm3 = vcmask 130112   ;;  %vm869_vm4 = vcmask 195712   ;;  %vm930_vm5 = vcmask 261312  }
  0x5d   :  { %v118_v8 = vadd.f32 %v114_v6, %v2370_v5  ;;  %1827 = vmatprep.subr.bf16.mxu1 %v1826_v3  ;;  %v115_v10 = vld [vmem:[#allocation5 + $0x8] sm:$0xff]  ;;  %v2384_v12 = vld [vmem:[%s2863_s10] sm:$0xff]  ;;  %v2386_v13 = vld [vmem:[#allocation2 + $0x10] sm:$0xff]  ;;  %351 = vrot.lane.b32.xlu1 %v2379_v11, %s2206_s13  ;;  %vm763_vm6 = vcmask 64512   ;;  %s2212_s23 = smov 112   ;;  %s2213_s25 = smov 104  }
  0x5e   :  { %1829 = vmatpush3.bf16.msra.mxu1 %v1826_v3  ;;  %v116_v14 = vld [vmem:[#allocation5 + $0x10] sm:$0xff]  ;;  %347 = vrot.lane.b32.xlu0 %v2384_v12, %s2206_s13  ;;  %v2393_v15 = vld [vmem:[%s2863_s10 + $0x18] sm:$0xff]  ;;  %v119_v16 = vadd.f32 %v115_v10, %v2373_v9  ;;  %v2399_v17 = vld [vmem:[%s2863_s10 + $0x8] sm:$0xff]  ;;  %vm995_vm7 = vcmask 130048   ;;  %vm1000_vm8 = vcmask 195584   ;;  %s2214_s2 = smov [#allocation12]  }
  0x5f   :  { %1704 = vmatprep.mubr.msk.f32.mxu1 %vm133_vm0, %v118_v8  ;;  %1831 = vmatprep.subr.bf16.mxu1 %v1830_v7  ;;  %v120_v18 = vadd.f32 %v116_v14, %v2386_v13  ;;  %v2402_v19 = vld [vmem:[#allocation2 + $0x18] sm:$0xff]  ;;  %v231_v22 = vld [vmem:[#allocation8] sm:$0xff]  ;;  %v232_v23 = vld [vmem:[#allocation8 + $0x8] sm:$0xff]  ;;  %s1573_s14 = sshll.u32 %s2214_s2, 4  ;;  %s1574_s14 = int_to_ptr.vmem [resolvable:$true] %s1573_s14 }
  0x60   :  { %v117_v20 = vld [vmem:[#allocation5 + $0x18] sm:$0xff]  ;;  %v233_v24 = vld [vmem:[#allocation8 + $0x10] sm:$0xff]  ;;  %v1834_v25 = vpack.c.bf16 %v232_v23, %v231_v22  ;;  %v1591_v31 = vld [vmem:[%s2856_s3] ss:$0 sm:$0xff]  ;;  %s2208_s3 = smov 96   ;;  %p2150_p13 = scmp.lt.s32.totalorder %s1574_s14, %s1574_s14 }
  0x61   :  { %353 = vrot.lane.b32.xlu1 %v2393_v15, %s2206_s13  ;;  %v121_v21 = vadd.f32 %v117_v20, %v2402_v19  ;;  %v234_v26 = vld [vmem:[#allocation8 + $0x18] sm:$0xff]  ;;  %v1596_v6 = vld [vmem:[%s2858_s5] ss:$0 sm:$0xff]  ;;  %vm2460_vm2 = vmpackc.low %vm133_vm0, %vm133_vm0  ;;  %s2211_s5 = smov 120  }
  0x62   :  { %1833 = vmatpush3.bf16.msra.mxu1 %v1830_v7  ;;  %349 = vrot.lane.b32.xlu0 %v2399_v17, %s2206_s13  ;;  %v1838_v27 = vpack.c.bf16 %v234_v26, %v233_v24 }
  0x63   :  { %1835 = vmatprep.subr.bf16.mxu1 %v1834_v25 }
  0x65   :  { %1705 = vmatmul.mubr.msk.f32.vlgmr.msra.gmra.mrb[0].mxu1 %vm133_vm0, %v119_v16 }
  0x66   :  { %1707 = vmatprep.mubr.msk.f32.mxu1 %vm133_vm0, %v120_v18  ;;  %1837 = vmatpush3.bf16.msra.mxu1 %v1834_v25 }
  0x67   :  { %1839 = vmatprep.subr.bf16.mxu1 %v1838_v27 }
  0x69   :  { %1708 = vmatmul.mubr.msk.f32.gmra.mrb[2].mxu1 %vm133_vm0, %v121_v21 }
  0x6a   :  { %1718 = vmatprep.mubr.msk.f32.mxu1 %vm133_vm0, %v2370_v5  ;;  %1841 = vmatpush3.bf16.msra.mxu1 %v1838_v27 }
  0x6b   :  { %1850 = vmatprep.subr.bf16.mxu1 %v2207_v30 }
  0x6d   :  { %1719 = vmatmul.mubr.msk.f32.vlgmr.msra.gmra.mrb[4].mxu1 %vm133_vm0, %v2373_v9 }
  0x6e   :  { %1721 = vmatprep.mubr.msk.f32.mxu1 %vm133_vm0, %v2386_v13 }
  0x71   :  { %1722 = vmatmul.mubr.msk.f32.gmra.mrb[6].mxu1 %vm133_vm0, %v2402_v19 }
  0x72   :  { %1743 = vmatprep.mubr.msk.f32.mxu1 %vm2209_vm1, %v2210_v58 }
  0xcf   :  { %v352_v29 = vpop.permute.xlu1 %351 }
  0xd0   :  { %v348_v28 = vpop.permute.xlu0 %347 }
  0xd3   :  { %v354_v36 = vpop.permute.xlu1 %353 }
  0xd4   :  { %v350_v33 = vpop.permute.xlu0 %349 }
 0x138   :  { %v1706_v32 = vpop.f32.mrb[0].mxu1 }
 0x139   :  { %v2423_v34 = vadd.f32 %v1706_v32, %v1591_v31  ;;  %v212_v35 = vpop.f32.mrb[1].mxu1 }
 0x13a   :  { %v2425_v37 = vadd.f32 %v1591_v31, %v212_v35 }
 0x13b   :  { %v364_v38 = vmul.f32 %v350_v33, %v2423_v34  ;;  %v363_v39 = vmul.f32 %v348_v28, %v2423_v34  ;;  %v366_v40 = vmul.f32 %v354_v36, %v2423_v34  ;;  %v365_v44 = vmul.f32 %v352_v29, %v2423_v34 }
 0x13c   :  { %v360_v41 = vmul.f32 %v350_v33, %v2425_v37  ;;  %v1709_v42 = vpop.f32.mrb[2].mxu1  ;;  %v359_v43 = vmul.f32 %v348_v28, %v2425_v37  ;;  %v362_v48 = vmul.f32 %v354_v36, %v2425_v37  ;;  %v361_v51 = vmul.f32 %v352_v29, %v2425_v37 }
 0x13d   :  { %v2433_v45 = vadd.f32 %v1709_v42, %v1591_v31  ;;  %v222_v46 = vpop.f32.mrb[3].mxu1  ;;  %v1928_v47 = vpack.i.bf16 %v364_v38, %v363_v39  ;;  %v1938_v52 = vpack.i.bf16 %v366_v40, %v365_v44 }
 0x13e   :  { %v2436_v49 = vadd.f32 %v1591_v31, %v222_v46  ;;  %v1923_v50 = vpack.i.bf16 %v360_v41, %v359_v43  ;;  %v1933_v55 = vpack.i.bf16 %v362_v48, %v361_v51 }
 0x13f   :  { %1929 = vrot.lane.b32.xlu1 %v1928_v47, %s2208_s3  ;;  %v371_v53 = vmul.f32 %v348_v28, %v2433_v45  ;;  %v372_v54 = vmul.f32 %v350_v33, %v2433_v45  ;;  %v373_v60 = vmul.f32 %v352_v29, %v2433_v45  ;;  %v374_v61 = vmul.f32 %v354_v36, %v2433_v45 }
 0x140   :  { %1924 = vrot.lane.b32.xlu0 %v1923_v50, %s2208_s3  ;;  %v367_v56 = vmul.f32 %v348_v28, %v2436_v49  ;;  %v368_v57 = vmul.f32 %v350_v33, %v2436_v49  ;;  %v369_v63 = vmul.f32 %v352_v29, %v2436_v49  ;;  %v370_v0 = vmul.f32 %v354_v36, %v2436_v49  ;;  %v1720_v3 = vpop.f32.mrb[4].mxu1 }
 0x141   :  { %v1948_v59 = vpack.i.bf16 %v372_v54, %v371_v53  ;;  %v1958_v1 = vpack.i.bf16 %v374_v61, %v373_v60  ;;  %v320_v4 = vpop.f32.mrb[5].mxu1 }
 0x142   :  { %v1943_v62 = vpack.i.bf16 %v368_v57, %v367_v56  ;;  %v1953_v2 = vpack.i.bf16 %v370_v0, %v369_v63  ;;  %v321_v53 = vadd.f32 %v1596_v6, %v320_v4 }
 0x143   :  { %1939 = vrot.lane.b32.xlu1 %v1938_v52, %s2208_s3 }
 0x144   :  { %1934 = vrot.lane.b32.xlu0 %v1933_v55, %s2208_s3  ;;  %v1723_v7 = vpop.f32.mrb[6].mxu1  ;;  %v376_v60 = vmul.f32 %v2399_v17, %v321_v53  ;;  %v377_v0 = vmul.f32 %v2379_v11, %v321_v53 }
 0x145   :  { %v2454_v8 = vadd.f32 %v1723_v7, %v1596_v6  ;;  %v330_v10 = vpop.f32.mrb[7].mxu1 }
 0x146   :  { %v2456_v14 = vadd.f32 %v1596_v6, %v330_v10 }
 0x147   :  { %1949 = vrot.lane.b32.xlu1 %v1948_v59, %s2208_s3  ;;  %v375_v59 = vmul.f32 %v2384_v12, %v321_v53 }
 0x148   :  { %1944 = vrot.lane.b32.xlu0 %v1943_v62, %s2208_s3 }
 0x14b   :  { %1959 = vrot.lane.b32.xlu1 %v1958_v1, %s2208_s3  ;;  %v378_v1 = vmul.f32 %v2393_v15, %v321_v53 }
 0x14c   :  { %1954 = vrot.lane.b32.xlu0 %v1953_v2, %s2208_s3  ;;  %v1875_v2 = vpack.c.bf16 %v376_v60, %v375_v59 }
 0x14d   :  { %v1878_v4 = vpack.c.bf16 %v378_v1, %v377_v0 }
 0x1b1   :  { %v1930_v16 = vpop.permute.xlu1 %1929 }
 0x1b2   :  { %v1932_v18 = vunpack.i.h.bf16 %v1930_v16  ;;  %v1931_v20 = vunpack.i.l.bf16 %v1930_v16  ;;  %v1925_v21 = vpop.permute.xlu0 %1924 }
 0x1b3   :  { %v1927_v22 = vunpack.i.h.bf16 %v1925_v21  ;;  %v1926_v23 = vunpack.i.l.bf16 %v1925_v21 }
 0x1b4   :  { %v1851_v25 = vpack.c.bf16 %v1932_v18, %v1931_v20 }
 0x1b5   :  { %v1843_v26 = vpack.c.bf16 %v1927_v22, %v1926_v23  ;;  %v1940_v27 = vpop.permute.xlu1 %1939 }
 0x1b6   :  { %1853 = vmatpush3.bf16.xpose.msk.msra.mxu1 %vm2460_vm2, %v1851_v25  ;;  %v1935_v28 = vpop.permute.xlu0 %1934  ;;  %v1942_v29 = vunpack.i.h.bf16 %v1940_v27  ;;  %v1941_v31 = vunpack.i.l.bf16 %v1940_v27 }
 0x1b7   :  { %1845 = vmatpush3.bf16.xpose.msk.msra.mxu0 %vm2460_vm2, %v1843_v26  ;;  %1854 = vmatprep.subr.bf16.mxu1 %v2207_v30  ;;  %v1937_v32 = vunpack.i.h.bf16 %v1935_v28  ;;  %v1936_v33 = vunpack.i.l.bf16 %v1935_v28 }
 0x1b8   :  { %1846 = vmatprep.subr.bf16.mxu0 %v2207_v30  ;;  %v1855_v35 = vpack.c.bf16 %v1942_v29, %v1941_v31 }
 0x1b9   :  { %v1847_v36 = vpack.c.bf16 %v1937_v32, %v1936_v33  ;;  %v1950_v38 = vpop.permute.xlu1 %1949 }
 0x1ba   :  { %v1945_v39 = vpop.permute.xlu0 %1944  ;;  %v1952_v40 = vunpack.i.h.bf16 %v1950_v38  ;;  %v1951_v41 = vunpack.i.l.bf16 %v1950_v38 }
 0x1bb   :  { %v1947_v42 = vunpack.i.h.bf16 %v1945_v39  ;;  %v1946_v43 = vunpack.i.l.bf16 %v1945_v39 }
 0x1bc   :  { %v1867_v44 = vpack.c.bf16 %v1952_v40, %v1951_v41 }
 0x1bd   :  { %v1859_v46 = vpack.c.bf16 %v1947_v42, %v1946_v43  ;;  %v1960_v47 = vpop.permute.xlu1 %1959 }
 0x1be   :  { %1857 = vmatpush3.bf16.xpose.msk.msra.mxu1 %vm2460_vm2, %v1855_v35  ;;  %v1955_v48 = vpop.permute.xlu0 %1954  ;;  %v1962_v50 = vunpack.i.h.bf16 %v1960_v47  ;;  %v1961_v51 = vunpack.i.l.bf16 %v1960_v47 }
 0x1bf   :  { %1849 = vmatpush3.bf16.xpose.msk.msra.mxu0 %vm2460_vm2, %v1847_v36  ;;  %1866 = vmatprep.subr.bf16.mxu1 %v2207_v30  ;;  %v1956_v52 = vunpack.i.l.bf16 %v1955_v48 }
 0x1c0   :  { %1858 = vmatprep.subr.bf16.mxu0 %v2207_v30  ;;  %v1871_v54 = vpack.c.bf16 %v1962_v50, %v1961_v51 }
 0x1c5   :  { %1744 = vmatmul.mubr.msk.f32.vlgmr.msra.gmra.mrb[8].mxu1 %vm133_vm0, %v2423_v34  ;;  %v1957_v34 = vunpack.i.h.bf16 %v1955_v48 }
 0x1c6   :  { %1733 = vmatmul.mubr.msk.f32.vlgmr.msra.gmra.mrb[0].mxu0 %vm133_vm0, %v2425_v37  ;;  %1869 = vmatpush3.bf16.xpose.msk.msra.mxu1 %vm2460_vm2, %v1867_v44  ;;  %v326_v37 = vadd.f32 %v1720_v3, %v1596_v6 }
 0x1c7   :  { %1861 = vmatpush3.bf16.xpose.msk.msra.mxu0 %vm2460_vm2, %v1859_v46  ;;  %1870 = vmatprep.subr.bf16.mxu1 %v2207_v30  ;;  %v1863_v55 = vpack.c.bf16 %v1957_v34, %v1956_v52 }
 0x1c8   :  { %1862 = vmatprep.subr.bf16.mxu0 %v2207_v30  ;;  %1765 = vmatprep.mubr.msk.f32.mxu1 %vm2209_vm1, %v2210_v58  ;;  %v379_v56 = vmul.f32 %v2384_v12, %v326_v37  ;;  %v380_v57 = vmul.f32 %v2399_v17, %v326_v37  ;;  %v381_v61 = vmul.f32 %v2379_v11, %v326_v37 }
 0x1c9   :  { %1754 = vmatprep.mubr.msk.f32.mxu0 %vm2209_vm1, %v2210_v58  ;;  %v382_v62 = vmul.f32 %v2393_v15, %v326_v37 }
 0x1ca   :  { %v1881_v63 = vpack.c.bf16 %v380_v57, %v379_v56 }
 0x1cb   :  { %v1884_v3 = vpack.c.bf16 %v382_v62, %v381_v61 }
 0x1ce   :  { %1873 = vmatpush3.bf16.xpose.msk.msra.mxu1 %vm2460_vm2, %v1871_v54 }
 0x1cf   :  { %1865 = vmatpush3.bf16.xpose.msk.msra.mxu0 %vm2460_vm2, %v1863_v55  ;;  %1880 = vmatprep.subr.bf16.mxu1 %v2207_v30 }
 0x1d0   :  { %1874 = vmatprep.subr.bf16.mxu0 %v2207_v30 }
 0x1d5   :  { %1766 = vmatmul.mubr.msk.f32.vlgmr.msra.gmra.mrb[10].mxu1 %vm133_vm0, %v2433_v45 }
 0x1d6   :  { %1755 = vmatmul.mubr.msk.f32.vlgmr.msra.gmra.mrb[2].mxu0 %vm133_vm0, %v2436_v49  ;;  %1882 = vmatpush3.bf16.msra.mxu1 %v1881_v63 }
 0x1d7   :  { %1876 = vmatpush3.bf16.msra.mxu0 %v1875_v2  ;;  %1883 = vmatprep.subr.bf16.mxu1 %v2207_v30 }
 0x1d8   :  { %1877 = vmatprep.subr.bf16.mxu0 %v2207_v30  ;;  %1787 = vmatprep.mubr.msk.f32.mxu1 %vm2209_vm1, %v2210_v58 }
 0x1d9   :  { %1776 = vmatprep.mubr.msk.f32.mxu0 %vm2209_vm1, %v2210_v58 }
 0x1da   :  { %1885 = vmatpush3.bf16.msra.mxu1 %v1884_v3 }
 0x1db   :  { %1879 = vmatpush3.bf16.msra.mxu0 %v1878_v4  ;;  %1892 = vmatprep.subr.bf16.mxu1 %v2207_v30 }
 0x1dc   :  { %1886 = vmatprep.subr.bf16.mxu0 %v2207_v30 }
 0x298   :  { %v2516_v45 = vpop.f32.mrb[8].mxu1 }
 0x299   :  { %v2518_v49 = vpop.f32.mrb[0].mxu0  ;;  %v1745_v6 = vpop.f32.mrb[9].mxu1  ;;  %v812_v7 = vsel %vm808_vm3, %v2516_v45, -inf  ;;  %v873_v10 = vsel %vm869_vm4, %v2516_v45, -inf  ;;  %v934_v18 = vsel %vm930_vm5, %v2516_v45, -inf  ;;  %v767_v35 = vsel %vm763_vm6, %v2516_v45, -inf }
 0x29a   :  { %813 = vmax.xlane.f32.xlu1 %v812_v7  ;;  %874 = vmax.xlane.f32.xlu0 %v873_v10  ;;  %v1734_v16 = vpop.f32.mrb[1].mxu0  ;;  %v931_v20 = vsel %vm930_vm5, %v2518_v49, -inf  ;;  %v809_v21 = vsel %vm808_vm3, %v2518_v49, -inf  ;;  %v870_v22 = vsel %vm869_vm4, %v2518_v49, -inf  ;;  %v764_v36 = vsel %vm763_vm6, %v2518_v49, -inf }
 0x29e   :  { %935 = vmax.xlane.f32.xlu0 %v934_v18  ;;  %932 = vmax.xlane.f32.xlu1 %v931_v20 }
 0x2a2   :  { %810 = vmax.xlane.f32.xlu0 %v809_v21 }
 0x2a6   :  { %871 = vmax.xlane.f32.xlu0 %v870_v22 }
 0x2a8   :  { %v2532_v23 = vpop.f32.mrb[10].mxu1 }
 0x2a9   :  { %v2534_v24 = vpop.f32.mrb[2].mxu0  ;;  %v1767_v25 = vpop.f32.mrb[11].mxu1  ;;  %v818_v26 = vsel %vm808_vm3, %v2532_v23, -inf  ;;  %v879_v29 = vsel %vm869_vm4, %v2532_v23, -inf  ;;  %v940_v32 = vsel %vm930_vm5, %v2532_v23, -inf  ;;  %v773_v38 = vsel %vm763_vm6, %v2532_v23, -inf }
 0x2aa   :  { %819 = vmax.xlane.f32.xlu0 %v818_v26  ;;  %v1756_v27 = vpop.f32.mrb[3].mxu0  ;;  %v815_v28 = vsel %vm808_vm3, %v2534_v24, -inf  ;;  %v876_v31 = vsel %vm869_vm4, %v2534_v24, -inf  ;;  %v937_v33 = vsel %vm930_vm5, %v2534_v24, -inf  ;;  %v770_v39 = vsel %vm763_vm6, %v2534_v24, -inf }
 0x2ab   :  { %816 = vmax.xlane.f32.xlu1 %v815_v28 }
 0x2ae   :  { %880 = vmax.xlane.f32.xlu0 %v879_v29 }
 0x2af   :  { %877 = vmax.xlane.f32.xlu1 %v876_v31 }
 0x2b2   :  { %941 = vmax.xlane.f32.xlu0 %v940_v32 }
 0x2b3   :  { %938 = vmax.xlane.f32.xlu1 %v937_v33 }
 0x2b6   :  { %768 = vmax.xlane.f32.xlu0 %v767_v35 }
 0x2b7   :  { %765 = vmax.xlane.f32.xlu1 %v764_v36 }
 0x2ba   :  { %774 = vmax.xlane.f32.xlu0 %v773_v38 }
 0x2bb   :  { %771 = vmax.xlane.f32.xlu1 %v770_v39 }
 0x327   :  { %v814_v40 = vpop.xlane.xlu1 %813  ;;  %v875_v41 = vpop.xlane.xlu0 %874 }
 0x328   :  { %v822_v42 = vsub.f32 %v2516_v45, %v814_v40  ;;  %v883_v43 = vsub.f32 %v2516_v45, %v875_v41 }
 0x32a   :  { %v827_v44 = vmul.f32 1.442695, %v822_v42  ;;  %v888_v46 = vmul.f32 1.442695, %v883_v43 }
 0x32b   :  { %v936_v47 = vpop.xlane.xlu0 %935  ;;  %v933_v48 = vpop.xlane.xlu1 %932 }
 0x32c   :  { %1963 = vpow2.f32 %v827_v44  ;;  %v944_v50 = vsub.f32 %v2516_v45, %v936_v47  ;;  %v943_v51 = vsub.f32 %v2518_v49, %v933_v48 }
 0x32d   :  { %1965 = vpow2.f32 %v888_v46 }
 0x32e   :  { %v949_v34 = vmul.f32 1.442695, %v944_v50  ;;  %v947_v52 = vmul.f32 1.442695, %v943_v51 }
 0x32f   :  { %v811_v37 = vpop.xlane.xlu0 %810 }
 0x330   :  { %1967 = vpow2.f32 %v949_v34  ;;  %v821_v53 = vsub.f32 %v2518_v49, %v811_v37 }
 0x331   :  { %1969 = vpow2.f32 %v947_v52 }
 0x332   :  { %v825_v54 = vmul.f32 1.442695, %v821_v53 }
 0x333   :  { %v872_v55 = vpop.xlane.xlu0 %871 }
 0x334   :  { %1971 = vpow2.f32 %v825_v54  ;;  %v882_v56 = vsub.f32 %v2518_v49, %v872_v55 }
 0x336   :  { %v2562_v57 = vpop.eup %1963  ;;  %v886_v59 = vmul.f32 1.442695, %v882_v56 }
 0x337   :  { %v2564_v60 = vpop.eup %1965  ;;  %839 = vrot.lane.b32.xlu0 %v2562_v57, %s2211_s5  ;;  %v820_v61 = vpop.xlane.xlu0 %819 }
 0x338   :  { %1973 = vpow2.f32 %v886_v59  ;;  %v824_v62 = vsub.f32 %v2532_v23, %v820_v61  ;;  %900 = vrot.lane.b32.xlu1 %v2564_v60, %s2212_s23  ;;  %v817_v63 = vpop.xlane.xlu1 %816 }
 0x339   :  { %v823_v0 = vsub.f32 %v2534_v24, %v817_v63 }
 0x33a   :  { %v2572_v1 = vpop.eup %1967  ;;  %v831_v2 = vmul.f32 1.442695, %v824_v62 }
 0x33b   :  { %v2574_v3 = vpop.eup %1969  ;;  %v829_v4 = vmul.f32 1.442695, %v823_v0  ;;  %v881_v6 = vpop.xlane.xlu0 %880 }
 0x33c   :  { %1975 = vpow2.f32 %v831_v2  ;;  %959 = vrot.lane.b32.xlu0 %v2574_v3, %s2213_s25  ;;  %v885_v7 = vsub.f32 %v2532_v23, %v881_v6  ;;  %961 = vrot.lane.b32.xlu1 %v2572_v1, %s2213_s25  ;;  %v878_v10 = vpop.xlane.xlu1 %877 }
 0x33d   :  { %1977 = vpow2.f32 %v829_v4  ;;  %v884_v16 = vsub.f32 %v2534_v24, %v878_v10 }
 0x33e   :  { %v2582_v18 = vpop.eup %1971  ;;  %v892_v20 = vmul.f32 1.442695, %v885_v7 }
 0x33f   :  { %v890_v21 = vmul.f32 1.442695, %v884_v16  ;;  %v942_v22 = vpop.xlane.xlu0 %941 }
 0x340   :  { %1979 = vpow2.f32 %v892_v20  ;;  %v946_v25 = vsub.f32 %v2532_v23, %v942_v22  ;;  %837 = vrot.lane.b32.xlu1 %v2582_v18, %s2211_s5  ;;  %v939_v26 = vpop.xlane.xlu1 %938 }
 0x341   :  { %1981 = vpow2.f32 %v890_v21  ;;  %v945_v27 = vsub.f32 %v2534_v24, %v939_v26 }
 0x342   :  { %v2588_v28 = vpop.eup %1973  ;;  %v953_v29 = vmul.f32 1.442695, %v946_v25 }
 0x343   :  { %v951_v31 = vmul.f32 1.442695, %v945_v27  ;;  %v769_v40 = vpop.xlane.xlu0 %768 }
 0x344   :  { %1983 = vpow2.f32 %v953_v29  ;;  %898 = vrot.lane.b32.xlu1 %v2588_v28, %s2212_s23  ;;  %v766_v41 = vpop.xlane.xlu1 %765  ;;  %v777_v44 = vsub.f32 %v2516_v45, %v769_v40 }
 0x345   :  { %1985 = vpow2.f32 %v951_v31  ;;  %v776_v42 = vsub.f32 %v2518_v49, %v766_v41 }
 0x346   :  { %v2592_v32 = vpop.eup %1975  ;;  %v782_v50 = vmul.f32 1.442695, %v777_v44 }
 0x347   :  { %v2594_v33 = vpop.eup %1977  ;;  %v775_v43 = vpop.xlane.xlu0 %774  ;;  %v780_v46 = vmul.f32 1.442695, %v776_v42 }
 0x348   :  { %843 = vrot.lane.b32.xlu1 %v2592_v32, %s2211_s5  ;;  %841 = vrot.lane.b32.xlu0 %v2594_v33, %s2211_s5  ;;  %v779_v47 = vsub.f32 %v2532_v23, %v775_v43  ;;  %v772_v48 = vpop.xlane.xlu1 %771 }
 0x349   :  { %1987 = vpow2.f32 %v780_v46  ;;  %v778_v34 = vsub.f32 %v2534_v24, %v772_v48 }
 0x34a   :  { %v2600_v35 = vpop.eup %1979  ;;  %v786_v51 = vmul.f32 1.442695, %v779_v47  ;;  %1989 = vpow2.f32 %v782_v50 }
 0x34b   :  { %v2602_v36 = vpop.eup %1981  ;;  %v784_v52 = vmul.f32 1.442695, %v778_v34 }
 0x34c   :  { %904 = vrot.lane.b32.xlu1 %v2600_v35, %s2212_s23  ;;  %902 = vrot.lane.b32.xlu0 %v2602_v36, %s2212_s23  ;;  %1991 = vpow2.f32 %v786_v51 }
 0x34d   :  { %1993 = vpow2.f32 %v784_v52 }
 0x34e   :  { %v2608_v38 = vpop.eup %1983 }
 0x34f   :  { %v2610_v39 = vpop.eup %1985 }
 0x350   :  { %965 = vrot.lane.b32.xlu1 %v2608_v38, %s2213_s25  ;;  %963 = vrot.lane.b32.xlu0 %v2610_v39, %s2213_s25 }
 0x353   :  { %v2620_v37 = vpop.eup %1987 }
 0x354   :  { %v788_v49 = vsel %vm763_vm6, %v2620_v37, 0.0  ;;  %v2624_v53 = vpop.eup %1989 }
 0x355   :  { %v791_v23 = vsel %vm763_vm6, %v2624_v53, 0.0 }
 0x356   :  { %v2626_v45 = vpop.eup %1991 }
 0x357   :  { %v797_v24 = vsel %vm763_vm6, %v2626_v45, 0.0  ;;  %v2632_v54 = vpop.eup %1993 }
 0x358   :  { %v794_v55 = vsel %vm763_vm6, %v2632_v54, 0.0 }
 0x36f   :  { %789 = vadd.xlane.f32.xlu0 %v788_v49 }
 0x373   :  { %792 = vadd.xlane.f32.xlu0 %v791_v23 }
 0x374   :  { %798 = vadd.xlane.f32.xlu1 %v797_v24 }
 0x378   :  { %795 = vadd.xlane.f32.xlu1 %v794_v55 }
 0x3a9   :  { %v840_v56 = vpop.permute.xlu0 %839 }
 0x3aa   :  { %v901_v59 = vpop.permute.xlu1 %900  ;;  %v852_v61 = vsel %vm763_vm6, %v840_v56, 0.0 }
 0x3ab   :  { %853 = vadd.xlane.f32.xlu0 %v852_v61  ;;  %v913_v63 = vsel %vm763_vm6, %v901_v59, 0.0 }
 0x3ae   :  { %v962_v62 = vpop.permute.xlu1 %961  ;;  %v960_v6 = vpop.permute.xlu0 %959 }
 0x3af   :  { %914 = vadd.xlane.f32.xlu0 %v913_v63  ;;  %v974_v2 = vsel %vm763_vm6, %v962_v62, 0.0  ;;  %v971_v21 = vsel %vm763_vm6, %v960_v6, 0.0  ;;  %v387_v63 = vmul.f32 %v2384_v12, %v2454_v8  ;;  %v389_v6 = vmul.f32 %v2379_v11, %v2454_v8 }
 0x3b2   :  { %v838_v0 = vpop.permute.xlu1 %837 }
 0x3b3   :  { %975 = vadd.xlane.f32.xlu0 %v974_v2  ;;  %v849_v4 = vsel %vm763_vm6, %v838_v0, 0.0  ;;  %v388_v0 = vmul.f32 %v2399_v17, %v2454_v8 }
 0x3b4   :  { %850 = vadd.xlane.f32.xlu1 %v849_v4 }
 0x3b6   :  { %v899_v7 = vpop.permute.xlu1 %898 }
 0x3b7   :  { %v910_v10 = vsel %vm763_vm6, %v899_v7, 0.0 }
 0x3b8   :  { %911 = vadd.xlane.f32.xlu1 %v910_v10 }
 0x3ba   :  { %v844_v16 = vpop.permute.xlu1 %843  ;;  %v842_v20 = vpop.permute.xlu0 %841 }
 0x3bb   :  { %v858_v22 = vsel %vm763_vm6, %v844_v16, 0.0  ;;  %v855_v40 = vsel %vm763_vm6, %v842_v20, 0.0  ;;  %v390_v16 = vmul.f32 %v2393_v15, %v2454_v8  ;;  %v1893_v20 = vpack.c.bf16 %v388_v0, %v387_v63  ;;  %v1366_v63 = vld [vmem:[#allocation10 + $0x8] sm:$0xff]  ;;  %v1367_v0 = vld [vmem:[#allocation10 + $0x10] sm:$0xff] }
 0x3bc   :  { %972 = vadd.xlane.f32.xlu1 %v971_v21  ;;  %859 = vadd.xlane.f32.xlu0 %v858_v22 }
 0x3be   :  { %v905_v25 = vpop.permute.xlu1 %904  ;;  %v903_v26 = vpop.permute.xlu0 %902 }
 0x3bf   :  { %v919_v27 = vsel %vm763_vm6, %v905_v25, 0.0  ;;  %v916_v29 = vsel %vm763_vm6, %v903_v26, 0.0 }
 0x3c0   :  { %920 = vadd.xlane.f32.xlu0 %v919_v27  ;;  %917 = vadd.xlane.f32.xlu1 %v916_v29  ;;  %v1896_v29 = vpack.c.bf16 %v390_v16, %v389_v6 }
 0x3c2   :  { %v964_v31 = vpop.permute.xlu0 %963  ;;  %v966_v42 = vpop.permute.xlu1 %965 }
 0x3c3   :  { %v977_v41 = vsel %vm763_vm6, %v964_v31, 0.0  ;;  %v980_v43 = vsel %vm763_vm6, %v966_v42, 0.0 }
 0x3c4   :  { %856 = vadd.xlane.f32.xlu0 %v855_v40  ;;  %978 = vadd.xlane.f32.xlu1 %v977_v41  ;;  %v383_v40 = vmul.f32 %v2384_v12, %v2456_v14  ;;  %v384_v41 = vmul.f32 %v2399_v17, %v2456_v14  ;;  %v385_v17 = vmul.f32 %v2379_v11, %v2456_v14 }
 0x3c8   :  { %981 = vadd.xlane.f32.xlu0 %v980_v43 }
 0x3fc   :  { %v790_v44 = vpop.xlane.xlu0 %789 }
 0x400   :  { %v793_v46 = vpop.xlane.xlu0 %792 }
 0x401   :  { %v799_v47 = vpop.xlane.xlu1 %798 }
 0x405   :  { %v796_v51 = vpop.xlane.xlu1 %795 }
 0x438   :  { %v854_v48 = vpop.xlane.xlu0 %853 }
 0x439   :  { %1995 = vrcp.f32 %v854_v48 }
 0x43a   :  { %1997 = vrcp.f32 %v793_v46 }
 0x43c   :  { %v915_v50 = vpop.xlane.xlu0 %914 }
 0x43d   :  { %1999 = vrcp.f32 %v915_v50 }
 0x440   :  { %v976_v34 = vpop.xlane.xlu0 %975 }
 0x441   :  { %2001 = vrcp.f32 %v976_v34  ;;  %v851_v52 = vpop.xlane.xlu1 %850 }
 0x442   :  { %2003 = vrcp.f32 %v851_v52 }
 0x443   :  { %v1996_v49 = vpop.eup %1995 }
 0x444   :  { %v1998_v24 = vpop.eup %1997  ;;  %v2649_v56 = vmul.f32 %v1996_v49, %v2562_v57 }
 0x445   :  { %v912_v23 = vpop.xlane.xlu1 %911  ;;  %v2659_v2 = vmul.f32 %v1998_v24, %v2624_v53 }
 0x446   :  { %2005 = vrcp.f32 %v912_v23 }
 0x447   :  { %v2000_v55 = vpop.eup %1999  ;;  %2007 = vrcp.f32 %v790_v44 }
 0x448   :  { %v2652_v59 = vmul.f32 %v2000_v55, %v2564_v60  ;;  %v992_v60 = vsel %vm763_vm6, %v2659_v2, %v2649_v56 }
 0x449   :  { %v860_v61 = vpop.xlane.xlu0 %859  ;;  %v973_v62 = vpop.xlane.xlu1 %972 }
 0x44a   :  { %2009 = vrcp.f32 %v973_v62  ;;  %v997_v53 = vsel %vm995_vm7, %v992_v60, %v2652_v59  ;;  %v1365_v62 = vld [vmem:[#allocation10] sm:$0xff]  ;;  %v1368_v60 = vld [vmem:[#allocation10 + $0x18] sm:$0xff] }
 0x44b   :  { %v2002_v4 = vpop.eup %2001  ;;  %2011 = vrcp.f32 %v799_v47  ;;  %v1902_v6 = vpack.c.bf16 %v1368_v60, %v1367_v0 }
 0x44c   :  { %v2662_v57 = vmul.f32 %v2002_v4, %v2572_v1  ;;  %2013 = vrcp.f32 %v796_v51  ;;  %v2004_v21 = vpop.eup %2003  ;;  %v1898_v4 = vpack.c.bf16 %v1366_v63, %v1365_v62 }
 0x44d   :  { %v921_v7 = vpop.xlane.xlu0 %920  ;;  %v918_v10 = vpop.xlane.xlu1 %917  ;;  %2015 = vrcp.f32 %v860_v61  ;;  %v2680_v8 = vmul.f32 %v2004_v21, %v2582_v18 }
 0x44e   :  { %v1002_v1 = vsel %vm1000_vm8, %v997_v53, %v2662_v57  ;;  %2017 = vrcp.f32 %v921_v7 }
 0x44f   :  { %1788 = vmatmul.mubr.msk.f32.vlgmr.msra.gmra.mrb[12].mxu1 %vm133_vm0, %v1002_v1  ;;  %2019 = vrcp.f32 %v918_v10 }
 0x450   :  { %v2006_v22 = vpop.eup %2005  ;;  %1894 = vmatpush3.bf16.msra.mxu1 %v1893_v20  ;;  %1809 = vmatprep.mubr.msk.f32.mxu1 %vm2209_vm1, %v2210_v58 }
 0x451   :  { %v2008_v25 = vpop.eup %2007  ;;  %v857_v26 = vpop.xlane.xlu0 %856  ;;  %1895 = vmatprep.subr.bf16.mxu1 %v2207_v30  ;;  %v2683_v31 = vmul.f32 %v2006_v22, %v2588_v28  ;;  %v1625_v22 = vld [vmem:[%s2860_s7] ss:$0 sm:$0xff] }
 0x452   :  { %v979_v27 = vpop.xlane.xlu1 %978  ;;  %2021 = vrcp.f32 %v857_v26  ;;  %v2690_v42 = vmul.f32 %v2008_v25, %v2620_v37  ;;  %v386_v37 = vmul.f32 %v2393_v15, %v2456_v14 }
 0x453   :  { %2023 = vrcp.f32 %v979_v27 }
 0x454   :  { %1897 = vmatpush3.bf16.msra.mxu1 %v1896_v29  ;;  %v2010_v43 = vpop.eup %2009  ;;  %v991_v28 = vsel %vm763_vm6, %v2690_v42, %v2680_v8  ;;  %v1890_v11 = vpack.c.bf16 %v386_v37, %v385_v17 }
 0x455   :  { %v982_v44 = vpop.xlane.xlu0 %981  ;;  %v2693_v18 = vmul.f32 %v2010_v43, %v2574_v3  ;;  %v2012_v46 = vpop.eup %2011  ;;  %v996_v12 = vsel %vm995_vm7, %v991_v28, %v2683_v31  ;;  %v1887_v3 = vpack.c.bf16 %v384_v41, %v383_v40 }
 0x456   :  { %2025 = vrcp.f32 %v982_v44  ;;  %v2014_v47 = vpop.eup %2013 }
 0x457   :  { %v1001_v48 = vsel %vm1000_vm8, %v996_v12, %v2693_v18  ;;  %v2016_v50 = vpop.eup %2015  ;;  %v2711_v15 = vmul.f32 %v2014_v47, %v2632_v54 }
 0x458   :  { %1777 = vmatmul.mubr.msk.f32.vlgmr.msra.gmra.mrb[4].mxu0 %vm133_vm0, %v1001_v48  ;;  %v2018_v51 = vpop.eup %2017  ;;  %v2714_v14 = vmul.f32 %v2016_v50, %v2592_v32 }
 0x459   :  { %1888 = vmatpush3.bf16.msra.mxu0 %v1887_v3  ;;  %1798 = vmatprep.mubr.msk.f32.mxu0 %vm2209_vm1, %v2210_v58  ;;  %v2020_v34 = vpop.eup %2019  ;;  %v2718_v24 = vmul.f32 %v2018_v51, %v2600_v35  ;;  %v2727_v58 = vmul.f32 %v2012_v46, %v2626_v45 }
 0x45a   :  { %1889 = vmatprep.subr.bf16.mxu0 %v2207_v30  ;;  %v2721_v55 = vmul.f32 %v2020_v34, %v2602_v36 }
 0x45c   :  { %v2022_v52 = vpop.eup %2021 }
 0x45d   :  { %v2024_v49 = vpop.eup %2023  ;;  %v867_v23 = vmul.f32 %v2022_v52, %v2594_v33  ;;  %1891 = vmatpush3.bf16.msra.mxu0 %v1890_v11 }
 0x45e   :  { %v2724_v30 = vmul.f32 %v2024_v49, %v2610_v39  ;;  %v994_v39 = vsel %vm763_vm6, %v2727_v58, %v2714_v14  ;;  %1899 = vmatprep.subr.bf16.mxu0 %v1898_v4 }
 0x45f   :  { %v993_v54 = vsel %vm763_vm6, %v2711_v15, %v867_v23  ;;  %v999_v45 = vsel %vm995_vm7, %v994_v39, %v2718_v24 }
 0x460   :  { %v2026_v32 = vpop.eup %2025  ;;  %v998_v33 = vsel %vm995_vm7, %v993_v54, %v2721_v55 }
 0x461   :  { %v1003_v35 = vsel %vm1000_vm8, %v998_v33, %v2724_v30  ;;  %v990_v36 = vmul.f32 %v2026_v32, %v2608_v38 }
 0x462   :  { %1799 = vmatmul.mubr.msk.f32.vlgmr.msra.gmra.mrb[6].mxu0 %vm133_vm0, %v1003_v35 }
 0x463   :  { %v1004_v61 = vsel %vm1000_vm8, %v999_v45, %v990_v36  ;;  %1901 = vmatpush3.bf16.msra.mxu0 %v1898_v4 }
 0x464   :  { %1810 = vmatmul.mubr.msk.f32.vlgmr.msra.gmra.mrb[14].mxu1 %vm133_vm0, %v1004_v61  ;;  %1903 = vmatprep.subr.bf16.mxu0 %v1902_v6 }
 0x467   :  { %1905 = vmatpush3.bf16.msra.mxu0 %v1902_v6 }
 0x522   :  { %v1215_v38 = vpop.f32.mrb[12].mxu1 }
 0x523   :  { %v1789_v7 = vpop.f32.mrb[13].mxu1 }
 0x52b   :  { %v1142_v10 = vpop.f32.mrb[4].mxu0 }
 0x52c   :  { %v1778_v53 = vpop.f32.mrb[5].mxu0  ;;  %1820 = vmatprep.mubr.msk.f32.mxu0 %vm133_vm0, %v1142_v10 }
 0x52d   :  { %1821 = vmatmul.mubr.msk.f32.vlgmr.msra.gmra.mrb[8].mxu0 %vm133_vm0, %v1215_v38 }
 0x535   :  { %v1288_v16 = vpop.f32.mrb[6].mxu0 }
 0x536   :  { %v1800_v1 = vpop.f32.mrb[7].mxu0  ;;  %1823 = vmatprep.mubr.msk.f32.mxu0 %vm133_vm0, %v1288_v16 }
 0x537   :  { %v1361_v20 = vpop.f32.mrb[14].mxu1 }
 0x538   :  { %v1811_v21 = vpop.f32.mrb[15].mxu1  ;;  %1824 = vmatmul.mubr.msk.f32.gmra.mrb[10].mxu0 %vm133_vm0, %v1361_v20 }
 0x600   :  { %v1822_v25 = vpop.f32.mrb[8].mxu0 }
 0x601   :  { %v1460_v26 = vadd.f32 %v1822_v25, %v1625_v22  ;;  %v1454_v27 = vpop.f32.mrb[9].mxu0 }
 0x602   :  { %v1455_v29 = vadd.f32 %v1625_v22, %v1454_v27 }
 0x603   :  { %v1474_v40 = vadd.f32 %v1460_v26, %v2373_v9 }
 0x604   :  { %v1473_v41 = vadd.f32 %v1455_v29, %v2370_v5 }
 0x605   :  { %v1480_v43 = vsel %vm133_vm0, %v1474_v40, 0.0 }
 0x606   :  { %1481 = vadd.xlane.f32.xlu0 %v1480_v43  ;;  %v1477_v44 = vsel %vm133_vm0, %v1473_v41, 0.0 }
 0x607   :  { %1478 = vadd.xlane.f32.xlu1 %v1477_v44 }
 0x60b   :  { %v1825_v28 = vpop.f32.mrb[10].mxu0 }
 0x60c   :  { %v1470_v46 = vadd.f32 %v1825_v28, %v1625_v22  ;;  %v1464_v12 = vpop.f32.mrb[11].mxu0  ;;  %v1630_v28 = vld [vmem:[%s2861_s8] ss:$0 sm:$0xff]  ;;  %s2145_s8 = scalar_lea.vmem %s1574_s14, 512 }
 0x60d   :  { %v1465_v47 = vadd.f32 %v1625_v22, %v1464_v12  ;;  %p2146_p12 = scmp.ne.s32.totalorder %s1574_s14, %s2145_s8  ;;  %p2151_p0 = scmp.lt.s32.totalorder %s2145_s8, %s2145_s8 }
 0x60e   :  { %v1476_v17 = vadd.f32 %v1470_v46, %v2402_v19 }
 0x60f   :  { %v1475_v37 = vadd.f32 %v1465_v47, %v2386_v13  ;;  %p2152_p1 = por %p2151_p0, %p2150_p13 }
 0x610   :  { %v1486_v48 = vsel %vm133_vm0, %v1476_v17, 0.0 }
 0x611   :  { %1487 = vadd.xlane.f32.xlu0 %v1486_v48  ;;  %v1483_v9 = vsel %vm133_vm0, %v1475_v37, 0.0  ;;  %p2153_p2 = pnand %p2152_p1, %p2146_p12 }
 0x612   :  { %1484 = vadd.xlane.f32.xlu1 %v1483_v9 }
 0x623   :  { %1009 = vrot.lane.b32.xlu1 %v2680_v8, %s2211_s5 }
 0x627   :  { %1013 = vrot.lane.b32.xlu0 %v867_v23, %s2211_s5  ;;  %1011 = vrot.lane.b32.xlu1 %v2649_v56, %s2211_s5 }
 0x62b   :  { %1049 = vrot.lane.b32.xlu0 %v2693_v18, %s2213_s25  ;;  %1015 = vrot.lane.b32.xlu1 %v2714_v14, %s2211_s5 }
 0x62f   :  { %1029 = vrot.lane.b32.xlu1 %v2683_v31, %s2212_s23 }
 0x633   :  { %1031 = vrot.lane.b32.xlu1 %v2652_v59, %s2212_s23 }
 0x637   :  { %1033 = vrot.lane.b32.xlu1 %v2721_v55, %s2212_s23 }
 0x63b   :  { %1035 = vrot.lane.b32.xlu1 %v2718_v24, %s2212_s23 }
 0x63f   :  { %1051 = vrot.lane.b32.xlu1 %v2662_v57, %s2213_s25 }
 0x643   :  { %1055 = vrot.lane.b32.xlu1 %v990_v36, %s2213_s25 }
 0x693   :  { %v1482_v5 = vpop.xlane.xlu0 %1481 }
 0x694   :  { %v1491_v13 = vmul.f32 0.03125, %v1482_v5  ;;  %v1479_v19 = vpop.xlane.xlu1 %1478 }
 0x695   :  { %v1490_v56 = vmul.f32 0.03125, %v1479_v19 }
 0x696   :  { %v2779_v8 = vsub.f32 %v1474_v40, %v1491_v13 }
 0x697   :  { %v2781_v31 = vsub.f32 %v1473_v41, %v1490_v56 }
 0x698   :  { %v1499_v59 = vmul.f32 %v2779_v8, %v2779_v8 }
 0x699   :  { %v1498_v3 = vmul.f32 %v2781_v31, %v2781_v31 }
 0x69a   :  { %v1505_v18 = vsel %vm133_vm0, %v1499_v59, 0.0 }
 0x69b   :  { %1506 = vadd.xlane.f32.xlu0 %v1505_v18  ;;  %v1502_v51 = vsel %vm133_vm0, %v1498_v3, 0.0 }
 0x69e   :  { %v1488_v57 = vpop.xlane.xlu0 %1487 }
 0x69f   :  { %v1493_v50 = vmul.f32 0.03125, %v1488_v57  ;;  %v1485_v34 = vpop.xlane.xlu1 %1484  ;;  %1503 = vadd.xlane.f32.xlu0 %v1502_v51 }
 0x6a0   :  { %v1492_v52 = vmul.f32 0.03125, %v1485_v34 }
 0x6a1   :  { %v2789_v11 = vsub.f32 %v1476_v17, %v1493_v50  ;;  %v1631_v17 = vld [vmem:[%s2862_s9] ss:$0 sm:$0xff] }
 0x6a2   :  { %v2791_v49 = vsub.f32 %v1475_v37, %v1492_v52  ;;  %v1014_v33 = vpop.permute.xlu0 %1013 }
 0x6a3   :  { %v1010_v14 = vpop.permute.xlu1 %1009  ;;  %v1501_v23 = vmul.f32 %v2789_v11, %v2789_v11  ;;  %v1023_v4 = vadd.f32 %v1014_v33, %v2711_v15 }
 0x6a4   :  { %v1500_v55 = vmul.f32 %v2791_v49, %v2791_v49  ;;  %v1021_v36 = vadd.f32 %v1010_v14, %v2690_v42 }
 0x6a5   :  { %v1511_v24 = vsel %vm133_vm0, %v1501_v23, 0.0 }
 0x6a6   :  { %1512 = vadd.xlane.f32.xlu0 %v1511_v24  ;;  %v1508_v32 = vsel %vm133_vm0, %v1500_v55, 0.0  ;;  %v1050_v61 = vpop.permute.xlu0 %1049 }
 0x6a7   :  { %v1012_v54 = vpop.permute.xlu1 %1011 }
 0x6a8   :  { %v1022_v7 = vadd.f32 %v1012_v54, %v2659_v2 }
 0x6aa   :  { %1509 = vadd.xlane.f32.xlu0 %v1508_v32 }
 0x6ab   :  { %v1016_v35 = vpop.permute.xlu1 %1015 }
 0x6ac   :  { %v1024_v16 = vadd.f32 %v1016_v35, %v2727_v58 }
 0x6af   :  { %v1030_v39 = vpop.permute.xlu1 %1029 }
 0x6b0   :  { %v1041_v45 = vadd.f32 %v1030_v39, %v1021_v36 }
 0x6b2   :  { %v1061_v62 = vadd.f32 %v1050_v61, %v1041_v45 }
 0x6b3   :  { %v1032_v63 = vpop.permute.xlu1 %1031 }
 0x6b4   :  { %v1065_v0 = vmul.f32 0.25, %v1061_v62  ;;  %v1042_v10 = vadd.f32 %v1032_v63, %v1022_v7 }
 0x6b6   :  { %1069 = vst.msk [vmem:[#allocation12] sm:$0xff] %vm763_vm6, %v1065_v0 }
 0x6b7   :  { %v1034_v60 = vpop.permute.xlu1 %1033 }
 0x6b8   :  { %v1043_v6 = vadd.f32 %v1034_v60, %v1023_v4 }
 0x6bb   :  { %v1036_v38 = vpop.permute.xlu1 %1035 }
 0x6bc   :  { %v1044_v1 = vadd.f32 %v1036_v38, %v1024_v16 }
 0x6bf   :  { %v1052_v53 = vpop.permute.xlu1 %1051 }
 0x6c0   :  { %v1062_v42 = vadd.f32 %v1052_v53, %v1042_v10  ;;  %1053 = vrot.lane.b32.xlu0 %v2724_v30, %s2213_s25 }
 0x6c2   :  { %v1066_v20 = vmul.f32 0.25, %v1062_v42 }
 0x6c3   :  { %v1056_v21 = vpop.permute.xlu1 %1055 }
 0x6c4   :  { %1070 = vst.msk [vmem:[#allocation12 + $0x8] sm:$0xff] %vm763_vm6, %v1066_v20  ;;  %v1064_v15 = vadd.f32 %v1056_v21, %v1044_v1 }
 0x6c6   :  { %v1068_v22 = vmul.f32 0.25, %v1064_v15 }
 0x6c8   :  { %1072 = vst.msk [vmem:[#allocation12 + $0x18] sm:$0xff] %vm763_vm6, %v1068_v22 }
 0x728   :  { %v1507_v25 = vpop.xlane.xlu0 %1506 }
 0x729   :  { %v1515_v26 = vmul.f32 0.03125, %v1507_v25 }
 0x72b   :  { %v1519_v2 = vadd.f32 1e-05, %v1515_v26 }
 0x72c   :  { %v1504_v27 = vpop.xlane.xlu0 %1503 }
 0x72d   :  { %2027 = vrsqrt.f32 %v1519_v2  ;;  %v1514_v29 = vmul.f32 0.03125, %v1504_v27 }
 0x72f   :  { %v1518_v58 = vadd.f32 1e-05, %v1514_v29 }
 0x731   :  { %2029 = vrsqrt.f32 %v1518_v58 }
 0x733   :  { %v1513_v40 = vpop.xlane.xlu0 %1512 }
 0x734   :  { %v1517_v41 = vmul.f32 0.03125, %v1513_v40 }
 0x736   :  { %v1521_v30 = vadd.f32 1e-05, %v1517_v41 }
 0x737   :  { %v1510_v43 = vpop.xlane.xlu0 %1509  ;;  %v2028_v44 = vpop.eup %2027 }
 0x738   :  { %2031 = vrsqrt.f32 %v1521_v30  ;;  %v1516_v46 = vmul.f32 0.03125, %v1510_v43  ;;  %v1527_v12 = vmul.f32 %v2028_v44, %v2779_v8 }
 0x73a   :  { %v1520_v47 = vadd.f32 1e-05, %v1516_v46  ;;  %v1538_v37 = vmul.f32 %v1630_v28, %v1527_v12 }
 0x73b   :  { %v1054_v48 = vpop.permute.xlu0 %1053  ;;  %v2030_v9 = vpop.eup %2029 }
 0x73c   :  { %2033 = vrsqrt.f32 %v1520_v47  ;;  %v1063_v5 = vadd.f32 %v1054_v48, %v1043_v6  ;;  %v1526_v13 = vmul.f32 %v2030_v9, %v2781_v31  ;;  %v1549_v19 = vadd.f32 %v1631_v17, %v1538_v37 }
 0x73e   :  { %v1067_v56 = vmul.f32 0.25, %v1063_v5  ;;  %v1537_v59 = vmul.f32 %v1630_v28, %v1526_v13  ;;  %1553 = vst.msk [vmem:[#allocation11 + $0x8] sm:$0xff] %vm133_vm0, %v1549_v19 }
 0x740   :  { %1071 = vst.msk [vmem:[#allocation12 + $0x10] sm:$0xff] %vm763_vm6, %v1067_v56  ;;  %v1548_v8 = vadd.f32 %v1631_v17, %v1537_v59 }
 0x741   :  { %2156 = shalt.err (!%p2153_p2)
}
 0x742   :  { %s2157_s1 = scalar_lea.hbm %s2865_s12, 512 }
 0x743   :  { %p2158_p3 = scmp.ne.s32.totalorder %s2865_s12, %s2157_s1  ;;  %p2161_p4 = scmp.lt.u32.totalorder %s2157_s1, %s2865_s12 }
 0x745   :  { %p2163_p5 = pnand %p2161_p4, %p2158_p3 }
 0x747   :  { %2166 = shalt.err (!%p2163_p5)
}
 0x748   :  { %1579 = dma.vmem_to_hbm [thread:$0]  %s1574_s14, 512, %s2865_s12, [#allocation13], %s2201_s15, %s2201_s15, %s2202_s16   ;;  %v2032_v31 = vpop.eup %2031  ;;  %1552 = vst.msk [vmem:[#allocation11] sm:$0xff] %vm133_vm0, %v1548_v8 }
 0x749   :  { %v1529_v18 = vmul.f32 %v2032_v31, %v2789_v11  ;;  %v2034_v57 = vpop.eup %2033  ;;  %s2215_s30 = smov [#allocation11]  }
 0x74a   :  { %v1528_v50 = vmul.f32 %v2034_v57, %v2791_v49  ;;  %s1561_s10 = sshll.u32 %s2215_s30, 4  ;;  %s1562_s10 = int_to_ptr.vmem [resolvable:$true] %s1561_s10 }
 0x74b   :  { %v1540_v3 = vmul.f32 %v1630_v28, %v1529_v18  ;;  %s2167_s12 = scalar_lea.vmem %s1562_s10, 512  ;;  %p2172_p7 = scmp.lt.s32.totalorder %s1562_s10, %s1562_s10 }
 0x74c   :  { %v1539_v34 = vmul.f32 %v1630_v28, %v1528_v50  ;;  %p2168_p6 = scmp.ne.s32.totalorder %s1562_s10, %s2167_s12  ;;  %p2173_p8 = scmp.lt.s32.totalorder %s2167_s12, %s2167_s12 }
 0x74d   :  { %v1551_v51 = vadd.f32 %v1631_v17, %v1540_v3 }
 0x74e   :  { %v1550_v52 = vadd.f32 %v1631_v17, %v1539_v34  ;;  %p2174_p9 = por %p2173_p8, %p2172_p7 }
 0x74f   :  { %1555 = vst.msk [vmem:[#allocation11 + $0x18] sm:$0xff] %vm133_vm0, %v1551_v51 }
 0x750   :  { %1554 = vst.msk [vmem:[#allocation11 + $0x10] sm:$0xff] %vm133_vm0, %v1550_v52  ;;  %p2175_p10 = pnand %p2174_p9, %p2168_p6 }
 0x752   :  { %2178 = shalt.err (!%p2175_p10)
}
 0x753   :  { %s2179_s20 = scalar_lea.hbm %s2864_s11, 512 }
 0x754   :  { %p2180_p11 = scmp.ne.s32.totalorder %s2864_s11, %s2179_s20  ;;  %p2183_p12 = scmp.lt.u32.totalorder %s2179_s20, %s2864_s11 }
 0x756   :  { %p2185_p13 = pnand %p2183_p12, %p2180_p11 }
 0x758   :  { %2188 = shalt.err (!%p2185_p13)
}
 0x759   :  { %1567 = dma.vmem_to_hbm [thread:$0]  %s1562_s10, 512, %s2864_s11, [#allocation4], %s2201_s15, %s2201_s15, %s2202_s16  }
 0x75a   :  { %2195 = dma.done.wait [#allocation4], 512  }
 0x75b   :  { %2196 = vsyncadd [#allocation4], 4294966784 }
 0x75c   :  { %2197 = dma.done.wait [#allocation13], 512  }
 0x75d   :  { %2198 = vsyncadd [#allocation13], 4294966784 }
 0x75e   :  { %1586 = vsyncpa [#allocation3], 1 }
 0x75f   :  { %1587 = vsyncpa [#allocation6], 1 }
 0x760   :  { %1588 = vsyncpa [#allocation9], 1 }
 0x761   :  { %1589 = vsyncpa [#allocation4], 1 }
 0x762   :  { %1590 = vsyncpa [#allocation13], 1 }

// kernel: tpu_custom_call.1
= control target key start
LH: loop header
LB: loop body
LE: loop exit
PB: predicated region body
PF: predicated region fallthrough
CT: control target
= control target key end

     0   :  { %18 = vsyncpa [#allocation3], 0  ;;  %s2853_s0 = inlined_call_operand.hbm [shape: f32[4,8,32], index: 0, kind: input, shape index: {}]   ;;  %s2854_s1 = inlined_call_operand.hbm [shape: f32[4,8,32], index: 1, kind: input, shape index: {}]   ;;  %s2855_s2 = inlined_call_operand.hbm [shape: f32[32,64], index: 2, kind: input, shape index: {}]   ;;  %s2856_s3 = inlined_call_operand.vmem [shape: f32[1,64], index: 3, kind: input, shape index: {}]   ;;  %s2857_s4 = inlined_call_operand.hbm [shape: f32[32,32], index: 4, kind: input, shape index: {}]   ;;  %s2858_s5 = inlined_call_operand.vmem [shape: f32[1,32], index: 5, kind: input, shape index: {}]   ;;  %s2859_s6 = inlined_call_operand.hbm [shape: f32[32,32], index: 6, kind: input, shape index: {}]   ;;  %s2860_s7 = inlined_call_operand.vmem [shape: f32[1,32], index: 7, kind: input, shape index: {}]   ;;  %s2861_s8 = inlined_call_operand.vmem [shape: f32[1,32], index: 8, kind: input, shape index: {}]   ;;  %s2862_s9 = inlined_call_operand.vmem [shape: f32[1,32], index: 9, kind: input, shape index: {}]   ;;  %s2863_s10 = inlined_call_operand.vmem [shape: f32[32,32], index: 10, kind: input, shape index: {}]   ;;  %s2864_s11 = inlined_call_operand.hbm [shape: f32[4,8,32], index: 11, kind: output, shape index: {0}]   ;;  %s2865_s12 = inlined_call_operand.hbm [shape: f32[4,8,8], index: 12, kind: output, shape index: {1}]  }
   0x1   :  { %19 = vsyncpa [#allocation6], 0 }
   0x2   :  { %20 = vsyncpa [#allocation9], 0 }
   0x3   :  { %21 = vsyncpa [#allocation4], 0 }
   0x4   :  { %22 = vsyncpa [#allocation13], 0  ;;  %s2199_s21 = smov [#allocation5]   ;;  %s2200_s23 = smov [#allocation8]  }
   0x5   :  { %s40_s22 = sshll.u32 %s2199_s21, 4  ;;  %s66_s24 = sshll.u32 %s2200_s23, 4  ;;  %s41_s22 = int_to_ptr.vmem [resolvable:$true] %s40_s22  ;;  %s2281_s24 = int_to_ptr.vmem [resolvable:$true] %s66_s24 }
   0x6   :  { %s2035_s27 = scalar_lea.hbm %s2854_s1, 512 }
   0x7   :  { %p2036_p0 = scmp.ne.s32.totalorder %s2854_s1, %s2035_s27  ;;  %p2039_p1 = scmp.lt.u32.totalorder %s2035_s27, %s2854_s1 }
   0x9   :  { %p2041_p2 = pnand %p2039_p1, %p2036_p0 }
   0xb   :  { %2044 = shalt.err (!%p2041_p2)
}
   0xc   :  { %s2045_s14 = scalar_lea.vmem %s41_s22, 512  ;;  %p2050_p4 = scmp.lt.s32.totalorder %s41_s22, %s41_s22 }
   0xd   :  { %p2046_p3 = scmp.ne.s32.totalorder %s41_s22, %s2045_s14  ;;  %p2051_p5 = scmp.lt.s32.totalorder %s2045_s14, %s2045_s14 }
   0xf   :  { %p2052_p6 = por %p2051_p5, %p2050_p4 }
  0x11   :  { %p2053_p7 = pnand %p2052_p6, %p2046_p3 }
  0x13   :  { %2056 = shalt.err (!%p2053_p7)
}
  0x14   :  { %s2201_s15 = smov 128   ;;  %s2202_s16 = smov 8  }
  0x15   :  { %46 = dma.hbm_to_vmem [thread:$0]  %s2854_s1, 512, %s41_s22, [#allocation6], %s2201_s15, %s2201_s15, %s2202_s16  }
  0x16   :  { %s2057_s21 = scalar_lea.hbm %s2857_s4, 512 }
  0x17   :  { %p2058_p8 = scmp.ne.s32.totalorder %s2857_s4, %s2057_s21  ;;  %p2061_p9 = scmp.lt.u32.totalorder %s2057_s21, %s2857_s4 }
  0x19   :  { %p2063_p10 = pnand %p2061_p9, %p2058_p8 }
  0x1b   :  { %2066 = shalt.err (!%p2063_p10)
}
  0x1c   :  { %s2067_s28 = scalar_lea.vmem %s2281_s24, 512  ;;  %p2072_p12 = scmp.lt.s32.totalorder %s2281_s24, %s2281_s24 }
  0x1d   :  { %p2068_p11 = scmp.ne.s32.totalorder %s2281_s24, %s2067_s28  ;;  %p2073_p13 = scmp.lt.s32.totalorder %s2067_s28, %s2067_s28 }
  0x1f   :  { %p2074_p0 = por %p2073_p13, %p2072_p12 }
  0x21   :  { %p2075_p1 = pnand %p2074_p0, %p2068_p11 }
  0x23   :  { %2078 = shalt.err (!%p2075_p1)
}
  0x24   :  { %72 = dma.hbm_to_vmem [thread:$0]  %s2857_s4, 512, %s2281_s24, [#allocation9], %s2201_s15, %s2201_s15, %s2202_s16  }
  0x25   :  { %s2203_s29 = smov [#allocation2]   ;;  %s2204_s13 = smov [#allocation7]  }
  0x26   :  { %s28_s30 = sshll.u32 %s2203_s29, 4  ;;  %s52_s14 = sshll.u32 %s2204_s13, 4  ;;  %s29_s30 = int_to_ptr.vmem [resolvable:$true] %s28_s30  ;;  %s2318_s14 = int_to_ptr.vmem [resolvable:$true] %s52_s14 }
  0x27   :  { %s2079_s19 = scalar_lea.hbm %s2853_s0, 512 }
  0x28   :  { %p2080_p2 = scmp.ne.s32.totalorder %s2853_s0, %s2079_s19  ;;  %p2083_p3 = scmp.lt.u32.totalorder %s2079_s19, %s2853_s0 }
  0x2a   :  { %p2085_p4 = pnand %p2083_p3, %p2080_p2 }
  0x2c   :  { %2088 = shalt.err (!%p2085_p4)
}
  0x2d   :  { %s2089_s4 = scalar_lea.vmem %s29_s30, 512  ;;  %p2094_p6 = scmp.lt.s32.totalorder %s29_s30, %s29_s30 }
  0x2e   :  { %p2090_p5 = scmp.ne.s32.totalorder %s29_s30, %s2089_s4  ;;  %p2095_p7 = scmp.lt.s32.totalorder %s2089_s4, %s2089_s4 }
  0x30   :  { %p2096_p8 = por %p2095_p7, %p2094_p6 }
  0x32   :  { %p2097_p9 = pnand %p2096_p8, %p2090_p5 }
  0x34   :  { %2100 = shalt.err (!%p2097_p9)
}
  0x35   :  { %34 = dma.hbm_to_vmem [thread:$0]  %s2853_s0, 512, %s29_s30, [#allocation3], %s2201_s15, %s2201_s15, %s2202_s16  }
  0x36   :  { %s2101_s1 = scalar_lea.hbm %s2855_s2, 512 }
  0x37   :  { %p2102_p10 = scmp.ne.s32.totalorder %s2855_s2, %s2101_s1  ;;  %p2105_p11 = scmp.lt.u32.totalorder %s2101_s1, %s2855_s2 }
  0x39   :  { %p2107_p12 = pnand %p2105_p11, %p2102_p10 }
  0x3b   :  { %2110 = shalt.err (!%p2107_p12)
}
  0x3c   :  { %s2111_s18 = scalar_lea.vmem %s2318_s14, 512  ;;  %p2116_p0 = scmp.lt.s32.totalorder %s2318_s14, %s2318_s14 }
  0x3d   :  { %p2112_p13 = scmp.ne.s32.totalorder %s2318_s14, %s2111_s18  ;;  %p2117_p1 = scmp.lt.s32.totalorder %s2111_s18, %s2111_s18 }
  0x3f   :  { %p2118_p2 = por %p2117_p1, %p2116_p0 }
  0x41   :  { %p2119_p3 = pnand %p2118_p2, %p2112_p13 }
  0x43   :  { %2122 = shalt.err (!%p2119_p3)
}
  0x44   :  { %58 = dma.hbm_to_vmem [thread:$0]  %s2855_s2, 512, %s2318_s14, [#allocation6], %s2201_s15, %s2201_s15, %s2202_s16  }
  0x45   :  { %s2205_s19 = smov [#allocation10]   ;;  %s2123_s25 = scalar_lea.hbm %s2859_s6, 512 }
  0x46   :  { %s80_s20 = sshll.u32 %s2205_s19, 4  ;;  %p2124_p4 = scmp.ne.s32.totalorder %s2859_s6, %s2123_s25  ;;  %s81_s20 = int_to_ptr.vmem [resolvable:$true] %s80_s20 }
  0x47   :  { %p2127_p5 = scmp.lt.u32.totalorder %s2123_s25, %s2859_s6 }
  0x49   :  { %p2129_p6 = pnand %p2127_p5, %p2124_p4 }
  0x4b   :  { %2132 = shalt.err (!%p2129_p6)
}
  0x4c   :  { %s2133_s28 = scalar_lea.vmem %s81_s20, 512  ;;  %p2138_p8 = scmp.lt.s32.totalorder %s81_s20, %s81_s20 }
  0x4d   :  { %p2134_p7 = scmp.ne.s32.totalorder %s81_s20, %s2133_s28  ;;  %p2139_p9 = scmp.lt.s32.totalorder %s2133_s28, %s2133_s28 }
  0x4f   :  { %p2140_p10 = por %p2139_p9, %p2138_p8 }
  0x51   :  { %p2141_p11 = pnand %p2140_p10, %p2134_p7 }
  0x53   :  { %2144 = shalt.err (!%p2141_p11)
}
  0x54   :  { %86 = dma.hbm_to_vmem [thread:$0]  %s2859_s6, 512, %s81_s20, [#allocation9], %s2201_s15, %s2201_s15, %s2202_s16  }
  0x55   :  { %2189 = dma.done.wait [#allocation3], 512  }
  0x56   :  { %2190 = vsyncadd [#allocation3], 4294966784 }
  0x57   :  { %2191 = dma.done.wait [#allocation6], 1024  }
  0x58   :  { %2192 = vsyncadd [#allocation6], 4294966272 }
  0x59   :  { %2193 = dma.done.wait [#allocation9], 1024  }
  0x5a   :  { %2194 = vsyncadd [#allocation9], 4294966272  ;;  %v122_v0 = vld [vmem:[#allocation7] sm:$0xff]  ;;  %v123_v1 = vld [vmem:[#allocation7 + $0x8] sm:$0xff]  ;;  %vm133_vm0 = vcmask 261120   ;;  %s2206_s13 = smov 32  }
  0x5b   :  { %v124_v2 = vld [vmem:[#allocation7 + $0x10] sm:$0xff]  ;;  %v1826_v3 = vpack.c.bf16 %v123_v1, %v122_v0  ;;  %v125_v4 = vld [vmem:[#allocation7 + $0x18] sm:$0xff]  ;;  %v2370_v5 = vld [vmem:[#allocation2] sm:$0xff]  ;;  %v2207_v30 = vmov 0.0|0.0   ;;  %vm2209_vm1 = vmmov 0   ;;  %v2210_v58 = vmov 0.0  }
  0x5c   :  { %v114_v6 = vld [vmem:[#allocation5] sm:$0xff]  ;;  %v1830_v7 = vpack.c.bf16 %v125_v4, %v124_v2  ;;  %v2373_v9 = vld [vmem:[#allocation2 + $0x8] sm:$0xff]  ;;  %v2379_v11 = vld [vmem:[%s2863_s10 + $0x10] sm:$0xff]  ;;  %1842 = vmatprep.subr.bf16.mxu0 %v2207_v30  ;;  %1732 = vmatprep.mubr.msk.f32.mxu0 %vm2209_vm1, %v2210_v58  ;;  %vm808_vm3 = vcmask 130112   ;;  %vm869_vm4 = vcmask 195712   ;;  %vm930_vm5 = vcmask 261312  }
  0x5d   :  { %v118_v8 = vadd.f32 %v114_v6, %v2370_v5  ;;  %1827 = vmatprep.subr.bf16.mxu1 %v1826_v3  ;;  %v115_v10 = vld [vmem:[#allocation5 + $0x8] sm:$0xff]  ;;  %v2384_v12 = vld [vmem:[%s2863_s10] sm:$0xff]  ;;  %v2386_v13 = vld [vmem:[#allocation2 + $0x10] sm:$0xff]  ;;  %351 = vrot.lane.b32.xlu1 %v2379_v11, %s2206_s13  ;;  %vm763_vm6 = vcmask 64512   ;;  %s2212_s23 = smov 112   ;;  %s2213_s25 = smov 104  }
  0x5e   :  { %1829 = vmatpush3.bf16.msra.mxu1 %v1826_v3  ;;  %v116_v14 = vld [vmem:[#allocation5 + $0x10] sm:$0xff]  ;;  %347 = vrot.lane.b32.xlu0 %v2384_v12, %s2206_s13  ;;  %v2393_v15 = vld [vmem:[%s2863_s10 + $0x18] sm:$0xff]  ;;  %v119_v16 = vadd.f32 %v115_v10, %v2373_v9  ;;  %v2399_v17 = vld [vmem:[%s2863_s10 + $0x8] sm:$0xff]  ;;  %vm995_vm7 = vcmask 130048   ;;  %vm1000_vm8 = vcmask 195584   ;;  %s2214_s2 = smov [#allocation12]  }
  0x5f   :  { %1704 = vmatprep.mubr.msk.f32.mxu1 %vm133_vm0, %v118_v8  ;;  %1831 = vmatprep.subr.bf16.mxu1 %v1830_v7  ;;  %v120_v18 = vadd.f32 %v116_v14, %v2386_v13  ;;  %v2402_v19 = vld [vmem:[#allocation2 + $0x18] sm:$0xff]  ;;  %v231_v22 = vld [vmem:[#allocation8] sm:$0xff]  ;;  %v232_v23 = vld [vmem:[#allocation8 + $0x8] sm:$0xff]  ;;  %s1573_s14 = sshll.u32 %s2214_s2, 4  ;;  %s1574_s14 = int_to_ptr.vmem [resolvable:$true] %s1573_s14 }
  0x60   :  { %v117_v20 = vld [vmem:[#allocation5 + $0x18] sm:$0xff]  ;;  %v233_v24 = vld [vmem:[#allocation8 + $0x10] sm:$0xff]  ;;  %v1834_v25 = vpack.c.bf16 %v232_v23, %v231_v22  ;;  %v1591_v31 = vld [vmem:[%s2856_s3] ss:$0 sm:$0xff]  ;;  %s2208_s3 = smov 96   ;;  %p2150_p13 = scmp.lt.s32.totalorder %s1574_s14, %s1574_s14 }
  0x61   :  { %353 = vrot.lane.b32.xlu1 %v2393_v15, %s2206_s13  ;;  %v121_v21 = vadd.f32 %v117_v20, %v2402_v19  ;;  %v234_v26 = vld [vmem:[#allocation8 + $0x18] sm:$0xff]  ;;  %v1596_v6 = vld [vmem:[%s2858_s5] ss:$0 sm:$0xff]  ;;  %vm2460_vm2 = vmpackc.low %vm133_vm0, %vm133_vm0  ;;  %s2211_s5 = smov 120  }
  0x62   :  { %1833 = vmatpush3.bf16.msra.mxu1 %v1830_v7  ;;  %349 = vrot.lane.b32.xlu0 %v2399_v17, %s2206_s13  ;;  %v1838_v27 = vpack.c.bf16 %v234_v26, %v233_v24 }
  0x63   :  { %1835 = vmatprep.subr.bf16.mxu1 %v1834_v25 }
  0x65   :  { %1705 = vmatmul.mubr.msk.f32.vlgmr.msra.gmra.mrb[0].mxu1 %vm133_vm0, %v119_v16 }
  0x66   :  { %1707 = vmatprep.mubr.msk.f32.mxu1 %vm133_vm0, %v120_v18  ;;  %1837 = vmatpush3.bf16.msra.mxu1 %v1834_v25 }
  0x67   :  { %1839 = vmatprep.subr.bf16.mxu1 %v1838_v27 }
  0x69   :  { %1708 = vmatmul.mubr.msk.f32.gmra.mrb[2].mxu1 %vm133_vm0, %v121_v21 }
  0x6a   :  { %1718 = vmatprep.mubr.msk.f32.mxu1 %vm133_vm0, %v2370_v5  ;;  %1841 = vmatpush3.bf16.msra.mxu1 %v1838_v27 }
  0x6b   :  { %1850 = vmatprep.subr.bf16.mxu1 %v2207_v30 }
  0x6d   :  { %1719 = vmatmul.mubr.msk.f32.vlgmr.msra.gmra.mrb[4].mxu1 %vm133_vm0, %v2373_v9 }
  0x6e   :  { %1721 = vmatprep.mubr.msk.f32.mxu1 %vm133_vm0, %v2386_v13 }
  0x71   :  { %1722 = vmatmul.mubr.msk.f32.gmra.mrb[6].mxu1 %vm133_vm0, %v2402_v19 }
  0x72   :  { %1743 = vmatprep.mubr.msk.f32.mxu1 %vm2209_vm1, %v2210_v58 }
  0xcf   :  { %v352_v29 = vpop.permute.xlu1 %351 }
  0xd0   :  { %v348_v28 = vpop.permute.xlu0 %347 }
  0xd3   :  { %v354_v36 = vpop.permute.xlu1 %353 }
  0xd4   :  { %v350_v33 = vpop.permute.xlu0 %349 }
 0x138   :  { %v1706_v32 = vpop.f32.mrb[0].mxu1 }
 0x139   :  { %v2423_v34 = vadd.f32 %v1706_v32, %v1591_v31  ;;  %v212_v35 = vpop.f32.mrb[1].mxu1 }
 0x13a   :  { %v2425_v37 = vadd.f32 %v1591_v31, %v212_v35 }
 0x13b   :  { %v364_v38 = vmul.f32 %v350_v33, %v2423_v34  ;;  %v363_v39 = vmul.f32 %v348_v28, %v2423_v34  ;;  %v366_v40 = vmul.f32 %v354_v36, %v2423_v34  ;;  %v365_v44 = vmul.f32 %v352_v29, %v2423_v34 }
 0x13c   :  { %v360_v41 = vmul.f32 %v350_v33, %v2425_v37  ;;  %v1709_v42 = vpop.f32.mrb[2].mxu1  ;;  %v359_v43 = vmul.f32 %v348_v28, %v2425_v37  ;;  %v362_v48 = vmul.f32 %v354_v36, %v2425_v37  ;;  %v361_v51 = vmul.f32 %v352_v29, %v2425_v37 }
 0x13d   :  { %v2433_v45 = vadd.f32 %v1709_v42, %v1591_v31  ;;  %v222_v46 = vpop.f32.mrb[3].mxu1  ;;  %v1928_v47 = vpack.i.bf16 %v364_v38, %v363_v39  ;;  %v1938_v52 = vpack.i.bf16 %v366_v40, %v365_v44 }
 0x13e   :  { %v2436_v49 = vadd.f32 %v1591_v31, %v222_v46  ;;  %v1923_v50 = vpack.i.bf16 %v360_v41, %v359_v43  ;;  %v1933_v55 = vpack.i.bf16 %v362_v48, %v361_v51 }
 0x13f   :  { %1929 = vrot.lane.b32.xlu1 %v1928_v47, %s2208_s3  ;;  %v371_v53 = vmul.f32 %v348_v28, %v2433_v45  ;;  %v372_v54 = vmul.f32 %v350_v33, %v2433_v45  ;;  %v373_v60 = vmul.f32 %v352_v29, %v2433_v45  ;;  %v374_v61 = vmul.f32 %v354_v36, %v2433_v45 }
 0x140   :  { %1924 = vrot.lane.b32.xlu0 %v1923_v50, %s2208_s3  ;;  %v367_v56 = vmul.f32 %v348_v28, %v2436_v49  ;;  %v368_v57 = vmul.f32 %v350_v33, %v2436_v49  ;;  %v369_v63 = vmul.f32 %v352_v29, %v2436_v49  ;;  %v370_v0 = vmul.f32 %v354_v36, %v2436_v49  ;;  %v1720_v3 = vpop.f32.mrb[4].mxu1 }
 0x141   :  { %v1948_v59 = vpack.i.bf16 %v372_v54, %v371_v53  ;;  %v1958_v1 = vpack.i.bf16 %v374_v61, %v373_v60  ;;  %v320_v4 = vpop.f32.mrb[5].mxu1 }
 0x142   :  { %v1943_v62 = vpack.i.bf16 %v368_v57, %v367_v56  ;;  %v1953_v2 = vpack.i.bf16 %v370_v0, %v369_v63  ;;  %v321_v53 = vadd.f32 %v1596_v6, %v320_v4 }
 0x143   :  { %1939 = vrot.lane.b32.xlu1 %v1938_v52, %s2208_s3 }
 0x144   :  { %1934 = vrot.lane.b32.xlu0 %v1933_v55, %s2208_s3  ;;  %v1723_v7 = vpop.f32.mrb[6].mxu1  ;;  %v376_v60 = vmul.f32 %v2399_v17, %v321_v53  ;;  %v377_v0 = vmul.f32 %v2379_v11, %v321_v53 }
 0x145   :  { %v2454_v8 = vadd.f32 %v1723_v7, %v1596_v6  ;;  %v330_v10 = vpop.f32.mrb[7].mxu1 }
 0x146   :  { %v2456_v14 = vadd.f32 %v1596_v6, %v330_v10 }
 0x147   :  { %1949 = vrot.lane.b32.xlu1 %v1948_v59, %s2208_s3  ;;  %v375_v59 = vmul.f32 %v2384_v12, %v321_v53 }
 0x148   :  { %1944 = vrot.lane.b32.xlu0 %v1943_v62, %s2208_s3 }
 0x14b   :  { %1959 = vrot.lane.b32.xlu1 %v1958_v1, %s2208_s3  ;;  %v378_v1 = vmul.f32 %v2393_v15, %v321_v53 }
 0x14c   :  { %1954 = vrot.lane.b32.xlu0 %v1953_v2, %s2208_s3  ;;  %v1875_v2 = vpack.c.bf16 %v376_v60, %v375_v59 }
 0x14d   :  { %v1878_v4 = vpack.c.bf16 %v378_v1, %v377_v0 }
 0x1b1   :  { %v1930_v16 = vpop.permute.xlu1 %1929 }
 0x1b2   :  { %v1932_v18 = vunpack.i.h.bf16 %v1930_v16  ;;  %v1931_v20 = vunpack.i.l.bf16 %v1930_v16  ;;  %v1925_v21 = vpop.permute.xlu0 %1924 }
 0x1b3   :  { %v1927_v22 = vunpack.i.h.bf16 %v1925_v21  ;;  %v1926_v23 = vunpack.i.l.bf16 %v1925_v21 }
 0x1b4   :  { %v1851_v25 = vpack.c.bf16 %v1932_v18, %v1931_v20 }
 0x1b5   :  { %v1843_v26 = vpack.c.bf16 %v1927_v22, %v1926_v23  ;;  %v1940_v27 = vpop.permute.xlu1 %1939 }
 0x1b6   :  { %1853 = vmatpush3.bf16.xpose.msk.msra.mxu1 %vm2460_vm2, %v1851_v25  ;;  %v1935_v28 = vpop.permute.xlu0 %1934  ;;  %v1942_v29 = vunpack.i.h.bf16 %v1940_v27  ;;  %v1941_v31 = vunpack.i.l.bf16 %v1940_v27 }
 0x1b7   :  { %1845 = vmatpush3.bf16.xpose.msk.msra.mxu0 %vm2460_vm2, %v1843_v26  ;;  %1854 = vmatprep.subr.bf16.mxu1 %v2207_v30  ;;  %v1937_v32 = vunpack.i.h.bf16 %v1935_v28  ;;  %v1936_v33 = vunpack.i.l.bf16 %v1935_v28 }
 0x1b8   :  { %1846 = vmatprep.subr.bf16.mxu0 %v2207_v30  ;;  %v1855_v35 = vpack.c.bf16 %v1942_v29, %v1941_v31 }
 0x1b9   :  { %v1847_v36 = vpack.c.bf16 %v1937_v32, %v1936_v33  ;;  %v1950_v38 = vpop.permute.xlu1 %1949 }
 0x1ba   :  { %v1945_v39 = vpop.permute.xlu0 %1944  ;;  %v1952_v40 = vunpack.i.h.bf16 %v1950_v38  ;;  %v1951_v41 = vunpack.i.l.bf16 %v1950_v38 }
 0x1bb   :  { %v1947_v42 = vunpack.i.h.bf16 %v1945_v39  ;;  %v1946_v43 = vunpack.i.l.bf16 %v1945_v39 }
 0x1bc   :  { %v1867_v44 = vpack.c.bf16 %v1952_v40, %v1951_v41 }
 0x1bd   :  { %v1859_v46 = vpack.c.bf16 %v1947_v42, %v1946_v43  ;;  %v1960_v47 = vpop.permute.xlu1 %1959 }
 0x1be   :  { %1857 = vmatpush3.bf16.xpose.msk.msra.mxu1 %vm2460_vm2, %v1855_v35  ;;  %v1955_v48 = vpop.permute.xlu0 %1954  ;;  %v1962_v50 = vunpack.i.h.bf16 %v1960_v47  ;;  %v1961_v51 = vunpack.i.l.bf16 %v1960_v47 }
 0x1bf   :  { %1849 = vmatpush3.bf16.xpose.msk.msra.mxu0 %vm2460_vm2, %v1847_v36  ;;  %1866 = vmatprep.subr.bf16.mxu1 %v2207_v30  ;;  %v1956_v52 = vunpack.i.l.bf16 %v1955_v48 }
 0x1c0   :  { %1858 = vmatprep.subr.bf16.mxu0 %v2207_v30  ;;  %v1871_v54 = vpack.c.bf16 %v1962_v50, %v1961_v51 }
 0x1c5   :  { %1744 = vmatmul.mubr.msk.f32.vlgmr.msra.gmra.mrb[8].mxu1 %vm133_vm0, %v2423_v34  ;;  %v1957_v34 = vunpack.i.h.bf16 %v1955_v48 }
 0x1c6   :  { %1733 = vmatmul.mubr.msk.f32.vlgmr.msra.gmra.mrb[0].mxu0 %vm133_vm0, %v2425_v37  ;;  %1869 = vmatpush3.bf16.xpose.msk.msra.mxu1 %vm2460_vm2, %v1867_v44  ;;  %v326_v37 = vadd.f32 %v1720_v3, %v1596_v6 }
 0x1c7   :  { %1861 = vmatpush3.bf16.xpose.msk.msra.mxu0 %vm2460_vm2, %v1859_v46  ;;  %1870 = vmatprep.subr.bf16.mxu1 %v2207_v30  ;;  %v1863_v55 = vpack.c.bf16 %v1957_v34, %v1956_v52 }
 0x1c8   :  { %1862 = vmatprep.subr.bf16.mxu0 %v2207_v30  ;;  %1765 = vmatprep.mubr.msk.f32.mxu1 %vm2209_vm1, %v2210_v58  ;;  %v379_v56 = vmul.f32 %v2384_v12, %v326_v37  ;;  %v380_v57 = vmul.f32 %v2399_v17, %v326_v37  ;;  %v381_v61 = vmul.f32 %v2379_v11, %v326_v37 }
 0x1c9   :  { %1754 = vmatprep.mubr.msk.f32.mxu0 %vm2209_vm1, %v2210_v58  ;;  %v382_v62 = vmul.f32 %v2393_v15, %v326_v37 }
 0x1ca   :  { %v1881_v63 = vpack.c.bf16 %v380_v57, %v379_v56 }
 0x1cb   :  { %v1884_v3 = vpack.c.bf16 %v382_v62, %v381_v61 }
 0x1ce   :  { %1873 = vmatpush3.bf16.xpose.msk.msra.mxu1 %vm2460_vm2, %v1871_v54 }
 0x1cf   :  { %1865 = vmatpush3.bf16.xpose.msk.msra.mxu0 %vm2460_vm2, %v1863_v55  ;;  %1880 = vmatprep.subr.bf16.mxu1 %v2207_v30 }
 0x1d0   :  { %1874 = vmatprep.subr.bf16.mxu0 %v2207_v30 }
 0x1d5   :  { %1766 = vmatmul.mubr.msk.f32.vlgmr.msra.gmra.mrb[10].mxu1 %vm133_vm0, %v2433_v45 }
 0x1d6   :  { %1755 = vmatmul.mubr.msk.f32.vlgmr.msra.gmra.mrb[2].mxu0 %vm133_vm0, %v2436_v49  ;;  %1882 = vmatpush3.bf16.msra.mxu1 %v1881_v63 }
 0x1d7   :  { %1876 = vmatpush3.bf16.msra.mxu0 %v1875_v2  ;;  %1883 = vmatprep.subr.bf16.mxu1 %v2207_v30 }
 0x1d8   :  { %1877 = vmatprep.subr.bf16.mxu0 %v2207_v30  ;;  %1787 = vmatprep.mubr.msk.f32.mxu1 %vm2209_vm1, %v2210_v58 }
 0x1d9   :  { %1776 = vmatprep.mubr.msk.f32.mxu0 %vm2209_vm1, %v2210_v58 }
 0x1da   :  { %1885 = vmatpush3.bf16.msra.mxu1 %v1884_v3 }
 0x1db   :  { %1879 = vmatpush3.bf16.msra.mxu0 %v1878_v4  ;;  %1892 = vmatprep.subr.bf16.mxu1 %v2207_v30 }
 0x1dc   :  { %1886 = vmatprep.subr.bf16.mxu0 %v2207_v30 }
 0x298   :  { %v2516_v45 = vpop.f32.mrb[8].mxu1 }
 0x299   :  { %v2518_v49 = vpop.f32.mrb[0].mxu0  ;;  %v1745_v6 = vpop.f32.mrb[9].mxu1  ;;  %v812_v7 = vsel %vm808_vm3, %v2516_v45, -inf  ;;  %v873_v10 = vsel %vm869_vm4, %v2516_v45, -inf  ;;  %v934_v18 = vsel %vm930_vm5, %v2516_v45, -inf  ;;  %v767_v35 = vsel %vm763_vm6, %v2516_v45, -inf }
 0x29a   :  { %813 = vmax.xlane.f32.xlu1 %v812_v7  ;;  %874 = vmax.xlane.f32.xlu0 %v873_v10  ;;  %v1734_v16 = vpop.f32.mrb[1].mxu0  ;;  %v931_v20 = vsel %vm930_vm5, %v2518_v49, -inf  ;;  %v809_v21 = vsel %vm808_vm3, %v2518_v49, -inf  ;;  %v870_v22 = vsel %vm869_vm4, %v2518_v49, -inf  ;;  %v764_v36 = vsel %vm763_vm6, %v2518_v49, -inf }
 0x29e   :  { %935 = vmax.xlane.f32.xlu0 %v934_v18  ;;  %932 = vmax.xlane.f32.xlu1 %v931_v20 }
 0x2a2   :  { %810 = vmax.xlane.f32.xlu0 %v809_v21 }
 0x2a6   :  { %871 = vmax.xlane.f32.xlu0 %v870_v22 }
 0x2a8   :  { %v2532_v23 = vpop.f32.mrb[10].mxu1 }
 0x2a9   :  { %v2534_v24 = vpop.f32.mrb[2].mxu0  ;;  %v1767_v25 = vpop.f32.mrb[11].mxu1  ;;  %v818_v26 = vsel %vm808_vm3, %v2532_v23, -inf  ;;  %v879_v29 = vsel %vm869_vm4, %v2532_v23, -inf  ;;  %v940_v32 = vsel %vm930_vm5, %v2532_v23, -inf  ;;  %v773_v38 = vsel %vm763_vm6, %v2532_v23, -inf }
 0x2aa   :  { %819 = vmax.xlane.f32.xlu0 %v818_v26  ;;  %v1756_v27 = vpop.f32.mrb[3].mxu0  ;;  %v815_v28 = vsel %vm808_vm3, %v2534_v24, -inf  ;;  %v876_v31 = vsel %vm869_vm4, %v2534_v24, -inf  ;;  %v937_v33 = vsel %vm930_vm5, %v2534_v24, -inf  ;;  %v770_v39 = vsel %vm763_vm6, %v2534_v24, -inf }
 0x2ab   :  { %816 = vmax.xlane.f32.xlu1 %v815_v28 }
 0x2ae   :  { %880 = vmax.xlane.f32.xlu0 %v879_v29 }
 0x2af   :  { %877 = vmax.xlane.f32.xlu1 %v876_v31 }
 0x2b2   :  { %941 = vmax.xlane.f32.xlu0 %v940_v32 }
 0x2b3   :  { %938 = vmax.xlane.f32.xlu1 %v937_v33 }
 0x2b6   :  { %768 = vmax.xlane.f32.xlu0 %v767_v35 }
 0x2b7   :  { %765 = vmax.xlane.f32.xlu1 %v764_v36 }
 0x2ba   :  { %774 = vmax.xlane.f32.xlu0 %v773_v38 }
 0x2bb   :  { %771 = vmax.xlane.f32.xlu1 %v770_v39 }
 0x327   :  { %v814_v40 = vpop.xlane.xlu1 %813  ;;  %v875_v41 = vpop.xlane.xlu0 %874 }
 0x328   :  { %v822_v42 = vsub.f32 %v2516_v45, %v814_v40  ;;  %v883_v43 = vsub.f32 %v2516_v45, %v875_v41 }
 0x32a   :  { %v827_v44 = vmul.f32 1.442695, %v822_v42  ;;  %v888_v46 = vmul.f32 1.442695, %v883_v43 }
 0x32b   :  { %v936_v47 = vpop.xlane.xlu0 %935  ;;  %v933_v48 = vpop.xlane.xlu1 %932 }
 0x32c   :  { %1963 = vpow2.f32 %v827_v44  ;;  %v944_v50 = vsub.f32 %v2516_v45, %v936_v47  ;;  %v943_v51 = vsub.f32 %v2518_v49, %v933_v48 }
 0x32d   :  { %1965 = vpow2.f32 %v888_v46 }
 0x32e   :  { %v949_v34 = vmul.f32 1.442695, %v944_v50  ;;  %v947_v52 = vmul.f32 1.442695, %v943_v51 }
 0x32f   :  { %v811_v37 = vpop.xlane.xlu0 %810 }
 0x330   :  { %1967 = vpow2.f32 %v949_v34  ;;  %v821_v53 = vsub.f32 %v2518_v49, %v811_v37 }
 0x331   :  { %1969 = vpow2.f32 %v947_v52 }
 0x332   :  { %v825_v54 = vmul.f32 1.442695, %v821_v53 }
 0x333   :  { %v872_v55 = vpop.xlane.xlu0 %871 }
 0x334   :  { %1971 = vpow2.f32 %v825_v54  ;;  %v882_v56 = vsub.f32 %v2518_v49, %v872_v55 }
 0x336   :  { %v2562_v57 = vpop.eup %1963  ;;  %v886_v59 = vmul.f32 1.442695, %v882_v56 }
 0x337   :  { %v2564_v60 = vpop.eup %1965  ;;  %839 = vrot.lane.b32.xlu0 %v2562_v57, %s2211_s5  ;;  %v820_v61 = vpop.xlane.xlu0 %819 }
 0x338   :  { %1973 = vpow2.f32 %v886_v59  ;;  %v824_v62 = vsub.f32 %v2532_v23, %v820_v61  ;;  %900 = vrot.lane.b32.xlu1 %v2564_v60, %s2212_s23  ;;  %v817_v63 = vpop.xlane.xlu1 %816 }
 0x339   :  { %v823_v0 = vsub.f32 %v2534_v24, %v817_v63 }
 0x33a   :  { %v2572_v1 = vpop.eup %1967  ;;  %v831_v2 = vmul.f32 1.442695, %v824_v62 }
 0x33b   :  { %v2574_v3 = vpop.eup %1969  ;;  %v829_v4 = vmul.f32 1.442695, %v823_v0  ;;  %v881_v6 = vpop.xlane.xlu0 %880 }
 0x33c   :  { %1975 = vpow2.f32 %v831_v2  ;;  %959 = vrot.lane.b32.xlu0 %v2574_v3, %s2213_s25  ;;  %v885_v7 = vsub.f32 %v2532_v23, %v881_v6  ;;  %961 = vrot.lane.b32.xlu1 %v2572_v1, %s2213_s25  ;;  %v878_v10 = vpop.xlane.xlu1 %877 }
 0x33d   :  { %1977 = vpow2.f32 %v829_v4  ;;  %v884_v16 = vsub.f32 %v2534_v24, %v878_v10 }
 0x33e   :  { %v2582_v18 = vpop.eup %1971  ;;  %v892_v20 = vmul.f32 1.442695, %v885_v7 }
 0x33f   :  { %v890_v21 = vmul.f32 1.442695, %v884_v16  ;;  %v942_v22 = vpop.xlane.xlu0 %941 }
 0x340   :  { %1979 = vpow2.f32 %v892_v20  ;;  %v946_v25 = vsub.f32 %v2532_v23, %v942_v22  ;;  %837 = vrot.lane.b32.xlu1 %v2582_v18, %s2211_s5  ;;  %v939_v26 = vpop.xlane.xlu1 %938 }
 0x341   :  { %1981 = vpow2.f32 %v890_v21  ;;  %v945_v27 = vsub.f32 %v2534_v24, %v939_v26 }
 0x342   :  { %v2588_v28 = vpop.eup %1973  ;;  %v953_v29 = vmul.f32 1.442695, %v946_v25 }
 0x343   :  { %v951_v31 = vmul.f32 1.442695, %v945_v27  ;;  %v769_v40 = vpop.xlane.xlu0 %768 }
 0x344   :  { %1983 = vpow2.f32 %v953_v29  ;;  %898 = vrot.lane.b32.xlu1 %v2588_v28, %s2212_s23  ;;  %v766_v41 = vpop.xlane.xlu1 %765  ;;  %v777_v44 = vsub.f32 %v2516_v45, %v769_v40 }
 0x345   :  { %1985 = vpow2.f32 %v951_v31  ;;  %v776_v42 = vsub.f32 %v2518_v49, %v766_v41 }
 0x346   :  { %v2592_v32 = vpop.eup %1975  ;;  %v782_v50 = vmul.f32 1.442695, %v777_v44 }
 0x347   :  { %v2594_v33 = vpop.eup %1977  ;;  %v775_v43 = vpop.xlane.xlu0 %774  ;;  %v780_v46 = vmul.f32 1.442695, %v776_v42 }
 0x348   :  { %843 = vrot.lane.b32.xlu1 %v2592_v32, %s2211_s5  ;;  %841 = vrot.lane.b32.xlu0 %v2594_v33, %s2211_s5  ;;  %v779_v47 = vsub.f32 %v2532_v23, %v775_v43  ;;  %v772_v48 = vpop.xlane.xlu1 %771 }
 0x349   :  { %1987 = vpow2.f32 %v780_v46  ;;  %v778_v34 = vsub.f32 %v2534_v24, %v772_v48 }
 0x34a   :  { %v2600_v35 = vpop.eup %1979  ;;  %v786_v51 = vmul.f32 1.442695, %v779_v47  ;;  %1989 = vpow2.f32 %v782_v50 }
 0x34b   :  { %v2602_v36 = vpop.eup %1981  ;;  %v784_v52 = vmul.f32 1.442695, %v778_v34 }
 0x34c   :  { %904 = vrot.lane.b32.xlu1 %v2600_v35, %s2212_s23  ;;  %902 = vrot.lane.b32.xlu0 %v2602_v36, %s2212_s23  ;;  %1991 = vpow2.f32 %v786_v51 }
 0x34d   :  { %1993 = vpow2.f32 %v784_v52 }
 0x34e   :  { %v2608_v38 = vpop.eup %1983 }
 0x34f   :  { %v2610_v39 = vpop.eup %1985 }
 0x350   :  { %965 = vrot.lane.b32.xlu1 %v2608_v38, %s2213_s25  ;;  %963 = vrot.lane.b32.xlu0 %v2610_v39, %s2213_s25 }
 0x353   :  { %v2620_v37 = vpop.eup %1987 }
 0x354   :  { %v788_v49 = vsel %vm763_vm6, %v2620_v37, 0.0  ;;  %v2624_v53 = vpop.eup %1989 }
 0x355   :  { %v791_v23 = vsel %vm763_vm6, %v2624_v53, 0.0 }
 0x356   :  { %v2626_v45 = vpop.eup %1991 }
 0x357   :  { %v797_v24 = vsel %vm763_vm6, %v2626_v45, 0.0  ;;  %v2632_v54 = vpop.eup %1993 }
 0x358   :  { %v794_v55 = vsel %vm763_vm6, %v2632_v54, 0.0 }
 0x36f   :  { %789 = vadd.xlane.f32.xlu0 %v788_v49 }
 0x373   :  { %792 = vadd.xlane.f32.xlu0 %v791_v23 }
 0x374   :  { %798 = vadd.xlane.f32.xlu1 %v797_v24 }
 0x378   :  { %795 = vadd.xlane.f32.xlu1 %v794_v55 }
 0x3a9   :  { %v840_v56 = vpop.permute.xlu0 %839 }
 0x3aa   :  { %v901_v59 = vpop.permute.xlu1 %900  ;;  %v852_v61 = vsel %vm763_vm6, %v840_v56, 0.0 }
 0x3ab   :  { %853 = vadd.xlane.f32.xlu0 %v852_v61  ;;  %v913_v63 = vsel %vm763_vm6, %v901_v59, 0.0 }
 0x3ae   :  { %v962_v62 = vpop.permute.xlu1 %961  ;;  %v960_v6 = vpop.permute.xlu0 %959 }
 0x3af   :  { %914 = vadd.xlane.f32.xlu0 %v913_v63  ;;  %v974_v2 = vsel %vm763_vm6, %v962_v62, 0.0  ;;  %v971_v21 = vsel %vm763_vm6, %v960_v6, 0.0  ;;  %v387_v63 = vmul.f32 %v2384_v12, %v2454_v8  ;;  %v389_v6 = vmul.f32 %v2379_v11, %v2454_v8 }
 0x3b2   :  { %v838_v0 = vpop.permute.xlu1 %837 }
 0x3b3   :  { %975 = vadd.xlane.f32.xlu0 %v974_v2  ;;  %v849_v4 = vsel %vm763_vm6, %v838_v0, 0.0  ;;  %v388_v0 = vmul.f32 %v2399_v17, %v2454_v8 }
 0x3b4   :  { %850 = vadd.xlane.f32.xlu1 %v849_v4 }
 0x3b6   :  { %v899_v7 = vpop.permute.xlu1 %898 }
 0x3b7   :  { %v910_v10 = vsel %vm763_vm6, %v899_v7, 0.0 }
 0x3b8   :  { %911 = vadd.xlane.f32.xlu1 %v910_v10 }
 0x3ba   :  { %v844_v16 = vpop.permute.xlu1 %843  ;;  %v842_v20 = vpop.permute.xlu0 %841 }
 0x3bb   :  { %v858_v22 = vsel %vm763_vm6, %v844_v16, 0.0  ;;  %v855_v40 = vsel %vm763_vm6, %v842_v20, 0.0  ;;  %v390_v16 = vmul.f32 %v2393_v15, %v2454_v8  ;;  %v1893_v20 = vpack.c.bf16 %v388_v0, %v387_v63  ;;  %v1366_v63 = vld [vmem:[#allocation10 + $0x8] sm:$0xff]  ;;  %v1367_v0 = vld [vmem:[#allocation10 + $0x10] sm:$0xff] }
 0x3bc   :  { %972 = vadd.xlane.f32.xlu1 %v971_v21  ;;  %859 = vadd.xlane.f32.xlu0 %v858_v22 }
 0x3be   :  { %v905_v25 = vpop.permute.xlu1 %904  ;;  %v903_v26 = vpop.permute.xlu0 %902 }
 0x3bf   :  { %v919_v27 = vsel %vm763_vm6, %v905_v25, 0.0  ;;  %v916_v29 = vsel %vm763_vm6, %v903_v26, 0.0 }
 0x3c0   :  { %920 = vadd.xlane.f32.xlu0 %v919_v27  ;;  %917 = vadd.xlane.f32.xlu1 %v916_v29  ;;  %v1896_v29 = vpack.c.bf16 %v390_v16, %v389_v6 }
 0x3c2   :  { %v964_v31 = vpop.permute.xlu0 %963  ;;  %v966_v42 = vpop.permute.xlu1 %965 }
 0x3c3   :  { %v977_v41 = vsel %vm763_vm6, %v964_v31, 0.0  ;;  %v980_v43 = vsel %vm763_vm6, %v966_v42, 0.0 }
 0x3c4   :  { %856 = vadd.xlane.f32.xlu0 %v855_v40  ;;  %978 = vadd.xlane.f32.xlu1 %v977_v41  ;;  %v383_v40 = vmul.f32 %v2384_v12, %v2456_v14  ;;  %v384_v41 = vmul.f32 %v2399_v17, %v2456_v14  ;;  %v385_v17 = vmul.f32 %v2379_v11, %v2456_v14 }
 0x3c8   :  { %981 = vadd.xlane.f32.xlu0 %v980_v43 }
 0x3fc   :  { %v790_v44 = vpop.xlane.xlu0 %789 }
 0x400   :  { %v793_v46 = vpop.xlane.xlu0 %792 }
 0x401   :  { %v799_v47 = vpop.xlane.xlu1 %798 }
 0x405   :  { %v796_v51 = vpop.xlane.xlu1 %795 }
 0x438   :  { %v854_v48 = vpop.xlane.xlu0 %853 }
 0x439   :  { %1995 = vrcp.f32 %v854_v48 }
 0x43a   :  { %1997 = vrcp.f32 %v793_v46 }
 0x43c   :  { %v915_v50 = vpop.xlane.xlu0 %914 }
 0x43d   :  { %1999 = vrcp.f32 %v915_v50 }
 0x440   :  { %v976_v34 = vpop.xlane.xlu0 %975 }
 0x441   :  { %2001 = vrcp.f32 %v976_v34  ;;  %v851_v52 = vpop.xlane.xlu1 %850 }
 0x442   :  { %2003 = vrcp.f32 %v851_v52 }
 0x443   :  { %v1996_v49 = vpop.eup %1995 }
 0x444   :  { %v1998_v24 = vpop.eup %1997  ;;  %v2649_v56 = vmul.f32 %v1996_v49, %v2562_v57 }
 0x445   :  { %v912_v23 = vpop.xlane.xlu1 %911  ;;  %v2659_v2 = vmul.f32 %v1998_v24, %v2624_v53 }
 0x446   :  { %2005 = vrcp.f32 %v912_v23 }
 0x447   :  { %v2000_v55 = vpop.eup %1999  ;;  %2007 = vrcp.f32 %v790_v44 }
 0x448   :  { %v2652_v59 = vmul.f32 %v2000_v55, %v2564_v60  ;;  %v992_v60 = vsel %vm763_vm6, %v2659_v2, %v2649_v56 }
 0x449   :  { %v860_v61 = vpop.xlane.xlu0 %859  ;;  %v973_v62 = vpop.xlane.xlu1 %972 }
 0x44a   :  { %2009 = vrcp.f32 %v973_v62  ;;  %v997_v53 = vsel %vm995_vm7, %v992_v60, %v2652_v59  ;;  %v1365_v62 = vld [vmem:[#allocation10] sm:$0xff]  ;;  %v1368_v60 = vld [vmem:[#allocation10 + $0x18] sm:$0xff] }
 0x44b   :  { %v2002_v4 = vpop.eup %2001  ;;  %2011 = vrcp.f32 %v799_v47  ;;  %v1902_v6 = vpack.c.bf16 %v1368_v60, %v1367_v0 }
 0x44c   :  { %v2662_v57 = vmul.f32 %v2002_v4, %v2572_v1  ;;  %2013 = vrcp.f32 %v796_v51  ;;  %v2004_v21 = vpop.eup %2003  ;;  %v1898_v4 = vpack.c.bf16 %v1366_v63, %v1365_v62 }
 0x44d   :  { %v921_v7 = vpop.xlane.xlu0 %920  ;;  %v918_v10 = vpop.xlane.xlu1 %917  ;;  %2015 = vrcp.f32 %v860_v61  ;;  %v2680_v8 = vmul.f32 %v2004_v21, %v2582_v18 }
 0x44e   :  { %v1002_v1 = vsel %vm1000_vm8, %v997_v53, %v2662_v57  ;;  %2017 = vrcp.f32 %v921_v7 }
 0x44f   :  { %1788 = vmatmul.mubr.msk.f32.vlgmr.msra.gmra.mrb[12].mxu1 %vm133_vm0, %v1002_v1  ;;  %2019 = vrcp.f32 %v918_v10 }
 0x450   :  { %v2006_v22 = vpop.eup %2005  ;;  %1894 = vmatpush3.bf16.msra.mxu1 %v1893_v20  ;;  %1809 = vmatprep.mubr.msk.f32.mxu1 %vm2209_vm1, %v2210_v58 }
 0x451   :  { %v2008_v25 = vpop.eup %2007  ;;  %v857_v26 = vpop.xlane.xlu0 %856  ;;  %1895 = vmatprep.subr.bf16.mxu1 %v2207_v30  ;;  %v2683_v31 = vmul.f32 %v2006_v22, %v2588_v28  ;;  %v1625_v22 = vld [vmem:[%s2860_s7] ss:$0 sm:$0xff] }
 0x452   :  { %v979_v27 = vpop.xlane.xlu1 %978  ;;  %2021 = vrcp.f32 %v857_v26  ;;  %v2690_v42 = vmul.f32 %v2008_v25, %v2620_v37  ;;  %v386_v37 = vmul.f32 %v2393_v15, %v2456_v14 }
 0x453   :  { %2023 = vrcp.f32 %v979_v27 }
 0x454   :  { %1897 = vmatpush3.bf16.msra.mxu1 %v1896_v29  ;;  %v2010_v43 = vpop.eup %2009  ;;  %v991_v28 = vsel %vm763_vm6, %v2690_v42, %v2680_v8  ;;  %v1890_v11 = vpack.c.bf16 %v386_v37, %v385_v17 }
 0x455   :  { %v982_v44 = vpop.xlane.xlu0 %981  ;;  %v2693_v18 = vmul.f32 %v2010_v43, %v2574_v3  ;;  %v2012_v46 = vpop.eup %2011  ;;  %v996_v12 = vsel %vm995_vm7, %v991_v28, %v2683_v31  ;;  %v1887_v3 = vpack.c.bf16 %v384_v41, %v383_v40 }
 0x456   :  { %2025 = vrcp.f32 %v982_v44  ;;  %v2014_v47 = vpop.eup %2013 }
 0x457   :  { %v1001_v48 = vsel %vm1000_vm8, %v996_v12, %v2693_v18  ;;  %v2016_v50 = vpop.eup %2015  ;;  %v2711_v15 = vmul.f32 %v2014_v47, %v2632_v54 }
 0x458   :  { %1777 = vmatmul.mubr.msk.f32.vlgmr.msra.gmra.mrb[4].mxu0 %vm133_vm0, %v1001_v48  ;;  %v2018_v51 = vpop.eup %2017  ;;  %v2714_v14 = vmul.f32 %v2016_v50, %v2592_v32 }
 0x459   :  { %1888 = vmatpush3.bf16.msra.mxu0 %v1887_v3  ;;  %1798 = vmatprep.mubr.msk.f32.mxu0 %vm2209_vm1, %v2210_v58  ;;  %v2020_v34 = vpop.eup %2019  ;;  %v2718_v24 = vmul.f32 %v2018_v51, %v2600_v35  ;;  %v2727_v58 = vmul.f32 %v2012_v46, %v2626_v45 }
 0x45a   :  { %1889 = vmatprep.subr.bf16.mxu0 %v2207_v30  ;;  %v2721_v55 = vmul.f32 %v2020_v34, %v2602_v36 }
 0x45c   :  { %v2022_v52 = vpop.eup %2021 }
 0x45d   :  { %v2024_v49 = vpop.eup %2023  ;;  %v867_v23 = vmul.f32 %v2022_v52, %v2594_v33  ;;  %1891 = vmatpush3.bf16.msra.mxu0 %v1890_v11 }
 0x45e   :  { %v2724_v30 = vmul.f32 %v2024_v49, %v2610_v39  ;;  %v994_v39 = vsel %vm763_vm6, %v2727_v58, %v2714_v14  ;;  %1899 = vmatprep.subr.bf16.mxu0 %v1898_v4 }
 0x45f   :  { %v993_v54 = vsel %vm763_vm6, %v2711_v15, %v867_v23  ;;  %v999_v45 = vsel %vm995_vm7, %v994_v39, %v2718_v24 }
 0x460   :  { %v2026_v32 = vpop.eup %2025  ;;  %v998_v33 = vsel %vm995_vm7, %v993_v54, %v2721_v55 }
 0x461   :  { %v1003_v35 = vsel %vm1000_vm8, %v998_v33, %v2724_v30  ;;  %v990_v36 = vmul.f32 %v2026_v32, %v2608_v38 }
 0x462   :  { %1799 = vmatmul.mubr.msk.f32.vlgmr.msra.gmra.mrb[6].mxu0 %vm133_vm0, %v1003_v35 }
 0x463   :  { %v1004_v61 = vsel %vm1000_vm8, %v999_v45, %v990_v36  ;;  %1901 = vmatpush3.bf16.msra.mxu0 %v1898_v4 }
 0x464   :  { %1810 = vmatmul.mubr.msk.f32.vlgmr.msra.gmra.mrb[14].mxu1 %vm133_vm0, %v1004_v61  ;;  %1903 = vmatprep.subr.bf16.mxu0 %v1902_v6 }
 0x467   :  { %1905 = vmatpush3.bf16.msra.mxu0 %v1902_v6 }
 0x522   :  { %v1215_v38 = vpop.f32.mrb[12].mxu1 }
 0x523   :  { %v1789_v7 = vpop.f32.mrb[13].mxu1 }
 0x52b   :  { %v1142_v10 = vpop.f32.mrb[4].mxu0 }
 0x52c   :  { %v1778_v53 = vpop.f32.mrb[5].mxu0  ;;  %1820 = vmatprep.mubr.msk.f32.mxu0 %vm133_vm0, %v1142_v10 }
 0x52d   :  { %1821 = vmatmul.mubr.msk.f32.vlgmr.msra.gmra.mrb[8].mxu0 %vm133_vm0, %v1215_v38 }
 0x535   :  { %v1288_v16 = vpop.f32.mrb[6].mxu0 }
 0x536   :  { %v1800_v1 = vpop.f32.mrb[7].mxu0  ;;  %1823 = vmatprep.mubr.msk.f32.mxu0 %vm133_vm0, %v1288_v16 }
 0x537   :  { %v1361_v20 = vpop.f32.mrb[14].mxu1 }
 0x538   :  { %v1811_v21 = vpop.f32.mrb[15].mxu1  ;;  %1824 = vmatmul.mubr.msk.f32.gmra.mrb[10].mxu0 %vm133_vm0, %v1361_v20 }
 0x600   :  { %v1822_v25 = vpop.f32.mrb[8].mxu0 }
 0x601   :  { %v1460_v26 = vadd.f32 %v1822_v25, %v1625_v22  ;;  %v1454_v27 = vpop.f32.mrb[9].mxu0 }
 0x602   :  { %v1455_v29 = vadd.f32 %v1625_v22, %v1454_v27 }
 0x603   :  { %v1474_v40 = vadd.f32 %v1460_v26, %v2373_v9 }
 0x604   :  { %v1473_v41 = vadd.f32 %v1455_v29, %v2370_v5 }
 0x605   :  { %v1480_v43 = vsel %vm133_vm0, %v1474_v40, 0.0 }
 0x606   :  { %1481 = vadd.xlane.f32.xlu0 %v1480_v43  ;;  %v1477_v44 = vsel %vm133_vm0, %v1473_v41, 0.0 }
 0x607   :  { %1478 = vadd.xlane.f32.xlu1 %v1477_v44 }
 0x60b   :  { %v1825_v28 = vpop.f32.mrb[10].mxu0 }
 0x60c   :  { %v1470_v46 = vadd.f32 %v1825_v28, %v1625_v22  ;;  %v1464_v12 = vpop.f32.mrb[11].mxu0  ;;  %v1630_v28 = vld [vmem:[%s2861_s8] ss:$0 sm:$0xff]  ;;  %s2145_s8 = scalar_lea.vmem %s1574_s14, 512 }
 0x60d   :  { %v1465_v47 = vadd.f32 %v1625_v22, %v1464_v12  ;;  %p2146_p12 = scmp.ne.s32.totalorder %s1574_s14, %s2145_s8  ;;  %p2151_p0 = scmp.lt.s32.totalorder %s2145_s8, %s2145_s8 }
 0x60e   :  { %v1476_v17 = vadd.f32 %v1470_v46, %v2402_v19 }
 0x60f   :  { %v1475_v37 = vadd.f32 %v1465_v47, %v2386_v13  ;;  %p2152_p1 = por %p2151_p0, %p2150_p13 }
 0x610   :  { %v1486_v48 = vsel %vm133_vm0, %v1476_v17, 0.0 }
 0x611   :  { %1487 = vadd.xlane.f32.xlu0 %v1486_v48  ;;  %v1483_v9 = vsel %vm133_vm0, %v1475_v37, 0.0  ;;  %p2153_p2 = pnand %p2152_p1, %p2146_p12 }
 0x612   :  { %1484 = vadd.xlane.f32.xlu1 %v1483_v9 }
 0x623   :  { %1009 = vrot.lane.b32.xlu1 %v2680_v8, %s2211_s5 }
 0x627   :  { %1013 = vrot.lane.b32.xlu0 %v867_v23, %s2211_s5  ;;  %1011 = vrot.lane.b32.xlu1 %v2649_v56, %s2211_s5 }
 0x62b   :  { %1049 = vrot.lane.b32.xlu0 %v2693_v18, %s2213_s25  ;;  %1015 = vrot.lane.b32.xlu1 %v2714_v14, %s2211_s5 }
 0x62f   :  { %1029 = vrot.lane.b32.xlu1 %v2683_v31, %s2212_s23 }
 0x633   :  { %1031 = vrot.lane.b32.xlu1 %v2652_v59, %s2212_s23 }
 0x637   :  { %1033 = vrot.lane.b32.xlu1 %v2721_v55, %s2212_s23 }
 0x63b   :  { %1035 = vrot.lane.b32.xlu1 %v2718_v24, %s2212_s23 }
 0x63f   :  { %1051 = vrot.lane.b32.xlu1 %v2662_v57, %s2213_s25 }
 0x643   :  { %1055 = vrot.lane.b32.xlu1 %v990_v36, %s2213_s25 }
 0x693   :  { %v1482_v5 = vpop.xlane.xlu0 %1481 }
 0x694   :  { %v1491_v13 = vmul.f32 0.03125, %v1482_v5  ;;  %v1479_v19 = vpop.xlane.xlu1 %1478 }
 0x695   :  { %v1490_v56 = vmul.f32 0.03125, %v1479_v19 }
 0x696   :  { %v2779_v8 = vsub.f32 %v1474_v40, %v1491_v13 }
 0x697   :  { %v2781_v31 = vsub.f32 %v1473_v41, %v1490_v56 }
 0x698   :  { %v1499_v59 = vmul.f32 %v2779_v8, %v2779_v8 }
 0x699   :  { %v1498_v3 = vmul.f32 %v2781_v31, %v2781_v31 }
 0x69a   :  { %v1505_v18 = vsel %vm133_vm0, %v1499_v59, 0.0 }
 0x69b   :  { %1506 = vadd.xlane.f32.xlu0 %v1505_v18  ;;  %v1502_v51 = vsel %vm133_vm0, %v1498_v3, 0.0 }
 0x69e   :  { %v1488_v57 = vpop.xlane.xlu0 %1487 }
 0x69f   :  { %v1493_v50 = vmul.f32 0.03125, %v1488_v57  ;;  %v1485_v34 = vpop.xlane.xlu1 %1484  ;;  %1503 = vadd.xlane.f32.xlu0 %v1502_v51 }
 0x6a0   :  { %v1492_v52 = vmul.f32 0.03125, %v1485_v34 }
 0x6a1   :  { %v2789_v11 = vsub.f32 %v1476_v17, %v1493_v50  ;;  %v1631_v17 = vld [vmem:[%s2862_s9] ss:$0 sm:$0xff] }
 0x6a2   :  { %v2791_v49 = vsub.f32 %v1475_v37, %v1492_v52  ;;  %v1014_v33 = vpop.permute.xlu0 %1013 }
 0x6a3   :  { %v1010_v14 = vpop.permute.xlu1 %1009  ;;  %v1501_v23 = vmul.f32 %v2789_v11, %v2789_v11  ;;  %v1023_v4 = vadd.f32 %v1014_v33, %v2711_v15 }
 0x6a4   :  { %v1500_v55 = vmul.f32 %v2791_v49, %v2791_v49  ;;  %v1021_v36 = vadd.f32 %v1010_v14, %v2690_v42 }
 0x6a5   :  { %v1511_v24 = vsel %vm133_vm0, %v1501_v23, 0.0 }
 0x6a6   :  { %1512 = vadd.xlane.f32.xlu0 %v1511_v24  ;;  %v1508_v32 = vsel %vm133_vm0, %v1500_v55, 0.0  ;;  %v1050_v61 = vpop.permute.xlu0 %1049 }
 0x6a7   :  { %v1012_v54 = vpop.permute.xlu1 %1011 }
 0x6a8   :  { %v1022_v7 = vadd.f32 %v1012_v54, %v2659_v2 }
 0x6aa   :  { %1509 = vadd.xlane.f32.xlu0 %v1508_v32 }
 0x6ab   :  { %v1016_v35 = vpop.permute.xlu1 %1015 }
 0x6ac   :  { %v1024_v16 = vadd.f32 %v1016_v35, %v2727_v58 }
 0x6af   :  { %v1030_v39 = vpop.permute.xlu1 %1029 }
 0x6b0   :  { %v1041_v45 = vadd.f32 %v1030_v39, %v1021_v36 }
 0x6b2   :  { %v1061_v62 = vadd.f32 %v1050_v61, %v1041_v45 }
 0x6b3   :  { %v1032_v63 = vpop.permute.xlu1 %1031 }
 0x6b4   :  { %v1065_v0 = vmul.f32 0.25, %v1061_v62  ;;  %v1042_v10 = vadd.f32 %v1032_v63, %v1022_v7 }
 0x6b6   :  { %1069 = vst.msk [vmem:[#allocation12] sm:$0xff] %vm763_vm6, %v1065_v0 }
 0x6b7   :  { %v1034_v60 = vpop.permute.xlu1 %1033 }
 0x6b8   :  { %v1043_v6 = vadd.f32 %v1034_v60, %v1023_v4 }
 0x6bb   :  { %v1036_v38 = vpop.permute.xlu1 %1035 }
 0x6bc   :  { %v1044_v1 = vadd.f32 %v1036_v38, %v1024_v16 }
 0x6bf   :  { %v1052_v53 = vpop.permute.xlu1 %1051 }
 0x6c0   :  { %v1062_v42 = vadd.f32 %v1052_v53, %v1042_v10  ;;  %1053 = vrot.lane.b32.xlu0 %v2724_v30, %s2213_s25 }
 0x6c2   :  { %v1066_v20 = vmul.f32 0.25, %v1062_v42 }
 0x6c3   :  { %v1056_v21 = vpop.permute.xlu1 %1055 }
 0x6c4   :  { %1070 = vst.msk [vmem:[#allocation12 + $0x8] sm:$0xff] %vm763_vm6, %v1066_v20  ;;  %v1064_v15 = vadd.f32 %v1056_v21, %v1044_v1 }
 0x6c6   :  { %v1068_v22 = vmul.f32 0.25, %v1064_v15 }
 0x6c8   :  { %1072 = vst.msk [vmem:[#allocation12 + $0x18] sm:$0xff] %vm763_vm6, %v1068_v22 }
 0x728   :  { %v1507_v25 = vpop.xlane.xlu0 %1506 }
 0x729   :  { %v1515_v26 = vmul.f32 0.03125, %v1507_v25 }
 0x72b   :  { %v1519_v2 = vadd.f32 1e-05, %v1515_v26 }
 0x72c   :  { %v1504_v27 = vpop.xlane.xlu0 %1503 }
 0x72d   :  { %2027 = vrsqrt.f32 %v1519_v2  ;;  %v1514_v29 = vmul.f32 0.03125, %v1504_v27 }
 0x72f   :  { %v1518_v58 = vadd.f32 1e-05, %v1514_v29 }
 0x731   :  { %2029 = vrsqrt.f32 %v1518_v58 }
 0x733   :  { %v1513_v40 = vpop.xlane.xlu0 %1512 }
 0x734   :  { %v1517_v41 = vmul.f32 0.03125, %v1513_v40 }
 0x736   :  { %v1521_v30 = vadd.f32 1e-05, %v1517_v41 }
 0x737   :  { %v1510_v43 = vpop.xlane.xlu0 %1509  ;;  %v2028_v44 = vpop.eup %2027 }
 0x738   :  { %2031 = vrsqrt.f32 %v1521_v30  ;;  %v1516_v46 = vmul.f32 0.03125, %v1510_v43  ;;  %v1527_v12 = vmul.f32 %v2028_v44, %v2779_v8 }
 0x73a   :  { %v1520_v47 = vadd.f32 1e-05, %v1516_v46  ;;  %v1538_v37 = vmul.f32 %v1630_v28, %v1527_v12 }
 0x73b   :  { %v1054_v48 = vpop.permute.xlu0 %1053  ;;  %v2030_v9 = vpop.eup %2029 }
 0x73c   :  { %2033 = vrsqrt.f32 %v1520_v47  ;;  %v1063_v5 = vadd.f32 %v1054_v48, %v1043_v6  ;;  %v1526_v13 = vmul.f32 %v2030_v9, %v2781_v31  ;;  %v1549_v19 = vadd.f32 %v1631_v17, %v1538_v37 }
 0x73e   :  { %v1067_v56 = vmul.f32 0.25, %v1063_v5  ;;  %v1537_v59 = vmul.f32 %v1630_v28, %v1526_v13  ;;  %1553 = vst.msk [vmem:[#allocation11 + $0x8] sm:$0xff] %vm133_vm0, %v1549_v19 }
 0x740   :  { %1071 = vst.msk [vmem:[#allocation12 + $0x10] sm:$0xff] %vm763_vm6, %v1067_v56  ;;  %v1548_v8 = vadd.f32 %v1631_v17, %v1537_v59 }
 0x741   :  { %2156 = shalt.err (!%p2153_p2)
}
 0x742   :  { %s2157_s1 = scalar_lea.hbm %s2865_s12, 512 }
 0x743   :  { %p2158_p3 = scmp.ne.s32.totalorder %s2865_s12, %s2157_s1  ;;  %p2161_p4 = scmp.lt.u32.totalorder %s2157_s1, %s2865_s12 }
 0x745   :  { %p2163_p5 = pnand %p2161_p4, %p2158_p3 }
 0x747   :  { %2166 = shalt.err (!%p2163_p5)
}
 0x748   :  { %1579 = dma.vmem_to_hbm [thread:$0]  %s1574_s14, 512, %s2865_s12, [#allocation13], %s2201_s15, %s2201_s15, %s2202_s16   ;;  %v2032_v31 = vpop.eup %2031  ;;  %1552 = vst.msk [vmem:[#allocation11] sm:$0xff] %vm133_vm0, %v1548_v8 }
 0x749   :  { %v1529_v18 = vmul.f32 %v2032_v31, %v2789_v11  ;;  %v2034_v57 = vpop.eup %2033  ;;  %s2215_s30 = smov [#allocation11]  }
 0x74a   :  { %v1528_v50 = vmul.f32 %v2034_v57, %v2791_v49  ;;  %s1561_s10 = sshll.u32 %s2215_s30, 4  ;;  %s1562_s10 = int_to_ptr.vmem [resolvable:$true] %s1561_s10 }
 0x74b   :  { %v1540_v3 = vmul.f32 %v1630_v28, %v1529_v18  ;;  %s2167_s12 = scalar_lea.vmem %s1562_s10, 512  ;;  %p2172_p7 = scmp.lt.s32.totalorder %s1562_s10, %s1562_s10 }
 0x74c   :  { %v1539_v34 = vmul.f32 %v1630_v28, %v1528_v50  ;;  %p2168_p6 = scmp.ne.s32.totalorder %s1562_s10, %s2167_s12  ;;  %p2173_p8 = scmp.lt.s32.totalorder %s2167_s12, %s2167_s12 }
 0x74d   :  { %v1551_v51 = vadd.f32 %v1631_v17, %v1540_v3 }
 0x74e   :  { %v1550_v52 = vadd.f32 %v1631_v17, %v1539_v34  ;;  %p2174_p9 = por %p2173_p8, %p2172_p7 }
 0x74f   :  { %1555 = vst.msk [vmem:[#allocation11 + $0x18] sm:$0xff] %vm133_vm0, %v1551_v51 }
 0x750   :  { %1554 = vst.msk [vmem:[#allocation11 + $0x10] sm:$0xff] %vm133_vm0, %v1550_v52  ;;  %p2175_p10 = pnand %p2174_p9, %p2168_p6 }
 0x752   :  { %2178 = shalt.err (!%p2175_p10)
}
 0x753   :  { %s2179_s20 = scalar_lea.hbm %s2864_s11, 512 }
 0x754   :  { %p2180_p11 = scmp.ne.s32.totalorder %s2864_s11, %s2179_s20  ;;  %p2183_p12 = scmp.lt.u32.totalorder %s2179_s20, %s2864_s11 }
 0x756   :  { %p2185_p13 = pnand %p2183_p12, %p2180_p11 }
 0x758   :  { %2188 = shalt.err (!%p2185_p13)
}
 0x759   :  { %1567 = dma.vmem_to_hbm [thread:$0]  %s1562_s10, 512, %s2864_s11, [#allocation4], %s2201_s15, %s2201_s15, %s2202_s16  }
 0x75a   :  { %2195 = dma.done.wait [#allocation4], 512  }
 0x75b   :  { %2196 = vsyncadd [#allocation4], 4294966784 }
 0x75c   :  { %2197 = dma.done.wait [#allocation13], 512  }
 0x75d   :  { %2198 = vsyncadd [#allocation13], 4294966784 }
 0x75e   :  { %1586 = vsyncpa [#allocation3], 1 }
 0x75f   :  { %1587 = vsyncpa [#allocation6], 1 }
 0x760   :  { %1588 = vsyncpa [#allocation9], 1 }
 0x761   :  { %1589 = vsyncpa [#allocation4], 1 }
 0x762   :  { %1590 = vsyncpa [#allocation13], 1 }

</bundles_post_ra>
